<compile_context>
chip_gen: v5e
topology: v5e:2x2
jax: 0.10.0
libtpu: 0.0.40
codegen_flags: <defaults>
</compile_context>

<pallas_src>
import functools
import math

import jax
import jax.numpy as jnp
from jax.experimental import pallas as pl
from jax.experimental.pallas import tpu as pltpu


# ----------------------------------------------------------------------------
# Configuration (scaled-down ResNet-200D-style)
# ----------------------------------------------------------------------------
STAGE_STRIDES = (1, 2, 2, 2)
LAYERS = (1, 2, 1, 1)
STEM_WIDTH = 8
WIDTHS = (8, 16, 32, 64)
EXPANSION = 4
IN_CHANS = 3
OUT_DIM = 11
BN_EPS = 1e-5

LANE = 128       # channel dims are padded to multiples of this (lane width)
ROW_ALIGN = 16   # sublane alignment used for bf16 row (M) dims


# ----------------------------------------------------------------------------
# Small static helpers
# ----------------------------------------------------------------------------
def _round_up(x, m):
    return ((x + m - 1) // m) * m


def _choose_tile(size, cap, step):
    """Largest multiple of `step` that divides `size` and is <= cap.
    (`size` is either <= cap or a multiple of `step`.)"""
    if size <= cap:
        return size
    t = (cap // step) * step
    while size % t:
        t -= step
    return t


@functools.lru_cache(maxsize=None)
def _mxu_tile_cap():
    # 128-square tiles on v5e (4x128x128 MXU); 256 on v6e/v7x (2x256x256 MXU).
    try:
        kind = jax.devices()[0].device_kind.lower()
    except Exception:
        return 256
    return 128 if "v5" in kind else 256


# ----------------------------------------------------------------------------
# Pallas kernels
# ----------------------------------------------------------------------------
def _fused_matmul_kernel(*refs, relu, has_residual):
    """grid = (M tiles, N tiles, taps, K tiles); reduction over (taps, K)."""
    if has_residual:
        x_ref, w_ref, b_ref, r_ref, o_ref, acc_ref = refs
    else:
        x_ref, w_ref, b_ref, o_ref, acc_ref = refs
        r_ref = None
    t = pl.program_id(2)
    kc = pl.program_id(3)

    @pl.when(jnp.logical_and(t == 0, kc == 0))
    def _():
        acc_ref[...] = jnp.zeros_like(acc_ref)

    acc_ref[...] += jnp.dot(x_ref[...], w_ref[...],
                            preferred_element_type=jnp.float32)

    @pl.when(jnp.logical_and(t == pl.num_programs(2) - 1,
                             kc == pl.num_programs(3) - 1))
    def _():
        y = acc_ref[...] + b_ref[...]
        if has_residual:
            y = y + r_ref[...].astype(jnp.float32)
        if relu:
            y = jnp.maximum(y, 0.0)
        o_ref[...] = y.astype(o_ref.dtype)


def _max_pool_kernel(x_ref, o_ref):
    # x: (k*k, tm, C) -> max over the window-offset axis
    o_ref[...] = jnp.max(x_ref[...], axis=0)


def _avg_pool_kernel(x_ref, cnt_ref, o_ref):
    # x: (k*k, tm, C); cnt: (tm, 1) = number of valid taps per output position
    s = jnp.sum(x_ref[...].astype(jnp.float32), axis=0)
    inv = pl.reciprocal(cnt_ref[...], approx=True)   # EUP slot, off the VALU path
    o_ref[...] = (s * inv).astype(o_ref.dtype)


def _global_avg_kernel(x_ref, o_ref):
    # x: (N, H*W, cb) -> mean over the spatial axis (AdaptiveAvgPool2d(1))
    o_ref[...] = jnp.mean(x_ref[...].astype(jnp.float32),
                          axis=1).astype(o_ref.dtype)


# ----------------------------------------------------------------------------
# Fused (tap-accumulating) matmul wrapper
# ----------------------------------------------------------------------------
def fused_matmul(x_taps, w, bias, *, residual=None, relu=False,
                 out_dtype=jnp.bfloat16):
    """out = sum_t x_taps[t] @ w[t] + bias (+ residual) (optionally ReLU).

    x_taps: (T, M, K) bf16     w: (T, K, Ncol) bf16 (BN scale already folded)
    bias:   (1, Ncol) f32      residual: (M, Ncol) or None
    Ncol is a multiple of 128; K is a multiple of 128 (or a small full dim).
    """
    T, M, K = x_taps.shape
    Tw, Kw, Ncol = w.shape
    assert T == Tw and K == Kw and Ncol % LANE == 0

    cap = _mxu_tile_cap()
    Mp = _round_up(M, ROW_ALIGN)
    tm = _choose_tile(Mp, cap, ROW_ALIGN)
    tn = _choose_tile(Ncol, cap, LANE)
    tk = _choose_tile(K, 512, LANE) if K % LANE == 0 else K

    if Mp != M:
        x_taps = jnp.pad(x_taps, ((0, 0), (0, Mp - M), (0, 0)))
        if residual is not None:
            residual = jnp.pad(residual, ((0, Mp - M), (0, 0)))

    grid = (Mp // tm, Ncol // tn, T, K // tk)

    in_specs = [
        pl.BlockSpec((None, tm, tk), lambda i, j, t, kc: (t, i, kc)),
        pl.BlockSpec((None, tk, tn), lambda i, j, t, kc: (t, kc, j)),
        pl.BlockSpec((1, tn), lambda i, j, t, kc: (0, j)),
    ]
    args = [x_taps, w, bias]
    if residual is not None:
        in_specs.append(pl.BlockSpec((tm, tn), lambda i, j, t, kc: (i, j)))
        args.append(residual)

    out = pl.pallas_call(
        functools.partial(_fused_matmul_kernel, relu=relu,
                          has_residual=residual is not None),
        out_shape=jax.ShapeDtypeStruct((Mp, Ncol), out_dtype),
        grid=grid,
        in_specs=in_specs,
        out_specs=pl.BlockSpec((tm, tn), lambda i, j, t, kc: (i, j)),
        scratch_shapes=[pltpu.VMEM((tm, tn), jnp.float32)],
        compiler_params=pltpu.CompilerParams(
            dimension_semantics=("parallel", "parallel",
                                 "arbitrary", "arbitrary"),
            vmem_limit_bytes=32 * 1024 * 1024),
    )(*args)
    return out[:M] if Mp != M else out


# ----------------------------------------------------------------------------
# Conv / pooling wrappers
# ----------------------------------------------------------------------------
def _extract_patches(xpad, ksize, stride, oh, ow):
    """k*k shifted strided views of the spatially padded NHWC tensor."""
    span_h = stride * (oh - 1) + 1
    span_w = stride * (ow - 1) + 1
    pats = []
    for dh in range(ksize):
        for dw in range(ksize):
            pats.append(xpad[:, dh:dh + span_h:stride, dw:dw + span_w:stride, :])
    return jnp.stack(pats, axis=0)   # (k*k, N, oh, ow, C)


def conv_bn(x, p, *, stride, relu, residual=None, stem_fold=False):
    """Conv2d(no bias) + folded BN (+ fused residual add) (+ ReLU)."""
    w, b = p["w"], p["b"]
    N, H, W, Cin = x.shape
    coutp = w.shape[2]

    if stem_fold:
        # tiny-Cin stem conv: classic im2col with K = kh*kw*Cin padded to 128
        ksize = 3
        pad = 1
        oh = (H + 2 * pad - ksize) // stride + 1
        ow = (W + 2 * pad - ksize) // stride + 1
        xpad = jnp.pad(x, ((0, 0), (pad, pad), (pad, pad), (0, 0)))
        pats = _extract_patches(xpad, ksize, stride, oh, ow)
        cols = jnp.transpose(pats, (1, 2, 3, 0, 4)).reshape(
            N * oh * ow, ksize * ksize * Cin)
        cols = jnp.pad(cols, ((0, 0), (0, w.shape[1] - cols.shape[1])))
        xt = cols[None]                                   # (1, M, Kp)
    else:
        T = w.shape[0]
        ksize = int(round(math.sqrt(T)))
        if ksize == 1:
            if stride != 1:
                x = x[:, ::stride, ::stride, :]
            N, H, W, Cin = x.shape
            oh, ow = H, W
            xt = x.reshape(1, N * H * W, Cin)             # no im2col at all
        else:
            pad = (ksize - 1) // 2
            oh = (H + 2 * pad - ksize) // stride + 1
            ow = (W + 2 * pad - ksize) // stride + 1
            xpad = jnp.pad(x, ((0, 0), (pad, pad), (pad, pad), (0, 0)))
            # (T, M, Cin): taps are accumulated inside the matmul grid.
            xt = _extract_patches(xpad, ksize, stride, oh, ow).reshape(
                ksize * ksize, N * oh * ow, Cin)

    res2d = None
    if residual is not None:
        res2d = residual.reshape(N * oh * ow, coutp)
    y = fused_matmul(xt, w, b, residual=res2d, relu=relu,
                     out_dtype=jnp.bfloat16)
    return y.reshape(N, oh, ow, coutp)


def max_pool_3x3_s2(x):
    """MaxPool2d(kernel_size=3, stride=2, padding=1), gridded over row tiles."""
    N, H, W, C = x.shape
    k, s, pad = 3, 2, 1
    oh = (H + 2 * pad - k) // s + 1
    ow = (W + 2 * pad - k) // s + 1
    xpad = jnp.pad(x, ((0, 0), (pad, pad), (pad, pad), (0, 0)),
                   constant_values=-jnp.inf)
    pats = _extract_patches(xpad, k, s, oh, ow).reshape(k * k, N * oh * ow, C)
    M = N * oh * ow
    Mp = _round_up(M, ROW_ALIGN)
    tm = _choose_tile(Mp, 512, ROW_ALIGN)
    if Mp != M:
        pats = jnp.pad(pats, ((0, 0), (0, Mp - M), (0, 0)))
    out = pl.pallas_call(
        _max_pool_kernel,
        out_shape=jax.ShapeDtypeStruct((Mp, C), x.dtype),
        grid=(Mp // tm,),
        in_specs=[pl.BlockSpec((k * k, tm, C), lambda i: (0, i, 0))],
        out_specs=pl.BlockSpec((tm, C), lambda i: (i, 0)),
        compiler_params=pltpu.CompilerParams(
            dimension_semantics=("parallel",)),
    )(pats)
    return out[:M].reshape(N, oh, ow, C)


def avg_pool_2x2_ceil(x, stride):
    """AvgPool2d(2, stride, ceil_mode=True, count_include_pad=False)."""
    N, H, W, C = x.shape
    k = 2
    oh = math.ceil((H - k) / stride) + 1
    ow = math.ceil((W - k) / stride) + 1
    if (oh - 1) * stride >= H:
        oh -= 1
    if (ow - 1) * stride >= W:
        ow -= 1
    hp = (oh - 1) * stride + k
    wp = (ow - 1) * stride + k
    xpad = jnp.pad(x, ((0, 0), (0, hp - H), (0, wp - W), (0, 0)))
    pats = _extract_patches(xpad, k, stride, oh, ow).reshape(
        k * k, N * oh * ow, C)
    # per-output-position valid-tap count (depends only on geometry; tiny)
    ones = jnp.ones((1, H, W, 1), jnp.float32)
    opad = jnp.pad(ones, ((0, 0), (0, hp - H), (0, wp - W), (0, 0)))
    cnt = jnp.sum(_extract_patches(opad, k, stride, oh, ow), axis=0)
    cnt = jnp.broadcast_to(cnt, (N, oh, ow, 1)).reshape(N * oh * ow, 1)

    M = N * oh * ow
    Mp = _round_up(M, ROW_ALIGN)
    tm = _choose_tile(Mp, 512, ROW_ALIGN)
    if Mp != M:
        pats = jnp.pad(pats, ((0, 0), (0, Mp - M), (0, 0)))
        cnt = jnp.pad(cnt, ((0, Mp - M), (0, 0)), constant_values=1.0)
    out = pl.pallas_call(
        _avg_pool_kernel,
        out_shape=jax.ShapeDtypeStruct((Mp, C), x.dtype),
        grid=(Mp // tm,),
        in_specs=[pl.BlockSpec((k * k, tm, C), lambda i: (0, i, 0)),
                  pl.BlockSpec((tm, 1), lambda i: (i, 0))],
        out_specs=pl.BlockSpec((tm, C), lambda i: (i, 0)),
        compiler_params=pltpu.CompilerParams(
            dimension_semantics=("parallel",)),
    )(pats, cnt)
    return out[:M].reshape(N, oh, ow, C)


def global_avg_pool(x):
    """AdaptiveAvgPool2d(1), gridded over channel (lane) tiles."""
    N, H, W, C = x.shape
    x2 = x.reshape(N, H * W, C)
    cb = _choose_tile(C, 512, LANE)
    return pl.pallas_call(
        _global_avg_kernel,
        out_shape=jax.ShapeDtypeStruct((N, C), x.dtype),
        grid=(C // cb,),
        in_specs=[pl.BlockSpec((N, H * W, cb), lambda i: (0, 0, i))],
        out_specs=pl.BlockSpec((N, cb), lambda i: (0, i)),
        compiler_params=pltpu.CompilerParams(
            dimension_semantics=("parallel",)),
    )(x2)


# ----------------------------------------------------------------------------
# Model forward
# ----------------------------------------------------------------------------
def bottleneck(x, p, *, stride):
    if p["downsample"] is not None:
        sc = avg_pool_2x2_ceil(x, stride) if stride != 1 else x
        shortcut = conv_bn(sc, p["downsample"], stride=1, relu=False)
    else:
        shortcut = x
    out = conv_bn(x, p["conv1"], stride=1, relu=True)
    out = conv_bn(out, p["conv2"], stride=stride, relu=True)
    # conv3 + BN + residual add + ReLU fused into one matmul epilogue
    return conv_bn(out, p["conv3"], stride=1, relu=True, residual=shortcut)


def resnet_forward(params, x_nchw):
    x = jnp.transpose(x_nchw, (0, 2, 3, 1)).astype(jnp.bfloat16)  # NCHW->NHWC
    # deep stem (conv-BN-ReLU x3) + maxpool
    x = conv_bn(x, params["stem"][0], stride=2, relu=True, stem_fold=True)
    x = conv_bn(x, params["stem"][1], stride=1, relu=True)
    x = conv_bn(x, params["stem"][2], stride=1, relu=True)
    x = max_pool_3x3_s2(x)
    # 4 bottleneck stages
    for stage, stage_stride in zip(params["stages"], STAGE_STRIDES):
        for bi, bp in enumerate(stage):
            x = bottleneck(x, bp, stride=stage_stride if bi == 0 else 1)
    # pooling + fc head (self.pooling / self.fc of the PyTorch module)
    pooled = global_avg_pool(x)                        # (bs, n_features_padded)
    fc = params["fc"]
    logits = fused_matmul(pooled[None], fc["w"], fc["b"], relu=False,
                          out_dtype=jnp.float32)
    return logits[:, :OUT_DIM]


# ----------------------------------------------------------------------------
# Deterministic parameter init (BN folded, padded, bf16, tap-major layout)
# ----------------------------------------------------------------------------
def _fold_bn(kit, kh, kw, cin, cout):
    fan_in = kh * kw * cin
    w = jax.random.normal(next(kit), (kh, kw, cin, cout),
                          jnp.float32) / math.sqrt(fan_in)
    gamma = 1.0 + 0.1 * jax.random.normal(next(kit), (cout,), jnp.float32)
    beta = 0.1 * jax.random.normal(next(kit), (cout,), jnp.float32)
    mean = 0.1 * jax.random.normal(next(kit), (cout,), jnp.float32)
    var = 1.0 + 0.1 * jnp.abs(jax.random.normal(next(kit), (cout,), jnp.float32))
    scale = gamma / jnp.sqrt(var + BN_EPS)
    bias = beta - mean * scale
    return w * scale, bias           # BN scale folded into the conv weight


def _conv_bn_params(kit, kh, kw, cin, cout, *, fold_taps_into_k=False):
    w, bias = _fold_bn(kit, kh, kw, cin, cout)
    coutp = _round_up(cout, LANE)
    if fold_taps_into_k:
        kp = _round_up(kh * kw * cin, LANE)
        wp = jnp.pad(w.reshape(kh * kw * cin, cout),
                     ((0, kp - kh * kw * cin), (0, coutp - cout)))[None]
    else:
        cinp = _round_up(cin, LANE)
        wp = jnp.pad(w, ((0, 0), (0, 0), (0, cinp - cin), (0, coutp - cout)))
        wp = wp.reshape(kh * kw, cinp, coutp)
    bp = jnp.pad(bias, (0, coutp - cout)).reshape(1, coutp)
    return {"w": wp.astype(jnp.bfloat16), "b": bp.astype(jnp.float32)}


def init_params(key):
    counter = [0]

    def key_gen():
        while True:
            counter[0] += 1
            yield jax.random.fold_in(key, counter[0])

    kit = key_gen()
    params = {}
    params["stem"] = [
        _conv_bn_params(kit, 3, 3, IN_CHANS, STEM_WIDTH, fold_taps_into_k=True),
        _conv_bn_params(kit, 3, 3, STEM_WIDTH, STEM_WIDTH),
        _conv_bn_params(kit, 3, 3, STEM_WIDTH, WIDTHS[0]),
    ]
    stages = []
    in_ch = WIDTHS[0]
    for si, (nblocks, planes) in enumerate(zip(LAYERS, WIDTHS)):
        out_ch = planes * EXPANSION
        blocks = []
        for bi in range(nblocks):
            stride = STAGE_STRIDES[si] if bi == 0 else 1
            blocks.append({
                "conv1": _conv_bn_params(kit, 1, 1, in_ch, planes),
                "conv2": _conv_bn_params(kit, 3, 3, planes, planes),
                "conv3": _conv_bn_params(kit, 1, 1, planes, out_ch),
                "downsample": (_conv_bn_params(kit, 1, 1, in_ch, out_ch)
                               if (stride != 1 or in_ch != out_ch) else None),
            })
            in_ch = out_ch
        stages.append(blocks)
    params["stages"] = stages

    n_features = in_ch               # == fc.in_features in the PyTorch module
    nfp = _round_up(n_features, LANE)
    odp = _round_up(OUT_DIM, LANE)
    fw = jax.random.normal(next(kit), (n_features, OUT_DIM),
                           jnp.float32) / math.sqrt(n_features)
    fb = 0.01 * jax.random.normal(next(kit), (OUT_DIM,), jnp.float32)
    params["fc"] = {
        "w": jnp.pad(fw, ((0, nfp - n_features),
                          (0, odp - OUT_DIM)))[None].astype(jnp.bfloat16),
        "b": jnp.pad(fb, (0, odp - OUT_DIM)).reshape(1, odp).astype(jnp.float32),
    }
    return params


# ----------------------------------------------------------------------------
if __name__ == "__main__":
    key = jax.random.PRNGKey(0)
    params = init_params(key)
    x = jax.random.normal(jax.random.fold_in(key, 12345),
                          (2, IN_CHANS, 16, 16), jnp.float32)

    fwd = jax.jit(resnet_forward)
    out = jax.block_until_ready(fwd(params, x))

    assert out.shape == (2, OUT_DIM), out.shape
    assert bool(jnp.all(jnp.isfinite(out)))
    print("KERNEL_OK")
</pallas_src>

<mosaic_0001>
module attributes {stable_mosaic.version = 11 : i64} {
  func.func @_fused_matmul_kernel(%arg0: i32, %arg1: i32, %arg2: i32, %arg3: i32, %arg4: memref<1x128x128xbf16, #tpu.memory_space<vmem>>, %arg5: memref<1x128x128xbf16, #tpu.memory_space<vmem>>, %arg6: memref<1x128xf32, #tpu.memory_space<vmem>>, %arg7: memref<128x128xbf16, #tpu.memory_space<vmem>>, %arg8: memref<128x128xf32, #tpu.memory_space<vmem>>) attributes {dimension_semantics = [#tpu.dimension_semantics<parallel>, #tpu.dimension_semantics<parallel>, #tpu.dimension_semantics<arbitrary>, #tpu.dimension_semantics<arbitrary>], iteration_bounds = array<i64: 1, 1, 1, 1>, scalar_prefetch = 0 : i64, scratch_operands = 1 : i64, tpu.core_type = #tpu.core_type<tc>, window_params = [{transform_indices = @transform_0, window_bounds = array<i64: 1, 128, 128>}, {transform_indices = @transform_1, window_bounds = array<i64: 1, 128, 128>}, {transform_indices = @transform_2, window_bounds = array<i64: 1, 128>}, {transform_indices = @transform_3, window_bounds = array<i64: 128, 128>}]} {
    %c0_i32 = arith.constant 0 : i32
    %0 = arith.cmpi eq, %arg2, %c0_i32 : i32
    %c0_i32_0 = arith.constant 0 : i32
    %1 = arith.cmpi eq, %arg3, %c0_i32_0 : i32
    %2 = arith.andi %0, %1 : i1
    %3 = arith.extui %2 : i1 to i32
    %c0_i32_1 = arith.constant 0 : i32
    %4 = arith.cmpi ne, %3, %c0_i32_1 : i32
    scf.if %4 {
      %cst_14 = arith.constant 0.000000e+00 : f32
      %18 = vector.broadcast %cst_14 : f32 to vector<128x128xf32>
      %c0_15 = arith.constant 0 : index
      %c0_16 = arith.constant 0 : index
      %19 = vector.load %arg8[%c0_15, %c0_16] : memref<128x128xf32, #tpu.memory_space<vmem>>, vector<128x128xf32>
      tpu.vector_store %arg8[%c0_15, %c0_16], %18 {strides = array<i32>} : memref<128x128xf32, #tpu.memory_space<vmem>>, vector<128x128xf32>,
    } else {
    }
    %c0 = arith.constant 0 : index
    %c0_2 = arith.constant 0 : index
    %5 = vector.load %arg8[%c0, %c0_2] : memref<128x128xf32, #tpu.memory_space<vmem>>, vector<128x128xf32>
    %c0_3 = arith.constant 0 : index
    %c0_4 = arith.constant 0 : index
    %c0_5 = arith.constant 0 : index
    %6 = vector.load %arg4[%c0_3, %c0_4, %c0_5] : memref<1x128x128xbf16, #tpu.memory_space<vmem>>, vector<1x128x128xbf16>
    %7 = vector.shape_cast %6 : vector<1x128x128xbf16> to vector<128x128xbf16>
    %c0_6 = arith.constant 0 : index
    %c0_7 = arith.constant 0 : index
    %c0_8 = arith.constant 0 : index
    %8 = vector.load %arg5[%c0_6, %c0_7, %c0_8] : memref<1x128x128xbf16, #tpu.memory_space<vmem>>, vector<1x128x128xbf16>
    %9 = vector.shape_cast %8 : vector<1x128x128xbf16> to vector<128x128xbf16>
    %cst = arith.constant dense<0.000000e+00> : vector<128x128xf32>
    %10 = tpu.matmul %7, %9, %cst {dimension_numbers = #tpu.dot_dimension_numbers<[1], [0], [0], [1], [0, 0, 1, 1], [], []>} : vector<128x128xbf16>, vector<128x128xbf16>, vector<128x128xf32> -> vector<128x128xf32>
    %11 = arith.addf %5, %10 : vector<128x128xf32>
    %c0_9 = arith.constant 0 : index
    %c0_10 = arith.constant 0 : index
    %12 = vector.load %arg8[%c0_9, %c0_10] : memref<128x128xf32, #tpu.memory_space<vmem>>, vector<128x128xf32>
    tpu.vector_store %arg8[%c0_9, %c0_10], %11 {strides = array<i32>} : memref<128x128xf32, #tpu.memory_space<vmem>>, vector<128x128xf32>,
    %c0_i32_11 = arith.constant 0 : i32
    %13 = arith.cmpi eq, %arg2, %c0_i32_11 : i32
    %c0_i32_12 = arith.constant 0 : i32
    %14 = arith.cmpi eq, %arg3, %c0_i32_12 : i32
    %15 = arith.andi %13, %14 : i1
    %16 = arith.extui %15 : i1 to i32
    %c0_i32_13 = arith.constant 0 : i32
    %17 = arith.cmpi ne, %16, %c0_i32_13 : i32
    scf.if %17 {
      %c0_14 = arith.constant 0 : index
      %c0_15 = arith.constant 0 : index
      %18 = vector.load %arg8[%c0_14, %c0_15] : memref<128x128xf32, #tpu.memory_space<vmem>>, vector<128x128xf32>
      %c0_16 = arith.constant 0 : index
      %c0_17 = arith.constant 0 : index
      %19 = vector.load %arg6[%c0_16, %c0_17] : memref<1x128xf32, #tpu.memory_space<vmem>>, vector<1x128xf32>
      %20 = vector.broadcast %19 : vector<1x128xf32> to vector<128x128xf32>
      %21 = arith.addf %18, %20 : vector<128x128xf32>
      %cst_18 = arith.constant 0.000000e+00 : f32
      %22 = vector.broadcast %cst_18 : f32 to vector<128x128xf32>
      %23 = arith.maximumf %21, %22 : vector<128x128xf32>
      %24 = arith.truncf %23 : vector<128x128xf32> to vector<128x128xbf16>
      %c0_19 = arith.constant 0 : index
      %c0_20 = arith.constant 0 : index
      %25 = vector.load %arg7[%c0_19, %c0_20] : memref<128x128xbf16, #tpu.memory_space<vmem>>, vector<128x128xbf16>
      tpu.vector_store %arg7[%c0_19, %c0_20], %24 {strides = array<i32>} : memref<128x128xbf16, #tpu.memory_space<vmem>>, vector<128x128xbf16>,
    } else {
    }
    return
  }
  func.func @transform_0(%arg0: i32, %arg1: i32, %arg2: i32, %arg3: i32) -> (i32, i32, i32) {
    %c0_i32 = arith.constant 0 : i32
    return %arg2, %arg0, %arg3 : i32, i32, i32
  }
  func.func @transform_1(%arg0: i32, %arg1: i32, %arg2: i32, %arg3: i32) -> (i32, i32, i32) {
    %c0_i32 = arith.constant 0 : i32
    return %arg2, %arg3, %arg1 : i32, i32, i32
  }
  func.func @transform_2(%arg0: i32, %arg1: i32, %arg2: i32, %arg3: i32) -> (i32, i32) {
    %c0_i32 = arith.constant 0 : i32
    %c0_i32_0 = arith.constant 0 : i32
    return %c0_i32, %arg1 : i32, i32
  }
  func.func @transform_3(%arg0: i32, %arg1: i32, %arg2: i32, %arg3: i32) -> (i32, i32) {
    %c0_i32 = arith.constant 0 : i32
    return %arg0, %arg1 : i32, i32
  }
}

module attributes {stable_mosaic.version = 11 : i64} {
  func.func @_fused_matmul_kernel(%arg0: i32, %arg1: i32, %arg2: i32, %arg3: i32, %arg4: memref<1x128x128xbf16, #tpu.memory_space<vmem>>, %arg5: memref<1x128x128xbf16, #tpu.memory_space<vmem>>, %arg6: memref<1x128xf32, #tpu.memory_space<vmem>>, %arg7: memref<128x128xbf16, #tpu.memory_space<vmem>>, %arg8: memref<128x128xf32, #tpu.memory_space<vmem>>) attributes {dimension_semantics = [#tpu.dimension_semantics<parallel>, #tpu.dimension_semantics<parallel>, #tpu.dimension_semantics<arbitrary>, #tpu.dimension_semantics<arbitrary>], iteration_bounds = array<i64: 1, 1, 9, 1>, scalar_prefetch = 0 : i64, scratch_operands = 1 : i64, tpu.core_type = #tpu.core_type<tc>, window_params = [{transform_indices = @transform_0, window_bounds = array<i64: 1, 128, 128>}, {transform_indices = @transform_1, window_bounds = array<i64: 1, 128, 128>}, {transform_indices = @transform_2, window_bounds = array<i64: 1, 128>}, {transform_indices = @transform_3, window_bounds = array<i64: 128, 128>}]} {
    %c0_i32 = arith.constant 0 : i32
    %0 = arith.cmpi eq, %arg2, %c0_i32 : i32
    %c0_i32_0 = arith.constant 0 : i32
    %1 = arith.cmpi eq, %arg3, %c0_i32_0 : i32
    %2 = arith.andi %0, %1 : i1
    %3 = arith.extui %2 : i1 to i32
    %c0_i32_1 = arith.constant 0 : i32
    %4 = arith.cmpi ne, %3, %c0_i32_1 : i32
    scf.if %4 {
      %cst_13 = arith.constant 0.000000e+00 : f32
      %18 = vector.broadcast %cst_13 : f32 to vector<128x128xf32>
      %c0_14 = arith.constant 0 : index
      %c0_15 = arith.constant 0 : index
      %19 = vector.load %arg8[%c0_14, %c0_15] : memref<128x128xf32, #tpu.memory_space<vmem>>, vector<128x128xf32>
      tpu.vector_store %arg8[%c0_14, %c0_15], %18 {strides = array<i32>} : memref<128x128xf32, #tpu.memory_space<vmem>>, vector<128x128xf32>,
    } else {
    }
    %c0 = arith.constant 0 : index
    %c0_2 = arith.constant 0 : index
    %5 = vector.load %arg8[%c0, %c0_2] : memref<128x128xf32, #tpu.memory_space<vmem>>, vector<128x128xf32>
    %c0_3 = arith.constant 0 : index
    %c0_4 = arith.constant 0 : index
    %c0_5 = arith.constant 0 : index
    %6 = vector.load %arg4[%c0_3, %c0_4, %c0_5] : memref<1x128x128xbf16, #tpu.memory_space<vmem>>, vector<1x128x128xbf16>
    %7 = vector.shape_cast %6 : vector<1x128x128xbf16> to vector<128x128xbf16>
    %c0_6 = arith.constant 0 : index
    %c0_7 = arith.constant 0 : index
    %c0_8 = arith.constant 0 : index
    %8 = vector.load %arg5[%c0_6, %c0_7, %c0_8] : memref<1x128x128xbf16, #tpu.memory_space<vmem>>, vector<1x128x128xbf16>
    %9 = vector.shape_cast %8 : vector<1x128x128xbf16> to vector<128x128xbf16>
    %cst = arith.constant dense<0.000000e+00> : vector<128x128xf32>
    %10 = tpu.matmul %7, %9, %cst {dimension_numbers = #tpu.dot_dimension_numbers<[1], [0], [0], [1], [0, 0, 1, 1], [], []>} : vector<128x128xbf16>, vector<128x128xbf16>, vector<128x128xf32> -> vector<128x128xf32>
    %11 = arith.addf %5, %10 : vector<128x128xf32>
    %c0_9 = arith.constant 0 : index
    %c0_10 = arith.constant 0 : index
    %12 = vector.load %arg8[%c0_9, %c0_10] : memref<128x128xf32, #tpu.memory_space<vmem>>, vector<128x128xf32>
    tpu.vector_store %arg8[%c0_9, %c0_10], %11 {strides = array<i32>} : memref<128x128xf32, #tpu.memory_space<vmem>>, vector<128x128xf32>,
    %c8_i32 = arith.constant 8 : i32
    %13 = arith.cmpi eq, %arg2, %c8_i32 : i32
    %c0_i32_11 = arith.constant 0 : i32
    %14 = arith.cmpi eq, %arg3, %c0_i32_11 : i32
    %15 = arith.andi %13, %14 : i1
    %16 = arith.extui %15 : i1 to i32
    %c0_i32_12 = arith.constant 0 : i32
    %17 = arith.cmpi ne, %16, %c0_i32_12 : i32
    scf.if %17 {
      %c0_13 = arith.constant 0 : index
      %c0_14 = arith.constant 0 : index
      %18 = vector.load %arg8[%c0_13, %c0_14] : memref<128x128xf32, #tpu.memory_space<vmem>>, vector<128x128xf32>
      %c0_15 = arith.constant 0 : index
      %c0_16 = arith.constant 0 : index
      %19 = vector.load %arg6[%c0_15, %c0_16] : memref<1x128xf32, #tpu.memory_space<vmem>>, vector<1x128xf32>
      %20 = vector.broadcast %19 : vector<1x128xf32> to vector<128x128xf32>
      %21 = arith.addf %18, %20 : vector<128x128xf32>
      %cst_17 = arith.constant 0.000000e+00 : f32
      %22 = vector.broadcast %cst_17 : f32 to vector<128x128xf32>
      %23 = arith.maximumf %21, %22 : vector<128x128xf32>
      %24 = arith.truncf %23 : vector<128x128xf32> to vector<128x128xbf16>
      %c0_18 = arith.constant 0 : index
      %c0_19 = arith.constant 0 : index
      %25 = vector.load %arg7[%c0_18, %c0_19] : memref<128x128xbf16, #tpu.memory_space<vmem>>, vector<128x128xbf16>
      tpu.vector_store %arg7[%c0_18, %c0_19], %24 {strides = array<i32>} : memref<128x128xbf16, #tpu.memory_space<vmem>>, vector<128x128xbf16>,
    } else {
    }
    return
  }
  func.func @transform_0(%arg0: i32, %arg1: i32, %arg2: i32, %arg3: i32) -> (i32, i32, i32) {
    %c0_i32 = arith.constant 0 : i32
    return %arg2, %arg0, %arg3 : i32, i32, i32
  }
  func.func @transform_1(%arg0: i32, %arg1: i32, %arg2: i32, %arg3: i32) -> (i32, i32, i32) {
    %c0_i32 = arith.constant 0 : i32
    return %arg2, %arg3, %arg1 : i32, i32, i32
  }
  func.func @transform_2(%arg0: i32, %arg1: i32, %arg2: i32, %arg3: i32) -> (i32, i32) {
    %c0_i32 = arith.constant 0 : i32
    %c0_i32_0 = arith.constant 0 : i32
    return %c0_i32, %arg1 : i32, i32
  }
  func.func @transform_3(%arg0: i32, %arg1: i32, %arg2: i32, %arg3: i32) -> (i32, i32) {
    %c0_i32 = arith.constant 0 : i32
    return %arg0, %arg1 : i32, i32
  }
}

module attributes {stable_mosaic.version = 11 : i64} {
  func.func @_max_pool_kernel(%arg0: i32, %arg1: memref<9x32x128xbf16, #tpu.memory_space<vmem>>, %arg2: memref<32x128xbf16, #tpu.memory_space<vmem>>) attributes {dimension_semantics = [#tpu.dimension_semantics<parallel>], iteration_bounds = array<i64: 1>, scalar_prefetch = 0 : i64, scratch_operands = 0 : i64, tpu.core_type = #tpu.core_type<tc>, window_params = [{transform_indices = @transform_0, window_bounds = array<i64: 9, 32, 128>}, {transform_indices = @transform_1, window_bounds = array<i64: 32, 128>}]} {
    %c0 = arith.constant 0 : index
    %c0_0 = arith.constant 0 : index
    %c0_1 = arith.constant 0 : index
    %0 = vector.load %arg1[%c0, %c0_0, %c0_1] : memref<9x32x128xbf16, #tpu.memory_space<vmem>>, vector<9x32x128xbf16>
    %cst = arith.constant dense<0xFF80> : vector<32x128xbf16>
    %1 = vector.multi_reduction <maximumf>, %0, %cst [0] : vector<9x32x128xbf16> to vector<32x128xbf16>
    %c0_2 = arith.constant 0 : index
    %c0_3 = arith.constant 0 : index
    %2 = vector.load %arg2[%c0_2, %c0_3] : memref<32x128xbf16, #tpu.memory_space<vmem>>, vector<32x128xbf16>
    tpu.vector_store %arg2[%c0_2, %c0_3], %1 {strides = array<i32>} : memref<32x128xbf16, #tpu.memory_space<vmem>>, vector<32x128xbf16>,
    return
  }
  func.func @transform_0(%arg0: i32) -> (i32, i32, i32) {
    %c0_i32 = arith.constant 0 : i32
    %c0_i32_0 = arith.constant 0 : i32
    %c0_i32_1 = arith.constant 0 : i32
    return %c0_i32, %arg0, %c0_i32_0 : i32, i32, i32
  }
  func.func @transform_1(%arg0: i32) -> (i32, i32) {
    %c0_i32 = arith.constant 0 : i32
    %c0_i32_0 = arith.constant 0 : i32
    return %arg0, %c0_i32 : i32, i32
  }
}

module attributes {stable_mosaic.version = 11 : i64} {
  func.func @_fused_matmul_kernel(%arg0: i32, %arg1: i32, %arg2: i32, %arg3: i32, %arg4: memref<1x32x128xbf16, #tpu.memory_space<vmem>>, %arg5: memref<1x128x128xbf16, #tpu.memory_space<vmem>>, %arg6: memref<1x128xf32, #tpu.memory_space<vmem>>, %arg7: memref<32x128xbf16, #tpu.memory_space<vmem>>, %arg8: memref<32x128xf32, #tpu.memory_space<vmem>>) attributes {dimension_semantics = [#tpu.dimension_semantics<parallel>, #tpu.dimension_semantics<parallel>, #tpu.dimension_semantics<arbitrary>, #tpu.dimension_semantics<arbitrary>], iteration_bounds = array<i64: 1, 1, 1, 1>, scalar_prefetch = 0 : i64, scratch_operands = 1 : i64, tpu.core_type = #tpu.core_type<tc>, window_params = [{transform_indices = @transform_0, window_bounds = array<i64: 1, 32, 128>}, {transform_indices = @transform_1, window_bounds = array<i64: 1, 128, 128>}, {transform_indices = @transform_2, window_bounds = array<i64: 1, 128>}, {transform_indices = @transform_3, window_bounds = array<i64: 32, 128>}]} {
    %c0_i32 = arith.constant 0 : i32
    %0 = arith.cmpi eq, %arg2, %c0_i32 : i32
    %c0_i32_0 = arith.constant 0 : i32
    %1 = arith.cmpi eq, %arg3, %c0_i32_0 : i32
    %2 = arith.andi %0, %1 : i1
    %3 = arith.extui %2 : i1 to i32
    %c0_i32_1 = arith.constant 0 : i32
    %4 = arith.cmpi ne, %3, %c0_i32_1 : i32
    scf.if %4 {
      %cst_14 = arith.constant 0.000000e+00 : f32
      %18 = vector.broadcast %cst_14 : f32 to vector<32x128xf32>
      %c0_15 = arith.constant 0 : index
      %c0_16 = arith.constant 0 : index
      %19 = vector.load %arg8[%c0_15, %c0_16] : memref<32x128xf32, #tpu.memory_space<vmem>>, vector<32x128xf32>
      tpu.vector_store %arg8[%c0_15, %c0_16], %18 {strides = array<i32>} : memref<32x128xf32, #tpu.memory_space<vmem>>, vector<32x128xf32>,
    } else {
    }
    %c0 = arith.constant 0 : index
    %c0_2 = arith.constant 0 : index
    %5 = vector.load %arg8[%c0, %c0_2] : memref<32x128xf32, #tpu.memory_space<vmem>>, vector<32x128xf32>
    %c0_3 = arith.constant 0 : index
    %c0_4 = arith.constant 0 : index
    %c0_5 = arith.constant 0 : index
    %6 = vector.load %arg4[%c0_3, %c0_4, %c0_5] : memref<1x32x128xbf16, #tpu.memory_space<vmem>>, vector<1x32x128xbf16>
    %7 = vector.shape_cast %6 : vector<1x32x128xbf16> to vector<32x128xbf16>
    %c0_6 = arith.constant 0 : index
    %c0_7 = arith.constant 0 : index
    %c0_8 = arith.constant 0 : index
    %8 = vector.load %arg5[%c0_6, %c0_7, %c0_8] : memref<1x128x128xbf16, #tpu.memory_space<vmem>>, vector<1x128x128xbf16>
    %9 = vector.shape_cast %8 : vector<1x128x128xbf16> to vector<128x128xbf16>
    %cst = arith.constant dense<0.000000e+00> : vector<32x128xf32>
    %10 = tpu.matmul %7, %9, %cst {dimension_numbers = #tpu.dot_dimension_numbers<[1], [0], [0], [1], [0, 0, 1, 1], [], []>} : vector<32x128xbf16>, vector<128x128xbf16>, vector<32x128xf32> -> vector<32x128xf32>
    %11 = arith.addf %5, %10 : vector<32x128xf32>
    %c0_9 = arith.constant 0 : index
    %c0_10 = arith.constant 0 : index
    %12 = vector.load %arg8[%c0_9, %c0_10] : memref<32x128xf32, #tpu.memory_space<vmem>>, vector<32x128xf32>
    tpu.vector_store %arg8[%c0_9, %c0_10], %11 {strides = array<i32>} : memref<32x128xf32, #tpu.memory_space<vmem>>, vector<32x128xf32>,
    %c0_i32_11 = arith.constant 0 : i32
    %13 = arith.cmpi eq, %arg2, %c0_i32_11 : i32
    %c0_i32_12 = arith.constant 0 : i32
    %14 = arith.cmpi eq, %arg3, %c0_i32_12 : i32
    %15 = arith.andi %13, %14 : i1
    %16 = arith.extui %15 : i1 to i32
    %c0_i32_13 = arith.constant 0 : i32
    %17 = arith.cmpi ne, %16, %c0_i32_13 : i32
    scf.if %17 {
      %c0_14 = arith.constant 0 : index
      %c0_15 = arith.constant 0 : index
      %18 = vector.load %arg8[%c0_14, %c0_15] : memref<32x128xf32, #tpu.memory_space<vmem>>, vector<32x128xf32>
      %c0_16 = arith.constant 0 : index
      %c0_17 = arith.constant 0 : index
      %19 = vector.load %arg6[%c0_16, %c0_17] : memref<1x128xf32, #tpu.memory_space<vmem>>, vector<1x128xf32>
      %20 = vector.broadcast %19 : vector<1x128xf32> to vector<32x128xf32>
      %21 = arith.addf %18, %20 : vector<32x128xf32>
      %cst_18 = arith.constant 0.000000e+00 : f32
      %22 = vector.broadcast %cst_18 : f32 to vector<32x128xf32>
      %23 = arith.maximumf %21, %22 : vector<32x128xf32>
      %24 = arith.truncf %23 : vector<32x128xf32> to vector<32x128xbf16>
      %c0_19 = arith.constant 0 : index
      %c0_20 = arith.constant 0 : index
      %25 = vector.load %arg7[%c0_19, %c0_20] : memref<32x128xbf16, #tpu.memory_space<vmem>>, vector<32x128xbf16>
      tpu.vector_store %arg7[%c0_19, %c0_20], %24 {strides = array<i32>} : memref<32x128xbf16, #tpu.memory_space<vmem>>, vector<32x128xbf16>,
    } else {
    }
    return
  }
  func.func @transform_0(%arg0: i32, %arg1: i32, %arg2: i32, %arg3: i32) -> (i32, i32, i32) {
    %c0_i32 = arith.constant 0 : i32
    return %arg2, %arg0, %arg3 : i32, i32, i32
  }
  func.func @transform_1(%arg0: i32, %arg1: i32, %arg2: i32, %arg3: i32) -> (i32, i32, i32) {
    %c0_i32 = arith.constant 0 : i32
    return %arg2, %arg3, %arg1 : i32, i32, i32
  }
  func.func @transform_2(%arg0: i32, %arg1: i32, %arg2: i32, %arg3: i32) -> (i32, i32) {
    %c0_i32 = arith.constant 0 : i32
    %c0_i32_0 = arith.constant 0 : i32
    return %c0_i32, %arg1 : i32, i32
  }
  func.func @transform_3(%arg0: i32, %arg1: i32, %arg2: i32, %arg3: i32) -> (i32, i32) {
    %c0_i32 = arith.constant 0 : i32
    return %arg0, %arg1 : i32, i32
  }
}

module attributes {stable_mosaic.version = 11 : i64} {
  func.func @_fused_matmul_kernel(%arg0: i32, %arg1: i32, %arg2: i32, %arg3: i32, %arg4: memref<1x32x128xbf16, #tpu.memory_space<vmem>>, %arg5: memref<1x128x128xbf16, #tpu.memory_space<vmem>>, %arg6: memref<1x128xf32, #tpu.memory_space<vmem>>, %arg7: memref<32x128xbf16, #tpu.memory_space<vmem>>, %arg8: memref<32x128xf32, #tpu.memory_space<vmem>>) attributes {dimension_semantics = [#tpu.dimension_semantics<parallel>, #tpu.dimension_semantics<parallel>, #tpu.dimension_semantics<arbitrary>, #tpu.dimension_semantics<arbitrary>], iteration_bounds = array<i64: 1, 1, 1, 1>, scalar_prefetch = 0 : i64, scratch_operands = 1 : i64, tpu.core_type = #tpu.core_type<tc>, window_params = [{transform_indices = @transform_0, window_bounds = array<i64: 1, 32, 128>}, {transform_indices = @transform_1, window_bounds = array<i64: 1, 128, 128>}, {transform_indices = @transform_2, window_bounds = array<i64: 1, 128>}, {transform_indices = @transform_3, window_bounds = array<i64: 32, 128>}]} {
    %c0_i32 = arith.constant 0 : i32
    %0 = arith.cmpi eq, %arg2, %c0_i32 : i32
    %c0_i32_0 = arith.constant 0 : i32
    %1 = arith.cmpi eq, %arg3, %c0_i32_0 : i32
    %2 = arith.andi %0, %1 : i1
    %3 = arith.extui %2 : i1 to i32
    %c0_i32_1 = arith.constant 0 : i32
    %4 = arith.cmpi ne, %3, %c0_i32_1 : i32
    scf.if %4 {
      %cst_14 = arith.constant 0.000000e+00 : f32
      %18 = vector.broadcast %cst_14 : f32 to vector<32x128xf32>
      %c0_15 = arith.constant 0 : index
      %c0_16 = arith.constant 0 : index
      %19 = vector.load %arg8[%c0_15, %c0_16] : memref<32x128xf32, #tpu.memory_space<vmem>>, vector<32x128xf32>
      tpu.vector_store %arg8[%c0_15, %c0_16], %18 {strides = array<i32>} : memref<32x128xf32, #tpu.memory_space<vmem>>, vector<32x128xf32>,
    } else {
    }
    %c0 = arith.constant 0 : index
    %c0_2 = arith.constant 0 : index
    %5 = vector.load %arg8[%c0, %c0_2] : memref<32x128xf32, #tpu.memory_space<vmem>>, vector<32x128xf32>
    %c0_3 = arith.constant 0 : index
    %c0_4 = arith.constant 0 : index
    %c0_5 = arith.constant 0 : index
    %6 = vector.load %arg4[%c0_3, %c0_4, %c0_5] : memref<1x32x128xbf16, #tpu.memory_space<vmem>>, vector<1x32x128xbf16>
    %7 = vector.shape_cast %6 : vector<1x32x128xbf16> to vector<32x128xbf16>
    %c0_6 = arith.constant 0 : index
    %c0_7 = arith.constant 0 : index
    %c0_8 = arith.constant 0 : index
    %8 = vector.load %arg5[%c0_6, %c0_7, %c0_8] : memref<1x128x128xbf16, #tpu.memory_space<vmem>>, vector<1x128x128xbf16>
    %9 = vector.shape_cast %8 : vector<1x128x128xbf16> to vector<128x128xbf16>
    %cst = arith.constant dense<0.000000e+00> : vector<32x128xf32>
    %10 = tpu.matmul %7, %9, %cst {dimension_numbers = #tpu.dot_dimension_numbers<[1], [0], [0], [1], [0, 0, 1, 1], [], []>} : vector<32x128xbf16>, vector<128x128xbf16>, vector<32x128xf32> -> vector<32x128xf32>
    %11 = arith.addf %5, %10 : vector<32x128xf32>
    %c0_9 = arith.constant 0 : index
    %c0_10 = arith.constant 0 : index
    %12 = vector.load %arg8[%c0_9, %c0_10] : memref<32x128xf32, #tpu.memory_space<vmem>>, vector<32x128xf32>
    tpu.vector_store %arg8[%c0_9, %c0_10], %11 {strides = array<i32>} : memref<32x128xf32, #tpu.memory_space<vmem>>, vector<32x128xf32>,
    %c0_i32_11 = arith.constant 0 : i32
    %13 = arith.cmpi eq, %arg2, %c0_i32_11 : i32
    %c0_i32_12 = arith.constant 0 : i32
    %14 = arith.cmpi eq, %arg3, %c0_i32_12 : i32
    %15 = arith.andi %13, %14 : i1
    %16 = arith.extui %15 : i1 to i32
    %c0_i32_13 = arith.constant 0 : i32
    %17 = arith.cmpi ne, %16, %c0_i32_13 : i32
    scf.if %17 {
      %c0_14 = arith.constant 0 : index
      %c0_15 = arith.constant 0 : index
      %18 = vector.load %arg8[%c0_14, %c0_15] : memref<32x128xf32, #tpu.memory_space<vmem>>, vector<32x128xf32>
      %c0_16 = arith.constant 0 : index
      %c0_17 = arith.constant 0 : index
      %19 = vector.load %arg6[%c0_16, %c0_17] : memref<1x128xf32, #tpu.memory_space<vmem>>, vector<1x128xf32>
      %20 = vector.broadcast %19 : vector<1x128xf32> to vector<32x128xf32>
      %21 = arith.addf %18, %20 : vector<32x128xf32>
      %22 = arith.truncf %21 : vector<32x128xf32> to vector<32x128xbf16>
      %c0_18 = arith.constant 0 : index
      %c0_19 = arith.constant 0 : index
      %23 = vector.load %arg7[%c0_18, %c0_19] : memref<32x128xbf16, #tpu.memory_space<vmem>>, vector<32x128xbf16>
      tpu.vector_store %arg7[%c0_18, %c0_19], %22 {strides = array<i32>} : memref<32x128xbf16, #tpu.memory_space<vmem>>, vector<32x128xbf16>,
    } else {
    }
    return
  }
  func.func @transform_0(%arg0: i32, %arg1: i32, %arg2: i32, %arg3: i32) -> (i32, i32, i32) {
    %c0_i32 = arith.constant 0 : i32
    return %arg2, %arg0, %arg3 : i32, i32, i32
  }
  func.func @transform_1(%arg0: i32, %arg1: i32, %arg2: i32, %arg3: i32) -> (i32, i32, i32) {
    %c0_i32 = arith.constant 0 : i32
    return %arg2, %arg3, %arg1 : i32, i32, i32
  }
  func.func @transform_2(%arg0: i32, %arg1: i32, %arg2: i32, %arg3: i32) -> (i32, i32) {
    %c0_i32 = arith.constant 0 : i32
    %c0_i32_0 = arith.constant 0 : i32
    return %c0_i32, %arg1 : i32, i32
  }
  func.func @transform_3(%arg0: i32, %arg1: i32, %arg2: i32, %arg3: i32) -> (i32, i32) {
    %c0_i32 = arith.constant 0 : i32
    return %arg0, %arg1 : i32, i32
  }
}

module attributes {stable_mosaic.version = 11 : i64} {
  func.func @_fused_matmul_kernel(%arg0: i32, %arg1: i32, %arg2: i32, %arg3: i32, %arg4: memref<1x32x128xbf16, #tpu.memory_space<vmem>>, %arg5: memref<1x128x128xbf16, #tpu.memory_space<vmem>>, %arg6: memref<1x128xf32, #tpu.memory_space<vmem>>, %arg7: memref<32x128xbf16, #tpu.memory_space<vmem>>, %arg8: memref<32x128xf32, #tpu.memory_space<vmem>>) attributes {dimension_semantics = [#tpu.dimension_semantics<parallel>, #tpu.dimension_semantics<parallel>, #tpu.dimension_semantics<arbitrary>, #tpu.dimension_semantics<arbitrary>], iteration_bounds = array<i64: 1, 1, 9, 1>, scalar_prefetch = 0 : i64, scratch_operands = 1 : i64, tpu.core_type = #tpu.core_type<tc>, window_params = [{transform_indices = @transform_0, window_bounds = array<i64: 1, 32, 128>}, {transform_indices = @transform_1, window_bounds = array<i64: 1, 128, 128>}, {transform_indices = @transform_2, window_bounds = array<i64: 1, 128>}, {transform_indices = @transform_3, window_bounds = array<i64: 32, 128>}]} {
    %c0_i32 = arith.constant 0 : i32
    %0 = arith.cmpi eq, %arg2, %c0_i32 : i32
    %c0_i32_0 = arith.constant 0 : i32
    %1 = arith.cmpi eq, %arg3, %c0_i32_0 : i32
    %2 = arith.andi %0, %1 : i1
    %3 = arith.extui %2 : i1 to i32
    %c0_i32_1 = arith.constant 0 : i32
    %4 = arith.cmpi ne, %3, %c0_i32_1 : i32
    scf.if %4 {
      %cst_13 = arith.constant 0.000000e+00 : f32
      %18 = vector.broadcast %cst_13 : f32 to vector<32x128xf32>
      %c0_14 = arith.constant 0 : index
      %c0_15 = arith.constant 0 : index
      %19 = vector.load %arg8[%c0_14, %c0_15] : memref<32x128xf32, #tpu.memory_space<vmem>>, vector<32x128xf32>
      tpu.vector_store %arg8[%c0_14, %c0_15], %18 {strides = array<i32>} : memref<32x128xf32, #tpu.memory_space<vmem>>, vector<32x128xf32>,
    } else {
    }
    %c0 = arith.constant 0 : index
    %c0_2 = arith.constant 0 : index
    %5 = vector.load %arg8[%c0, %c0_2] : memref<32x128xf32, #tpu.memory_space<vmem>>, vector<32x128xf32>
    %c0_3 = arith.constant 0 : index
    %c0_4 = arith.constant 0 : index
    %c0_5 = arith.constant 0 : index
    %6 = vector.load %arg4[%c0_3, %c0_4, %c0_5] : memref<1x32x128xbf16, #tpu.memory_space<vmem>>, vector<1x32x128xbf16>
    %7 = vector.shape_cast %6 : vector<1x32x128xbf16> to vector<32x128xbf16>
    %c0_6 = arith.constant 0 : index
    %c0_7 = arith.constant 0 : index
    %c0_8 = arith.constant 0 : index
    %8 = vector.load %arg5[%c0_6, %c0_7, %c0_8] : memref<1x128x128xbf16, #tpu.memory_space<vmem>>, vector<1x128x128xbf16>
    %9 = vector.shape_cast %8 : vector<1x128x128xbf16> to vector<128x128xbf16>
    %cst = arith.constant dense<0.000000e+00> : vector<32x128xf32>
    %10 = tpu.matmul %7, %9, %cst {dimension_numbers = #tpu.dot_dimension_numbers<[1], [0], [0], [1], [0, 0, 1, 1], [], []>} : vector<32x128xbf16>, vector<128x128xbf16>, vector<32x128xf32> -> vector<32x128xf32>
    %11 = arith.addf %5, %10 : vector<32x128xf32>
    %c0_9 = arith.constant 0 : index
    %c0_10 = arith.constant 0 : index
    %12 = vector.load %arg8[%c0_9, %c0_10] : memref<32x128xf32, #tpu.memory_space<vmem>>, vector<32x128xf32>
    tpu.vector_store %arg8[%c0_9, %c0_10], %11 {strides = array<i32>} : memref<32x128xf32, #tpu.memory_space<vmem>>, vector<32x128xf32>,
    %c8_i32 = arith.constant 8 : i32
    %13 = arith.cmpi eq, %arg2, %c8_i32 : i32
    %c0_i32_11 = arith.constant 0 : i32
    %14 = arith.cmpi eq, %arg3, %c0_i32_11 : i32
    %15 = arith.andi %13, %14 : i1
    %16 = arith.extui %15 : i1 to i32
    %c0_i32_12 = arith.constant 0 : i32
    %17 = arith.cmpi ne, %16, %c0_i32_12 : i32
    scf.if %17 {
      %c0_13 = arith.constant 0 : index
      %c0_14 = arith.constant 0 : index
      %18 = vector.load %arg8[%c0_13, %c0_14] : memref<32x128xf32, #tpu.memory_space<vmem>>, vector<32x128xf32>
      %c0_15 = arith.constant 0 : index
      %c0_16 = arith.constant 0 : index
      %19 = vector.load %arg6[%c0_15, %c0_16] : memref<1x128xf32, #tpu.memory_space<vmem>>, vector<1x128xf32>
      %20 = vector.broadcast %19 : vector<1x128xf32> to vector<32x128xf32>
      %21 = arith.addf %18, %20 : vector<32x128xf32>
      %cst_17 = arith.constant 0.000000e+00 : f32
      %22 = vector.broadcast %cst_17 : f32 to vector<32x128xf32>
      %23 = arith.maximumf %21, %22 : vector<32x128xf32>
      %24 = arith.truncf %23 : vector<32x128xf32> to vector<32x128xbf16>
      %c0_18 = arith.constant 0 : index
      %c0_19 = arith.constant 0 : index
      %25 = vector.load %arg7[%c0_18, %c0_19] : memref<32x128xbf16, #tpu.memory_space<vmem>>, vector<32x128xbf16>
      tpu.vector_store %arg7[%c0_18, %c0_19], %24 {strides = array<i32>} : memref<32x128xbf16, #tpu.memory_space<vmem>>, vector<32x128xbf16>,
    } else {
    }
    return
  }
  func.func @transform_0(%arg0: i32, %arg1: i32, %arg2: i32, %arg3: i32) -> (i32, i32, i32) {
    %c0_i32 = arith.constant 0 : i32
    return %arg2, %arg0, %arg3 : i32, i32, i32
  }
  func.func @transform_1(%arg0: i32, %arg1: i32, %arg2: i32, %arg3: i32) -> (i32, i32, i32) {
    %c0_i32 = arith.constant 0 : i32
    return %arg2, %arg3, %arg1 : i32, i32, i32
  }
  func.func @transform_2(%arg0: i32, %arg1: i32, %arg2: i32, %arg3: i32) -> (i32, i32) {
    %c0_i32 = arith.constant 0 : i32
    %c0_i32_0 = arith.constant 0 : i32
    return %c0_i32, %arg1 : i32, i32
  }
  func.func @transform_3(%arg0: i32, %arg1: i32, %arg2: i32, %arg3: i32) -> (i32, i32) {
    %c0_i32 = arith.constant 0 : i32
    return %arg0, %arg1 : i32, i32
  }
}

module attributes {stable_mosaic.version = 11 : i64} {
  func.func @_fused_matmul_kernel(%arg0: i32, %arg1: i32, %arg2: i32, %arg3: i32, %arg4: memref<1x32x128xbf16, #tpu.memory_space<vmem>>, %arg5: memref<1x128x128xbf16, #tpu.memory_space<vmem>>, %arg6: memref<1x128xf32, #tpu.memory_space<vmem>>, %arg7: memref<32x128xbf16, #tpu.memory_space<vmem>>, %arg8: memref<32x128xbf16, #tpu.memory_space<vmem>>, %arg9: memref<32x128xf32, #tpu.memory_space<vmem>>) attributes {dimension_semantics = [#tpu.dimension_semantics<parallel>, #tpu.dimension_semantics<parallel>, #tpu.dimension_semantics<arbitrary>, #tpu.dimension_semantics<arbitrary>], iteration_bounds = array<i64: 1, 1, 1, 1>, scalar_prefetch = 0 : i64, scratch_operands = 1 : i64, tpu.core_type = #tpu.core_type<tc>, window_params = [{transform_indices = @transform_0, window_bounds = array<i64: 1, 32, 128>}, {transform_indices = @transform_1, window_bounds = array<i64: 1, 128, 128>}, {transform_indices = @transform_2, window_bounds = array<i64: 1, 128>}, {transform_indices = @transform_3, window_bounds = array<i64: 32, 128>}, {transform_indices = @transform_4, window_bounds = array<i64: 32, 128>}]} {
    %c0_i32 = arith.constant 0 : i32
    %0 = arith.cmpi eq, %arg2, %c0_i32 : i32
    %c0_i32_0 = arith.constant 0 : i32
    %1 = arith.cmpi eq, %arg3, %c0_i32_0 : i32
    %2 = arith.andi %0, %1 : i1
    %3 = arith.extui %2 : i1 to i32
    %c0_i32_1 = arith.constant 0 : i32
    %4 = arith.cmpi ne, %3, %c0_i32_1 : i32
    scf.if %4 {
      %cst_14 = arith.constant 0.000000e+00 : f32
      %18 = vector.broadcast %cst_14 : f32 to vector<32x128xf32>
      %c0_15 = arith.constant 0 : index
      %c0_16 = arith.constant 0 : index
      %19 = vector.load %arg9[%c0_15, %c0_16] : memref<32x128xf32, #tpu.memory_space<vmem>>, vector<32x128xf32>
      tpu.vector_store %arg9[%c0_15, %c0_16], %18 {strides = array<i32>} : memref<32x128xf32, #tpu.memory_space<vmem>>, vector<32x128xf32>,
    } else {
    }
    %c0 = arith.constant 0 : index
    %c0_2 = arith.constant 0 : index
    %5 = vector.load %arg9[%c0, %c0_2] : memref<32x128xf32, #tpu.memory_space<vmem>>, vector<32x128xf32>
    %c0_3 = arith.constant 0 : index
    %c0_4 = arith.constant 0 : index
    %c0_5 = arith.constant 0 : index
    %6 = vector.load %arg4[%c0_3, %c0_4, %c0_5] : memref<1x32x128xbf16, #tpu.memory_space<vmem>>, vector<1x32x128xbf16>
    %7 = vector.shape_cast %6 : vector<1x32x128xbf16> to vector<32x128xbf16>
    %c0_6 = arith.constant 0 : index
    %c0_7 = arith.constant 0 : index
    %c0_8 = arith.constant 0 : index
    %8 = vector.load %arg5[%c0_6, %c0_7, %c0_8] : memref<1x128x128xbf16, #tpu.memory_space<vmem>>, vector<1x128x128xbf16>
    %9 = vector.shape_cast %8 : vector<1x128x128xbf16> to vector<128x128xbf16>
    %cst = arith.constant dense<0.000000e+00> : vector<32x128xf32>
    %10 = tpu.matmul %7, %9, %cst {dimension_numbers = #tpu.dot_dimension_numbers<[1], [0], [0], [1], [0, 0, 1, 1], [], []>} : vector<32x128xbf16>, vector<128x128xbf16>, vector<32x128xf32> -> vector<32x128xf32>
    %11 = arith.addf %5, %10 : vector<32x128xf32>
    %c0_9 = arith.constant 0 : index
    %c0_10 = arith.constant 0 : index
    %12 = vector.load %arg9[%c0_9, %c0_10] : memref<32x128xf32, #tpu.memory_space<vmem>>, vector<32x128xf32>
    tpu.vector_store %arg9[%c0_9, %c0_10], %11 {strides = array<i32>} : memref<32x128xf32, #tpu.memory_space<vmem>>, vector<32x128xf32>,
    %c0_i32_11 = arith.constant 0 : i32
    %13 = arith.cmpi eq, %arg2, %c0_i32_11 : i32
    %c0_i32_12 = arith.constant 0 : i32
    %14 = arith.cmpi eq, %arg3, %c0_i32_12 : i32
    %15 = arith.andi %13, %14 : i1
    %16 = arith.extui %15 : i1 to i32
    %c0_i32_13 = arith.constant 0 : i32
    %17 = arith.cmpi ne, %16, %c0_i32_13 : i32
    scf.if %17 {
      %c0_14 = arith.constant 0 : index
      %c0_15 = arith.constant 0 : index
      %18 = vector.load %arg9[%c0_14, %c0_15] : memref<32x128xf32, #tpu.memory_space<vmem>>, vector<32x128xf32>
      %c0_16 = arith.constant 0 : index
      %c0_17 = arith.constant 0 : index
      %19 = vector.load %arg6[%c0_16, %c0_17] : memref<1x128xf32, #tpu.memory_space<vmem>>, vector<1x128xf32>
      %20 = vector.broadcast %19 : vector<1x128xf32> to vector<32x128xf32>
      %21 = arith.addf %18, %20 : vector<32x128xf32>
      %c0_18 = arith.constant 0 : index
      %c0_19 = arith.constant 0 : index
      %22 = vector.load %arg7[%c0_18, %c0_19] : memref<32x128xbf16, #tpu.memory_space<vmem>>, vector<32x128xbf16>
      %23 = arith.extf %22 : vector<32x128xbf16> to vector<32x128xf32>
      %24 = arith.addf %21, %23 : vector<32x128xf32>
      %cst_20 = arith.constant 0.000000e+00 : f32
      %25 = vector.broadcast %cst_20 : f32 to vector<32x128xf32>
      %26 = arith.maximumf %24, %25 : vector<32x128xf32>
      %27 = arith.truncf %26 : vector<32x128xf32> to vector<32x128xbf16>
      %c0_21 = arith.constant 0 : index
      %c0_22 = arith.constant 0 : index
      %28 = vector.load %arg8[%c0_21, %c0_22] : memref<32x128xbf16, #tpu.memory_space<vmem>>, vector<32x128xbf16>
      tpu.vector_store %arg8[%c0_21, %c0_22], %27 {strides = array<i32>} : memref<32x128xbf16, #tpu.memory_space<vmem>>, vector<32x128xbf16>,
    } else {
    }
    return
  }
  func.func @transform_0(%arg0: i32, %arg1: i32, %arg2: i32, %arg3: i32) -> (i32, i32, i32) {
    %c0_i32 = arith.constant 0 : i32
    return %arg2, %arg0, %arg3 : i32, i32, i32
  }
  func.func @transform_1(%arg0: i32, %arg1: i32, %arg2: i32, %arg3: i32) -> (i32, i32, i32) {
    %c0_i32 = arith.constant 0 : i32
    return %arg2, %arg3, %arg1 : i32, i32, i32
  }
  func.func @transform_2(%arg0: i32, %arg1: i32, %arg2: i32, %arg3: i32) -> (i32, i32) {
    %c0_i32 = arith.constant 0 : i32
    %c0_i32_0 = arith.constant 0 : i32
    return %c0_i32, %arg1 : i32, i32
  }
  func.func @transform_3(%arg0: i32, %arg1: i32, %arg2: i32, %arg3: i32) -> (i32, i32) {
    %c0_i32 = arith.constant 0 : i32
    return %arg0, %arg1 : i32, i32
  }
  func.func @transform_4(%arg0: i32, %arg1: i32, %arg2: i32, %arg3: i32) -> (i32, i32) {
    %c0_i32 = arith.constant 0 : i32
    return %arg0, %arg1 : i32, i32
  }
}

module attributes {stable_mosaic.version = 11 : i64} {
  func.func @_fused_matmul_kernel(%arg0: i32, %arg1: i32, %arg2: i32, %arg3: i32, %arg4: memref<1x16x128xbf16, #tpu.memory_space<vmem>>, %arg5: memref<1x128x128xbf16, #tpu.memory_space<vmem>>, %arg6: memref<1x128xf32, #tpu.memory_space<vmem>>, %arg7: memref<16x128xbf16, #tpu.memory_space<vmem>>, %arg8: memref<16x128xf32, #tpu.memory_space<vmem>>) attributes {dimension_semantics = [#tpu.dimension_semantics<parallel>, #tpu.dimension_semantics<parallel>, #tpu.dimension_semantics<arbitrary>, #tpu.dimension_semantics<arbitrary>], iteration_bounds = array<i64: 1, 1, 1, 1>, scalar_prefetch = 0 : i64, scratch_operands = 1 : i64, tpu.core_type = #tpu.core_type<tc>, window_params = [{transform_indices = @transform_0, window_bounds = array<i64: 1, 16, 128>}, {transform_indices = @transform_1, window_bounds = array<i64: 1, 128, 128>}, {transform_indices = @transform_2, window_bounds = array<i64: 1, 128>}, {transform_indices = @transform_3, window_bounds = array<i64: 16, 128>}]} {
    %c0_i32 = arith.constant 0 : i32
    %0 = arith.cmpi eq, %arg2, %c0_i32 : i32
    %c0_i32_0 = arith.constant 0 : i32
    %1 = arith.cmpi eq, %arg3, %c0_i32_0 : i32
    %2 = arith.andi %0, %1 : i1
    %3 = arith.extui %2 : i1 to i32
    %c0_i32_1 = arith.constant 0 : i32
    %4 = arith.cmpi ne, %3, %c0_i32_1 : i32
    scf.if %4 {
      %cst_14 = arith.constant 0.000000e+00 : f32
      %18 = vector.broadcast %cst_14 : f32 to vector<16x128xf32>
      %c0_15 = arith.constant 0 : index
      %c0_16 = arith.constant 0 : index
      %19 = vector.load %arg8[%c0_15, %c0_16] : memref<16x128xf32, #tpu.memory_space<vmem>>, vector<16x128xf32>
      tpu.vector_store %arg8[%c0_15, %c0_16], %18 {strides = array<i32>} : memref<16x128xf32, #tpu.memory_space<vmem>>, vector<16x128xf32>,
    } else {
    }
    %c0 = arith.constant 0 : index
    %c0_2 = arith.constant 0 : index
    %5 = vector.load %arg8[%c0, %c0_2] : memref<16x128xf32, #tpu.memory_space<vmem>>, vector<16x128xf32>
    %c0_3 = arith.constant 0 : index
    %c0_4 = arith.constant 0 : index
    %c0_5 = arith.constant 0 : index
    %6 = vector.load %arg4[%c0_3, %c0_4, %c0_5] : memref<1x16x128xbf16, #tpu.memory_space<vmem>>, vector<1x16x128xbf16>
    %7 = vector.shape_cast %6 : vector<1x16x128xbf16> to vector<16x128xbf16>
    %c0_6 = arith.constant 0 : index
    %c0_7 = arith.constant 0 : index
    %c0_8 = arith.constant 0 : index
    %8 = vector.load %arg5[%c0_6, %c0_7, %c0_8] : memref<1x128x128xbf16, #tpu.memory_space<vmem>>, vector<1x128x128xbf16>
    %9 = vector.shape_cast %8 : vector<1x128x128xbf16> to vector<128x128xbf16>
    %cst = arith.constant dense<0.000000e+00> : vector<16x128xf32>
    %10 = tpu.matmul %7, %9, %cst {dimension_numbers = #tpu.dot_dimension_numbers<[1], [0], [0], [1], [0, 0, 1, 1], [], []>} : vector<16x128xbf16>, vector<128x128xbf16>, vector<16x128xf32> -> vector<16x128xf32>
    %11 = arith.addf %5, %10 : vector<16x128xf32>
    %c0_9 = arith.constant 0 : index
    %c0_10 = arith.constant 0 : index
    %12 = vector.load %arg8[%c0_9, %c0_10] : memref<16x128xf32, #tpu.memory_space<vmem>>, vector<16x128xf32>
    tpu.vector_store %arg8[%c0_9, %c0_10], %11 {strides = array<i32>} : memref<16x128xf32, #tpu.memory_space<vmem>>, vector<16x128xf32>,
    %c0_i32_11 = arith.constant 0 : i32
    %13 = arith.cmpi eq, %arg2, %c0_i32_11 : i32
    %c0_i32_12 = arith.constant 0 : i32
    %14 = arith.cmpi eq, %arg3, %c0_i32_12 : i32
    %15 = arith.andi %13, %14 : i1
    %16 = arith.extui %15 : i1 to i32
    %c0_i32_13 = arith.constant 0 : i32
    %17 = arith.cmpi ne, %16, %c0_i32_13 : i32
    scf.if %17 {
      %c0_14 = arith.constant 0 : index
      %c0_15 = arith.constant 0 : index
      %18 = vector.load %arg8[%c0_14, %c0_15] : memref<16x128xf32, #tpu.memory_space<vmem>>, vector<16x128xf32>
      %c0_16 = arith.constant 0 : index
      %c0_17 = arith.constant 0 : index
      %19 = vector.load %arg6[%c0_16, %c0_17] : memref<1x128xf32, #tpu.memory_space<vmem>>, vector<1x128xf32>
      %20 = vector.broadcast %19 : vector<1x128xf32> to vector<16x128xf32>
      %21 = arith.addf %18, %20 : vector<16x128xf32>
      %22 = arith.truncf %21 : vector<16x128xf32> to vector<16x128xbf16>
      %c0_18 = arith.constant 0 : index
      %c0_19 = arith.constant 0 : index
      %23 = vector.load %arg7[%c0_18, %c0_19] : memref<16x128xbf16, #tpu.memory_space<vmem>>, vector<16x128xbf16>
      tpu.vector_store %arg7[%c0_18, %c0_19], %22 {strides = array<i32>} : memref<16x128xbf16, #tpu.memory_space<vmem>>, vector<16x128xbf16>,
    } else {
    }
    return
  }
  func.func @transform_0(%arg0: i32, %arg1: i32, %arg2: i32, %arg3: i32) -> (i32, i32, i32) {
    %c0_i32 = arith.constant 0 : i32
    return %arg2, %arg0, %arg3 : i32, i32, i32
  }
  func.func @transform_1(%arg0: i32, %arg1: i32, %arg2: i32, %arg3: i32) -> (i32, i32, i32) {
    %c0_i32 = arith.constant 0 : i32
    return %arg2, %arg3, %arg1 : i32, i32, i32
  }
  func.func @transform_2(%arg0: i32, %arg1: i32, %arg2: i32, %arg3: i32) -> (i32, i32) {
    %c0_i32 = arith.constant 0 : i32
    %c0_i32_0 = arith.constant 0 : i32
    return %c0_i32, %arg1 : i32, i32
  }
  func.func @transform_3(%arg0: i32, %arg1: i32, %arg2: i32, %arg3: i32) -> (i32, i32) {
    %c0_i32 = arith.constant 0 : i32
    return %arg0, %arg1 : i32, i32
  }
}

module attributes {stable_mosaic.version = 11 : i64} {
  func.func @_avg_pool_kernel(%arg0: i32, %arg1: memref<4x16x128xbf16, #tpu.memory_space<vmem>>, %arg2: memref<16x1xf32, #tpu.memory_space<vmem>>, %arg3: memref<16x128xbf16, #tpu.memory_space<vmem>>) attributes {dimension_semantics = [#tpu.dimension_semantics<parallel>], iteration_bounds = array<i64: 1>, scalar_prefetch = 0 : i64, scratch_operands = 0 : i64, tpu.core_type = #tpu.core_type<tc>, window_params = [{transform_indices = @transform_0, window_bounds = array<i64: 4, 16, 128>}, {transform_indices = @transform_1, window_bounds = array<i64: 16, 1>}, {transform_indices = @transform_2, window_bounds = array<i64: 16, 128>}]} {
    %c0 = arith.constant 0 : index
    %c0_0 = arith.constant 0 : index
    %c0_1 = arith.constant 0 : index
    %0 = vector.load %arg1[%c0, %c0_0, %c0_1] : memref<4x16x128xbf16, #tpu.memory_space<vmem>>, vector<4x16x128xbf16>
    %1 = arith.extf %0 : vector<4x16x128xbf16> to vector<4x16x128xf32>
    %cst = arith.constant dense<0.000000e+00> : vector<16x128xf32>
    %2 = vector.multi_reduction <add>, %1, %cst [0] : vector<4x16x128xf32> to vector<16x128xf32>
    %c0_2 = arith.constant 0 : index
    %c0_3 = arith.constant 0 : index
    %3 = vector.load %arg2[%c0_2, %c0_3] : memref<16x1xf32, #tpu.memory_space<vmem>>, vector<16x1xf32>
    %4 = tpu.reciprocal %3 {approx = true} : vector<16x1xf32> -> vector<16x1xf32>
    %5 = vector.broadcast %4 : vector<16x1xf32> to vector<16x128xf32>
    %6 = arith.mulf %2, %5 : vector<16x128xf32>
    %7 = arith.truncf %6 : vector<16x128xf32> to vector<16x128xbf16>
    %c0_4 = arith.constant 0 : index
    %c0_5 = arith.constant 0 : index
    %8 = vector.load %arg3[%c0_4, %c0_5] : memref<16x128xbf16, #tpu.memory_space<vmem>>, vector<16x128xbf16>
    tpu.vector_store %arg3[%c0_4, %c0_5], %7 {strides = array<i32>} : memref<16x128xbf16, #tpu.memory_space<vmem>>, vector<16x128xbf16>,
    return
  }
  func.func @transform_0(%arg0: i32) -> (i32, i32, i32) {
    %c0_i32 = arith.constant 0 : i32
    %c0_i32_0 = arith.constant 0 : i32
    %c0_i32_1 = arith.constant 0 : i32
    return %c0_i32, %arg0, %c0_i32_0 : i32, i32, i32
  }
  func.func @transform_1(%arg0: i32) -> (i32, i32) {
    %c0_i32 = arith.constant 0 : i32
    %c0_i32_0 = arith.constant 0 : i32
    return %arg0, %c0_i32 : i32, i32
  }
  func.func @transform_2(%arg0: i32) -> (i32, i32) {
    %c0_i32 = arith.constant 0 : i32
    %c0_i32_0 = arith.constant 0 : i32
    return %arg0, %c0_i32 : i32, i32
  }
}

module attributes {stable_mosaic.version = 11 : i64} {
  func.func @_fused_matmul_kernel(%arg0: i32, %arg1: i32, %arg2: i32, %arg3: i32, %arg4: memref<1x16x128xbf16, #tpu.memory_space<vmem>>, %arg5: memref<1x128x128xbf16, #tpu.memory_space<vmem>>, %arg6: memref<1x128xf32, #tpu.memory_space<vmem>>, %arg7: memref<16x128xbf16, #tpu.memory_space<vmem>>, %arg8: memref<16x128xbf16, #tpu.memory_space<vmem>>, %arg9: memref<16x128xf32, #tpu.memory_space<vmem>>) attributes {dimension_semantics = [#tpu.dimension_semantics<parallel>, #tpu.dimension_semantics<parallel>, #tpu.dimension_semantics<arbitrary>, #tpu.dimension_semantics<arbitrary>], iteration_bounds = array<i64: 1, 1, 1, 1>, scalar_prefetch = 0 : i64, scratch_operands = 1 : i64, tpu.core_type = #tpu.core_type<tc>, window_params = [{transform_indices = @transform_0, window_bounds = array<i64: 1, 16, 128>}, {transform_indices = @transform_1, window_bounds = array<i64: 1, 128, 128>}, {transform_indices = @transform_2, window_bounds = array<i64: 1, 128>}, {transform_indices = @transform_3, window_bounds = array<i64: 16, 128>}, {transform_indices = @transform_4, window_bounds = array<i64: 16, 128>}]} {
    %c0_i32 = arith.constant 0 : i32
    %0 = arith.cmpi eq, %arg2, %c0_i32 : i32
    %c0_i32_0 = arith.constant 0 : i32
    %1 = arith.cmpi eq, %arg3, %c0_i32_0 : i32
    %2 = arith.andi %0, %1 : i1
    %3 = arith.extui %2 : i1 to i32
    %c0_i32_1 = arith.constant 0 : i32
    %4 = arith.cmpi ne, %3, %c0_i32_1 : i32
    scf.if %4 {
      %cst_14 = arith.constant 0.000000e+00 : f32
      %18 = vector.broadcast %cst_14 : f32 to vector<16x128xf32>
      %c0_15 = arith.constant 0 : index
      %c0_16 = arith.constant 0 : index
      %19 = vector.load %arg9[%c0_15, %c0_16] : memref<16x128xf32, #tpu.memory_space<vmem>>, vector<16x128xf32>
      tpu.vector_store %arg9[%c0_15, %c0_16], %18 {strides = array<i32>} : memref<16x128xf32, #tpu.memory_space<vmem>>, vector<16x128xf32>,
    } else {
    }
    %c0 = arith.constant 0 : index
    %c0_2 = arith.constant 0 : index
    %5 = vector.load %arg9[%c0, %c0_2] : memref<16x128xf32, #tpu.memory_space<vmem>>, vector<16x128xf32>
    %c0_3 = arith.constant 0 : index
    %c0_4 = arith.constant 0 : index
    %c0_5 = arith.constant 0 : index
    %6 = vector.load %arg4[%c0_3, %c0_4, %c0_5] : memref<1x16x128xbf16, #tpu.memory_space<vmem>>, vector<1x16x128xbf16>
    %7 = vector.shape_cast %6 : vector<1x16x128xbf16> to vector<16x128xbf16>
    %c0_6 = arith.constant 0 : index
    %c0_7 = arith.constant 0 : index
    %c0_8 = arith.constant 0 : index
    %8 = vector.load %arg5[%c0_6, %c0_7, %c0_8] : memref<1x128x128xbf16, #tpu.memory_space<vmem>>, vector<1x128x128xbf16>
    %9 = vector.shape_cast %8 : vector<1x128x128xbf16> to vector<128x128xbf16>
    %cst = arith.constant dense<0.000000e+00> : vector<16x128xf32>
    %10 = tpu.matmul %7, %9, %cst {dimension_numbers = #tpu.dot_dimension_numbers<[1], [0], [0], [1], [0, 0, 1, 1], [], []>} : vector<16x128xbf16>, vector<128x128xbf16>, vector<16x128xf32> -> vector<16x128xf32>
    %11 = arith.addf %5, %10 : vector<16x128xf32>
    %c0_9 = arith.constant 0 : index
    %c0_10 = arith.constant 0 : index
    %12 = vector.load %arg9[%c0_9, %c0_10] : memref<16x128xf32, #tpu.memory_space<vmem>>, vector<16x128xf32>
    tpu.vector_store %arg9[%c0_9, %c0_10], %11 {strides = array<i32>} : memref<16x128xf32, #tpu.memory_space<vmem>>, vector<16x128xf32>,
    %c0_i32_11 = arith.constant 0 : i32
    %13 = arith.cmpi eq, %arg2, %c0_i32_11 : i32
    %c0_i32_12 = arith.constant 0 : i32
    %14 = arith.cmpi eq, %arg3, %c0_i32_12 : i32
    %15 = arith.andi %13, %14 : i1
    %16 = arith.extui %15 : i1 to i32
    %c0_i32_13 = arith.constant 0 : i32
    %17 = arith.cmpi ne, %16, %c0_i32_13 : i32
    scf.if %17 {
      %c0_14 = arith.constant 0 : index
      %c0_15 = arith.constant 0 : index
      %18 = vector.load %arg9[%c0_14, %c0_15] : memref<16x128xf32, #tpu.memory_space<vmem>>, vector<16x128xf32>
      %c0_16 = arith.constant 0 : index
      %c0_17 = arith.constant 0 : index
      %19 = vector.load %arg6[%c0_16, %c0_17] : memref<1x128xf32, #tpu.memory_space<vmem>>, vector<1x128xf32>
      %20 = vector.broadcast %19 : vector<1x128xf32> to vector<16x128xf32>
      %21 = arith.addf %18, %20 : vector<16x128xf32>
      %c0_18 = arith.constant 0 : index
      %c0_19 = arith.constant 0 : index
      %22 = vector.load %arg7[%c0_18, %c0_19] : memref<16x128xbf16, #tpu.memory_space<vmem>>, vector<16x128xbf16>
      %23 = arith.extf %22 : vector<16x128xbf16> to vector<16x128xf32>
      %24 = arith.addf %21, %23 : vector<16x128xf32>
      %cst_20 = arith.constant 0.000000e+00 : f32
      %25 = vector.broadcast %cst_20 : f32 to vector<16x128xf32>
      %26 = arith.maximumf %24, %25 : vector<16x128xf32>
      %27 = arith.truncf %26 : vector<16x128xf32> to vector<16x128xbf16>
      %c0_21 = arith.constant 0 : index
      %c0_22 = arith.constant 0 : index
      %28 = vector.load %arg8[%c0_21, %c0_22] : memref<16x128xbf16, #tpu.memory_space<vmem>>, vector<16x128xbf16>
      tpu.vector_store %arg8[%c0_21, %c0_22], %27 {strides = array<i32>} : memref<16x128xbf16, #tpu.memory_space<vmem>>, vector<16x128xbf16>,
    } else {
    }
    return
  }
  func.func @transform_0(%arg0: i32, %arg1: i32, %arg2: i32, %arg3: i32) -> (i32, i32, i32) {
    %c0_i32 = arith.constant 0 : i32
    return %arg2, %arg0, %arg3 : i32, i32, i32
  }
  func.func @transform_1(%arg0: i32, %arg1: i32, %arg2: i32, %arg3: i32) -> (i32, i32, i32) {
    %c0_i32 = arith.constant 0 : i32
    return %arg2, %arg3, %arg1 : i32, i32, i32
  }
  func.func @transform_2(%arg0: i32, %arg1: i32, %arg2: i32, %arg3: i32) -> (i32, i32) {
    %c0_i32 = arith.constant 0 : i32
    %c0_i32_0 = arith.constant 0 : i32
    return %c0_i32, %arg1 : i32, i32
  }
  func.func @transform_3(%arg0: i32, %arg1: i32, %arg2: i32, %arg3: i32) -> (i32, i32) {
    %c0_i32 = arith.constant 0 : i32
    return %arg0, %arg1 : i32, i32
  }
  func.func @transform_4(%arg0: i32, %arg1: i32, %arg2: i32, %arg3: i32) -> (i32, i32) {
    %c0_i32 = arith.constant 0 : i32
    return %arg0, %arg1 : i32, i32
  }
}

module attributes {stable_mosaic.version = 11 : i64} {
  func.func @_fused_matmul_kernel(%arg0: i32, %arg1: i32, %arg2: i32, %arg3: i32, %arg4: memref<1x16x128xbf16, #tpu.memory_space<vmem>>, %arg5: memref<1x128x128xbf16, #tpu.memory_space<vmem>>, %arg6: memref<1x128xf32, #tpu.memory_space<vmem>>, %arg7: memref<16x128xbf16, #tpu.memory_space<vmem>>, %arg8: memref<16x128xf32, #tpu.memory_space<vmem>>) attributes {dimension_semantics = [#tpu.dimension_semantics<parallel>, #tpu.dimension_semantics<parallel>, #tpu.dimension_semantics<arbitrary>, #tpu.dimension_semantics<arbitrary>], iteration_bounds = array<i64: 1, 1, 1, 1>, scalar_prefetch = 0 : i64, scratch_operands = 1 : i64, tpu.core_type = #tpu.core_type<tc>, window_params = [{transform_indices = @transform_0, window_bounds = array<i64: 1, 16, 128>}, {transform_indices = @transform_1, window_bounds = array<i64: 1, 128, 128>}, {transform_indices = @transform_2, window_bounds = array<i64: 1, 128>}, {transform_indices = @transform_3, window_bounds = array<i64: 16, 128>}]} {
    %c0_i32 = arith.constant 0 : i32
    %0 = arith.cmpi eq, %arg2, %c0_i32 : i32
    %c0_i32_0 = arith.constant 0 : i32
    %1 = arith.cmpi eq, %arg3, %c0_i32_0 : i32
    %2 = arith.andi %0, %1 : i1
    %3 = arith.extui %2 : i1 to i32
    %c0_i32_1 = arith.constant 0 : i32
    %4 = arith.cmpi ne, %3, %c0_i32_1 : i32
    scf.if %4 {
      %cst_14 = arith.constant 0.000000e+00 : f32
      %18 = vector.broadcast %cst_14 : f32 to vector<16x128xf32>
      %c0_15 = arith.constant 0 : index
      %c0_16 = arith.constant 0 : index
      %19 = vector.load %arg8[%c0_15, %c0_16] : memref<16x128xf32, #tpu.memory_space<vmem>>, vector<16x128xf32>
      tpu.vector_store %arg8[%c0_15, %c0_16], %18 {strides = array<i32>} : memref<16x128xf32, #tpu.memory_space<vmem>>, vector<16x128xf32>,
    } else {
    }
    %c0 = arith.constant 0 : index
    %c0_2 = arith.constant 0 : index
    %5 = vector.load %arg8[%c0, %c0_2] : memref<16x128xf32, #tpu.memory_space<vmem>>, vector<16x128xf32>
    %c0_3 = arith.constant 0 : index
    %c0_4 = arith.constant 0 : index
    %c0_5 = arith.constant 0 : index
    %6 = vector.load %arg4[%c0_3, %c0_4, %c0_5] : memref<1x16x128xbf16, #tpu.memory_space<vmem>>, vector<1x16x128xbf16>
    %7 = vector.shape_cast %6 : vector<1x16x128xbf16> to vector<16x128xbf16>
    %c0_6 = arith.constant 0 : index
    %c0_7 = arith.constant 0 : index
    %c0_8 = arith.constant 0 : index
    %8 = vector.load %arg5[%c0_6, %c0_7, %c0_8] : memref<1x128x128xbf16, #tpu.memory_space<vmem>>, vector<1x128x128xbf16>
    %9 = vector.shape_cast %8 : vector<1x128x128xbf16> to vector<128x128xbf16>
    %cst = arith.constant dense<0.000000e+00> : vector<16x128xf32>
    %10 = tpu.matmul %7, %9, %cst {dimension_numbers = #tpu.dot_dimension_numbers<[1], [0], [0], [1], [0, 0, 1, 1], [], []>} : vector<16x128xbf16>, vector<128x128xbf16>, vector<16x128xf32> -> vector<16x128xf32>
    %11 = arith.addf %5, %10 : vector<16x128xf32>
    %c0_9 = arith.constant 0 : index
    %c0_10 = arith.constant 0 : index
    %12 = vector.load %arg8[%c0_9, %c0_10] : memref<16x128xf32, #tpu.memory_space<vmem>>, vector<16x128xf32>
    tpu.vector_store %arg8[%c0_9, %c0_10], %11 {strides = array<i32>} : memref<16x128xf32, #tpu.memory_space<vmem>>, vector<16x128xf32>,
    %c0_i32_11 = arith.constant 0 : i32
    %13 = arith.cmpi eq, %arg2, %c0_i32_11 : i32
    %c0_i32_12 = arith.constant 0 : i32
    %14 = arith.cmpi eq, %arg3, %c0_i32_12 : i32
    %15 = arith.andi %13, %14 : i1
    %16 = arith.extui %15 : i1 to i32
    %c0_i32_13 = arith.constant 0 : i32
    %17 = arith.cmpi ne, %16, %c0_i32_13 : i32
    scf.if %17 {
      %c0_14 = arith.constant 0 : index
      %c0_15 = arith.constant 0 : index
      %18 = vector.load %arg8[%c0_14, %c0_15] : memref<16x128xf32, #tpu.memory_space<vmem>>, vector<16x128xf32>
      %c0_16 = arith.constant 0 : index
      %c0_17 = arith.constant 0 : index
      %19 = vector.load %arg6[%c0_16, %c0_17] : memref<1x128xf32, #tpu.memory_space<vmem>>, vector<1x128xf32>
      %20 = vector.broadcast %19 : vector<1x128xf32> to vector<16x128xf32>
      %21 = arith.addf %18, %20 : vector<16x128xf32>
      %cst_18 = arith.constant 0.000000e+00 : f32
      %22 = vector.broadcast %cst_18 : f32 to vector<16x128xf32>
      %23 = arith.maximumf %21, %22 : vector<16x128xf32>
      %24 = arith.truncf %23 : vector<16x128xf32> to vector<16x128xbf16>
      %c0_19 = arith.constant 0 : index
      %c0_20 = arith.constant 0 : index
      %25 = vector.load %arg7[%c0_19, %c0_20] : memref<16x128xbf16, #tpu.memory_space<vmem>>, vector<16x128xbf16>
      tpu.vector_store %arg7[%c0_19, %c0_20], %24 {strides = array<i32>} : memref<16x128xbf16, #tpu.memory_space<vmem>>, vector<16x128xbf16>,
    } else {
    }
    return
  }
  func.func @transform_0(%arg0: i32, %arg1: i32, %arg2: i32, %arg3: i32) -> (i32, i32, i32) {
    %c0_i32 = arith.constant 0 : i32
    return %arg2, %arg0, %arg3 : i32, i32, i32
  }
  func.func @transform_1(%arg0: i32, %arg1: i32, %arg2: i32, %arg3: i32) -> (i32, i32, i32) {
    %c0_i32 = arith.constant 0 : i32
    return %arg2, %arg3, %arg1 : i32, i32, i32
  }
  func.func @transform_2(%arg0: i32, %arg1: i32, %arg2: i32, %arg3: i32) -> (i32, i32) {
    %c0_i32 = arith.constant 0 : i32
    %c0_i32_0 = arith.constant 0 : i32
    return %c0_i32, %arg1 : i32, i32
  }
  func.func @transform_3(%arg0: i32, %arg1: i32, %arg2: i32, %arg3: i32) -> (i32, i32) {
    %c0_i32 = arith.constant 0 : i32
    return %arg0, %arg1 : i32, i32
  }
}

module attributes {stable_mosaic.version = 11 : i64} {
  func.func @_fused_matmul_kernel(%arg0: i32, %arg1: i32, %arg2: i32, %arg3: i32, %arg4: memref<1x16x128xbf16, #tpu.memory_space<vmem>>, %arg5: memref<1x128x128xbf16, #tpu.memory_space<vmem>>, %arg6: memref<1x128xf32, #tpu.memory_space<vmem>>, %arg7: memref<16x128xbf16, #tpu.memory_space<vmem>>, %arg8: memref<16x128xf32, #tpu.memory_space<vmem>>) attributes {dimension_semantics = [#tpu.dimension_semantics<parallel>, #tpu.dimension_semantics<parallel>, #tpu.dimension_semantics<arbitrary>, #tpu.dimension_semantics<arbitrary>], iteration_bounds = array<i64: 1, 1, 9, 1>, scalar_prefetch = 0 : i64, scratch_operands = 1 : i64, tpu.core_type = #tpu.core_type<tc>, window_params = [{transform_indices = @transform_0, window_bounds = array<i64: 1, 16, 128>}, {transform_indices = @transform_1, window_bounds = array<i64: 1, 128, 128>}, {transform_indices = @transform_2, window_bounds = array<i64: 1, 128>}, {transform_indices = @transform_3, window_bounds = array<i64: 16, 128>}]} {
    %c0_i32 = arith.constant 0 : i32
    %0 = arith.cmpi eq, %arg2, %c0_i32 : i32
    %c0_i32_0 = arith.constant 0 : i32
    %1 = arith.cmpi eq, %arg3, %c0_i32_0 : i32
    %2 = arith.andi %0, %1 : i1
    %3 = arith.extui %2 : i1 to i32
    %c0_i32_1 = arith.constant 0 : i32
    %4 = arith.cmpi ne, %3, %c0_i32_1 : i32
    scf.if %4 {
      %cst_13 = arith.constant 0.000000e+00 : f32
      %18 = vector.broadcast %cst_13 : f32 to vector<16x128xf32>
      %c0_14 = arith.constant 0 : index
      %c0_15 = arith.constant 0 : index
      %19 = vector.load %arg8[%c0_14, %c0_15] : memref<16x128xf32, #tpu.memory_space<vmem>>, vector<16x128xf32>
      tpu.vector_store %arg8[%c0_14, %c0_15], %18 {strides = array<i32>} : memref<16x128xf32, #tpu.memory_space<vmem>>, vector<16x128xf32>,
    } else {
    }
    %c0 = arith.constant 0 : index
    %c0_2 = arith.constant 0 : index
    %5 = vector.load %arg8[%c0, %c0_2] : memref<16x128xf32, #tpu.memory_space<vmem>>, vector<16x128xf32>
    %c0_3 = arith.constant 0 : index
    %c0_4 = arith.constant 0 : index
    %c0_5 = arith.constant 0 : index
    %6 = vector.load %arg4[%c0_3, %c0_4, %c0_5] : memref<1x16x128xbf16, #tpu.memory_space<vmem>>, vector<1x16x128xbf16>
    %7 = vector.shape_cast %6 : vector<1x16x128xbf16> to vector<16x128xbf16>
    %c0_6 = arith.constant 0 : index
    %c0_7 = arith.constant 0 : index
    %c0_8 = arith.constant 0 : index
    %8 = vector.load %arg5[%c0_6, %c0_7, %c0_8] : memref<1x128x128xbf16, #tpu.memory_space<vmem>>, vector<1x128x128xbf16>
    %9 = vector.shape_cast %8 : vector<1x128x128xbf16> to vector<128x128xbf16>
    %cst = arith.constant dense<0.000000e+00> : vector<16x128xf32>
    %10 = tpu.matmul %7, %9, %cst {dimension_numbers = #tpu.dot_dimension_numbers<[1], [0], [0], [1], [0, 0, 1, 1], [], []>} : vector<16x128xbf16>, vector<128x128xbf16>, vector<16x128xf32> -> vector<16x128xf32>
    %11 = arith.addf %5, %10 : vector<16x128xf32>
    %c0_9 = arith.constant 0 : index
    %c0_10 = arith.constant 0 : index
    %12 = vector.load %arg8[%c0_9, %c0_10] : memref<16x128xf32, #tpu.memory_space<vmem>>, vector<16x128xf32>
    tpu.vector_store %arg8[%c0_9, %c0_10], %11 {strides = array<i32>} : memref<16x128xf32, #tpu.memory_space<vmem>>, vector<16x128xf32>,
    %c8_i32 = arith.constant 8 : i32
    %13 = arith.cmpi eq, %arg2, %c8_i32 : i32
    %c0_i32_11 = arith.constant 0 : i32
    %14 = arith.cmpi eq, %arg3, %c0_i32_11 : i32
    %15 = arith.andi %13, %14 : i1
    %16 = arith.extui %15 : i1 to i32
    %c0_i32_12 = arith.constant 0 : i32
    %17 = arith.cmpi ne, %16, %c0_i32_12 : i32
    scf.if %17 {
      %c0_13 = arith.constant 0 : index
      %c0_14 = arith.constant 0 : index
      %18 = vector.load %arg8[%c0_13, %c0_14] : memref<16x128xf32, #tpu.memory_space<vmem>>, vector<16x128xf32>
      %c0_15 = arith.constant 0 : index
      %c0_16 = arith.constant 0 : index
      %19 = vector.load %arg6[%c0_15, %c0_16] : memref<1x128xf32, #tpu.memory_space<vmem>>, vector<1x128xf32>
      %20 = vector.broadcast %19 : vector<1x128xf32> to vector<16x128xf32>
      %21 = arith.addf %18, %20 : vector<16x128xf32>
      %cst_17 = arith.constant 0.000000e+00 : f32
      %22 = vector.broadcast %cst_17 : f32 to vector<16x128xf32>
      %23 = arith.maximumf %21, %22 : vector<16x128xf32>
      %24 = arith.truncf %23 : vector<16x128xf32> to vector<16x128xbf16>
      %c0_18 = arith.constant 0 : index
      %c0_19 = arith.constant 0 : index
      %25 = vector.load %arg7[%c0_18, %c0_19] : memref<16x128xbf16, #tpu.memory_space<vmem>>, vector<16x128xbf16>
      tpu.vector_store %arg7[%c0_18, %c0_19], %24 {strides = array<i32>} : memref<16x128xbf16, #tpu.memory_space<vmem>>, vector<16x128xbf16>,
    } else {
    }
    return
  }
  func.func @transform_0(%arg0: i32, %arg1: i32, %arg2: i32, %arg3: i32) -> (i32, i32, i32) {
    %c0_i32 = arith.constant 0 : i32
    return %arg2, %arg0, %arg3 : i32, i32, i32
  }
  func.func @transform_1(%arg0: i32, %arg1: i32, %arg2: i32, %arg3: i32) -> (i32, i32, i32) {
    %c0_i32 = arith.constant 0 : i32
    return %arg2, %arg3, %arg1 : i32, i32, i32
  }
  func.func @transform_2(%arg0: i32, %arg1: i32, %arg2: i32, %arg3: i32) -> (i32, i32) {
    %c0_i32 = arith.constant 0 : i32
    %c0_i32_0 = arith.constant 0 : i32
    return %c0_i32, %arg1 : i32, i32
  }
  func.func @transform_3(%arg0: i32, %arg1: i32, %arg2: i32, %arg3: i32) -> (i32, i32) {
    %c0_i32 = arith.constant 0 : i32
    return %arg0, %arg1 : i32, i32
  }
}

module attributes {stable_mosaic.version = 11 : i64} {
  func.func @_fused_matmul_kernel(%arg0: i32, %arg1: i32, %arg2: i32, %arg3: i32, %arg4: memref<1x16x128xbf16, #tpu.memory_space<vmem>>, %arg5: memref<1x128x256xbf16, #tpu.memory_space<vmem>>, %arg6: memref<1x256xf32, #tpu.memory_space<vmem>>, %arg7: memref<16x256xbf16, #tpu.memory_space<vmem>>, %arg8: memref<16x256xf32, #tpu.memory_space<vmem>>) attributes {dimension_semantics = [#tpu.dimension_semantics<parallel>, #tpu.dimension_semantics<parallel>, #tpu.dimension_semantics<arbitrary>, #tpu.dimension_semantics<arbitrary>], iteration_bounds = array<i64: 1, 1, 1, 1>, scalar_prefetch = 0 : i64, scratch_operands = 1 : i64, tpu.core_type = #tpu.core_type<tc>, window_params = [{transform_indices = @transform_0, window_bounds = array<i64: 1, 16, 128>}, {transform_indices = @transform_1, window_bounds = array<i64: 1, 128, 256>}, {transform_indices = @transform_2, window_bounds = array<i64: 1, 256>}, {transform_indices = @transform_3, window_bounds = array<i64: 16, 256>}]} {
    %c0_i32 = arith.constant 0 : i32
    %0 = arith.cmpi eq, %arg2, %c0_i32 : i32
    %c0_i32_0 = arith.constant 0 : i32
    %1 = arith.cmpi eq, %arg3, %c0_i32_0 : i32
    %2 = arith.andi %0, %1 : i1
    %3 = arith.extui %2 : i1 to i32
    %c0_i32_1 = arith.constant 0 : i32
    %4 = arith.cmpi ne, %3, %c0_i32_1 : i32
    scf.if %4 {
      %cst_14 = arith.constant 0.000000e+00 : f32
      %18 = vector.broadcast %cst_14 : f32 to vector<16x256xf32>
      %c0_15 = arith.constant 0 : index
      %c0_16 = arith.constant 0 : index
      %19 = vector.load %arg8[%c0_15, %c0_16] : memref<16x256xf32, #tpu.memory_space<vmem>>, vector<16x256xf32>
      tpu.vector_store %arg8[%c0_15, %c0_16], %18 {strides = array<i32>} : memref<16x256xf32, #tpu.memory_space<vmem>>, vector<16x256xf32>,
    } else {
    }
    %c0 = arith.constant 0 : index
    %c0_2 = arith.constant 0 : index
    %5 = vector.load %arg8[%c0, %c0_2] : memref<16x256xf32, #tpu.memory_space<vmem>>, vector<16x256xf32>
    %c0_3 = arith.constant 0 : index
    %c0_4 = arith.constant 0 : index
    %c0_5 = arith.constant 0 : index
    %6 = vector.load %arg4[%c0_3, %c0_4, %c0_5] : memref<1x16x128xbf16, #tpu.memory_space<vmem>>, vector<1x16x128xbf16>
    %7 = vector.shape_cast %6 : vector<1x16x128xbf16> to vector<16x128xbf16>
    %c0_6 = arith.constant 0 : index
    %c0_7 = arith.constant 0 : index
    %c0_8 = arith.constant 0 : index
    %8 = vector.load %arg5[%c0_6, %c0_7, %c0_8] : memref<1x128x256xbf16, #tpu.memory_space<vmem>>, vector<1x128x256xbf16>
    %9 = vector.shape_cast %8 : vector<1x128x256xbf16> to vector<128x256xbf16>
    %cst = arith.constant dense<0.000000e+00> : vector<16x256xf32>
    %10 = tpu.matmul %7, %9, %cst {dimension_numbers = #tpu.dot_dimension_numbers<[1], [0], [0], [1], [0, 0, 1, 1], [], []>} : vector<16x128xbf16>, vector<128x256xbf16>, vector<16x256xf32> -> vector<16x256xf32>
    %11 = arith.addf %5, %10 : vector<16x256xf32>
    %c0_9 = arith.constant 0 : index
    %c0_10 = arith.constant 0 : index
    %12 = vector.load %arg8[%c0_9, %c0_10] : memref<16x256xf32, #tpu.memory_space<vmem>>, vector<16x256xf32>
    tpu.vector_store %arg8[%c0_9, %c0_10], %11 {strides = array<i32>} : memref<16x256xf32, #tpu.memory_space<vmem>>, vector<16x256xf32>,
    %c0_i32_11 = arith.constant 0 : i32
    %13 = arith.cmpi eq, %arg2, %c0_i32_11 : i32
    %c0_i32_12 = arith.constant 0 : i32
    %14 = arith.cmpi eq, %arg3, %c0_i32_12 : i32
    %15 = arith.andi %13, %14 : i1
    %16 = arith.extui %15 : i1 to i32
    %c0_i32_13 = arith.constant 0 : i32
    %17 = arith.cmpi ne, %16, %c0_i32_13 : i32
    scf.if %17 {
      %c0_14 = arith.constant 0 : index
      %c0_15 = arith.constant 0 : index
      %18 = vector.load %arg8[%c0_14, %c0_15] : memref<16x256xf32, #tpu.memory_space<vmem>>, vector<16x256xf32>
      %c0_16 = arith.constant 0 : index
      %c0_17 = arith.constant 0 : index
      %19 = vector.load %arg6[%c0_16, %c0_17] : memref<1x256xf32, #tpu.memory_space<vmem>>, vector<1x256xf32>
      %20 = vector.broadcast %19 : vector<1x256xf32> to vector<16x256xf32>
      %21 = arith.addf %18, %20 : vector<16x256xf32>
      %22 = arith.truncf %21 : vector<16x256xf32> to vector<16x256xbf16>
      %c0_18 = arith.constant 0 : index
      %c0_19 = arith.constant 0 : index
      %23 = vector.load %arg7[%c0_18, %c0_19] : memref<16x256xbf16, #tpu.memory_space<vmem>>, vector<16x256xbf16>
      tpu.vector_store %arg7[%c0_18, %c0_19], %22 {strides = array<i32>} : memref<16x256xbf16, #tpu.memory_space<vmem>>, vector<16x256xbf16>,
    } else {
    }
    return
  }
  func.func @transform_0(%arg0: i32, %arg1: i32, %arg2: i32, %arg3: i32) -> (i32, i32, i32) {
    %c0_i32 = arith.constant 0 : i32
    return %arg2, %arg0, %arg3 : i32, i32, i32
  }
  func.func @transform_1(%arg0: i32, %arg1: i32, %arg2: i32, %arg3: i32) -> (i32, i32, i32) {
    %c0_i32 = arith.constant 0 : i32
    return %arg2, %arg3, %arg1 : i32, i32, i32
  }
  func.func @transform_2(%arg0: i32, %arg1: i32, %arg2: i32, %arg3: i32) -> (i32, i32) {
    %c0_i32 = arith.constant 0 : i32
    %c0_i32_0 = arith.constant 0 : i32
    return %c0_i32, %arg1 : i32, i32
  }
  func.func @transform_3(%arg0: i32, %arg1: i32, %arg2: i32, %arg3: i32) -> (i32, i32) {
    %c0_i32 = arith.constant 0 : i32
    return %arg0, %arg1 : i32, i32
  }
}

module attributes {stable_mosaic.version = 11 : i64} {
  func.func @_global_avg_kernel(%arg0: i32, %arg1: memref<2x1x256xbf16, #tpu.memory_space<vmem>>, %arg2: memref<2x256xbf16, #tpu.memory_space<vmem>>) attributes {dimension_semantics = [#tpu.dimension_semantics<parallel>], iteration_bounds = array<i64: 1>, scalar_prefetch = 0 : i64, scratch_operands = 0 : i64, tpu.core_type = #tpu.core_type<tc>, window_params = [{transform_indices = @transform_0, window_bounds = array<i64: 2, 1, 256>}, {transform_indices = @transform_1, window_bounds = array<i64: 2, 256>}]} {
    %c0 = arith.constant 0 : index
    %c0_0 = arith.constant 0 : index
    %c0_1 = arith.constant 0 : index
    %0 = vector.load %arg1[%c0, %c0_0, %c0_1] : memref<2x1x256xbf16, #tpu.memory_space<vmem>>, vector<2x1x256xbf16>
    %1 = arith.extf %0 : vector<2x1x256xbf16> to vector<2x1x256xf32>
    %cst = arith.constant dense<0.000000e+00> : vector<2x256xf32>
    %2 = vector.multi_reduction <add>, %1, %cst [1] : vector<2x1x256xf32> to vector<2x256xf32>
    %cst_2 = arith.constant 1.000000e+00 : f32
    %3 = vector.broadcast %cst_2 : f32 to vector<2x256xf32>
    %4 = arith.divf %2, %3 : vector<2x256xf32>
    %5 = arith.truncf %4 : vector<2x256xf32> to vector<2x256xbf16>
    %c0_3 = arith.constant 0 : index
    %c0_4 = arith.constant 0 : index
    %6 = vector.load %arg2[%c0_3, %c0_4] : memref<2x256xbf16, #tpu.memory_space<vmem>>, vector<2x256xbf16>
    tpu.vector_store %arg2[%c0_3, %c0_4], %5 {strides = array<i32>} : memref<2x256xbf16, #tpu.memory_space<vmem>>, vector<2x256xbf16>,
    return
  }
  func.func @transform_0(%arg0: i32) -> (i32, i32, i32) {
    %c0_i32 = arith.constant 0 : i32
    %c0_i32_0 = arith.constant 0 : i32
    %c0_i32_1 = arith.constant 0 : i32
    return %c0_i32, %c0_i32_0, %arg0 : i32, i32, i32
  }
  func.func @transform_1(%arg0: i32) -> (i32, i32) {
    %c0_i32 = arith.constant 0 : i32
    %c0_i32_0 = arith.constant 0 : i32
    return %c0_i32, %arg0 : i32, i32
  }
}

module attributes {stable_mosaic.version = 11 : i64} {
  func.func @_fused_matmul_kernel(%arg0: i32, %arg1: i32, %arg2: i32, %arg3: i32, %arg4: memref<1x16x256xbf16, #tpu.memory_space<vmem>>, %arg5: memref<1x256x128xbf16, #tpu.memory_space<vmem>>, %arg6: memref<1x128xf32, #tpu.memory_space<vmem>>, %arg7: memref<16x128xf32, #tpu.memory_space<vmem>>, %arg8: memref<16x128xf32, #tpu.memory_space<vmem>>) attributes {dimension_semantics = [#tpu.dimension_semantics<parallel>, #tpu.dimension_semantics<parallel>, #tpu.dimension_semantics<arbitrary>, #tpu.dimension_semantics<arbitrary>], iteration_bounds = array<i64: 1, 1, 1, 1>, scalar_prefetch = 0 : i64, scratch_operands = 1 : i64, tpu.core_type = #tpu.core_type<tc>, window_params = [{transform_indices = @transform_0, window_bounds = array<i64: 1, 16, 256>}, {transform_indices = @transform_1, window_bounds = array<i64: 1, 256, 128>}, {transform_indices = @transform_2, window_bounds = array<i64: 1, 128>}, {transform_indices = @transform_3, window_bounds = array<i64: 16, 128>}]} {
    %c0_i32 = arith.constant 0 : i32
    %0 = arith.cmpi eq, %arg2, %c0_i32 : i32
    %c0_i32_0 = arith.constant 0 : i32
    %1 = arith.cmpi eq, %arg3, %c0_i32_0 : i32
    %2 = arith.andi %0, %1 : i1
    %3 = arith.extui %2 : i1 to i32
    %c0_i32_1 = arith.constant 0 : i32
    %4 = arith.cmpi ne, %3, %c0_i32_1 : i32
    scf.if %4 {
      %cst_14 = arith.constant 0.000000e+00 : f32
      %18 = vector.broadcast %cst_14 : f32 to vector<16x128xf32>
      %c0_15 = arith.constant 0 : index
      %c0_16 = arith.constant 0 : index
      %19 = vector.load %arg8[%c0_15, %c0_16] : memref<16x128xf32, #tpu.memory_space<vmem>>, vector<16x128xf32>
      tpu.vector_store %arg8[%c0_15, %c0_16], %18 {strides = array<i32>} : memref<16x128xf32, #tpu.memory_space<vmem>>, vector<16x128xf32>,
    } else {
    }
    %c0 = arith.constant 0 : index
    %c0_2 = arith.constant 0 : index
    %5 = vector.load %arg8[%c0, %c0_2] : memref<16x128xf32, #tpu.memory_space<vmem>>, vector<16x128xf32>
    %c0_3 = arith.constant 0 : index
    %c0_4 = arith.constant 0 : index
    %c0_5 = arith.constant 0 : index
    %6 = vector.load %arg4[%c0_3, %c0_4, %c0_5] : memref<1x16x256xbf16, #tpu.memory_space<vmem>>, vector<1x16x256xbf16>
    %7 = vector.shape_cast %6 : vector<1x16x256xbf16> to vector<16x256xbf16>
    %c0_6 = arith.constant 0 : index
    %c0_7 = arith.constant 0 : index
    %c0_8 = arith.constant 0 : index
    %8 = vector.load %arg5[%c0_6, %c0_7, %c0_8] : memref<1x256x128xbf16, #tpu.memory_space<vmem>>, vector<1x256x128xbf16>
    %9 = vector.shape_cast %8 : vector<1x256x128xbf16> to vector<256x128xbf16>
    %cst = arith.constant dense<0.000000e+00> : vector<16x128xf32>
    %10 = tpu.matmul %7, %9, %cst {dimension_numbers = #tpu.dot_dimension_numbers<[1], [0], [0], [1], [0, 0, 1, 1], [], []>} : vector<16x256xbf16>, vector<256x128xbf16>, vector<16x128xf32> -> vector<16x128xf32>
    %11 = arith.addf %5, %10 : vector<16x128xf32>
    %c0_9 = arith.constant 0 : index
    %c0_10 = arith.constant 0 : index
    %12 = vector.load %arg8[%c0_9, %c0_10] : memref<16x128xf32, #tpu.memory_space<vmem>>, vector<16x128xf32>
    tpu.vector_store %arg8[%c0_9, %c0_10], %11 {strides = array<i32>} : memref<16x128xf32, #tpu.memory_space<vmem>>, vector<16x128xf32>,
    %c0_i32_11 = arith.constant 0 : i32
    %13 = arith.cmpi eq, %arg2, %c0_i32_11 : i32
    %c0_i32_12 = arith.constant 0 : i32
    %14 = arith.cmpi eq, %arg3, %c0_i32_12 : i32
    %15 = arith.andi %13, %14 : i1
    %16 = arith.extui %15 : i1 to i32
    %c0_i32_13 = arith.constant 0 : i32
    %17 = arith.cmpi ne, %16, %c0_i32_13 : i32
    scf.if %17 {
      %c0_14 = arith.constant 0 : index
      %c0_15 = arith.constant 0 : index
      %18 = vector.load %arg8[%c0_14, %c0_15] : memref<16x128xf32, #tpu.memory_space<vmem>>, vector<16x128xf32>
      %c0_16 = arith.constant 0 : index
      %c0_17 = arith.constant 0 : index
      %19 = vector.load %arg6[%c0_16, %c0_17] : memref<1x128xf32, #tpu.memory_space<vmem>>, vector<1x128xf32>
      %20 = vector.broadcast %19 : vector<1x128xf32> to vector<16x128xf32>
      %21 = arith.addf %18, %20 : vector<16x128xf32>
      %c0_18 = arith.constant 0 : index
      %c0_19 = arith.constant 0 : index
      %22 = vector.load %arg7[%c0_18, %c0_19] : memref<16x128xf32, #tpu.memory_space<vmem>>, vector<16x128xf32>
      tpu.vector_store %arg7[%c0_18, %c0_19], %21 {strides = array<i32>} : memref<16x128xf32, #tpu.memory_space<vmem>>, vector<16x128xf32>,
    } else {
    }
    return
  }
  func.func @transform_0(%arg0: i32, %arg1: i32, %arg2: i32, %arg3: i32) -> (i32, i32, i32) {
    %c0_i32 = arith.constant 0 : i32
    return %arg2, %arg0, %arg3 : i32, i32, i32
  }
  func.func @transform_1(%arg0: i32, %arg1: i32, %arg2: i32, %arg3: i32) -> (i32, i32, i32) {
    %c0_i32 = arith.constant 0 : i32
    return %arg2, %arg3, %arg1 : i32, i32, i32
  }
  func.func @transform_2(%arg0: i32, %arg1: i32, %arg2: i32, %arg3: i32) -> (i32, i32) {
    %c0_i32 = arith.constant 0 : i32
    %c0_i32_0 = arith.constant 0 : i32
    return %c0_i32, %arg1 : i32, i32
  }
  func.func @transform_3(%arg0: i32, %arg1: i32, %arg2: i32, %arg3: i32) -> (i32, i32) {
    %c0_i32 = arith.constant 0 : i32
    return %arg0, %arg1 : i32, i32
  }
}

module attributes {stable_mosaic.version = 11 : i64} {
  func.func @_fused_matmul_kernel(%arg0: i32, %arg1: i32, %arg2: i32, %arg3: i32, %arg4: memref<1x16x128xbf16, #tpu.memory_space<vmem>>, %arg5: memref<1x128x256xbf16, #tpu.memory_space<vmem>>, %arg6: memref<1x256xf32, #tpu.memory_space<vmem>>, %arg7: memref<16x256xbf16, #tpu.memory_space<vmem>>, %arg8: memref<16x256xbf16, #tpu.memory_space<vmem>>, %arg9: memref<16x256xf32, #tpu.memory_space<vmem>>) attributes {dimension_semantics = [#tpu.dimension_semantics<parallel>, #tpu.dimension_semantics<parallel>, #tpu.dimension_semantics<arbitrary>, #tpu.dimension_semantics<arbitrary>], iteration_bounds = array<i64: 1, 1, 1, 1>, scalar_prefetch = 0 : i64, scratch_operands = 1 : i64, tpu.core_type = #tpu.core_type<tc>, window_params = [{transform_indices = @transform_0, window_bounds = array<i64: 1, 16, 128>}, {transform_indices = @transform_1, window_bounds = array<i64: 1, 128, 256>}, {transform_indices = @transform_2, window_bounds = array<i64: 1, 256>}, {transform_indices = @transform_3, window_bounds = array<i64: 16, 256>}, {transform_indices = @transform_4, window_bounds = array<i64: 16, 256>}]} {
    %c0_i32 = arith.constant 0 : i32
    %0 = arith.cmpi eq, %arg2, %c0_i32 : i32
    %c0_i32_0 = arith.constant 0 : i32
    %1 = arith.cmpi eq, %arg3, %c0_i32_0 : i32
    %2 = arith.andi %0, %1 : i1
    %3 = arith.extui %2 : i1 to i32
    %c0_i32_1 = arith.constant 0 : i32
    %4 = arith.cmpi ne, %3, %c0_i32_1 : i32
    scf.if %4 {
      %cst_14 = arith.constant 0.000000e+00 : f32
      %18 = vector.broadcast %cst_14 : f32 to vector<16x256xf32>
      %c0_15 = arith.constant 0 : index
      %c0_16 = arith.constant 0 : index
      %19 = vector.load %arg9[%c0_15, %c0_16] : memref<16x256xf32, #tpu.memory_space<vmem>>, vector<16x256xf32>
      tpu.vector_store %arg9[%c0_15, %c0_16], %18 {strides = array<i32>} : memref<16x256xf32, #tpu.memory_space<vmem>>, vector<16x256xf32>,
    } else {
    }
    %c0 = arith.constant 0 : index
    %c0_2 = arith.constant 0 : index
    %5 = vector.load %arg9[%c0, %c0_2] : memref<16x256xf32, #tpu.memory_space<vmem>>, vector<16x256xf32>
    %c0_3 = arith.constant 0 : index
    %c0_4 = arith.constant 0 : index
    %c0_5 = arith.constant 0 : index
    %6 = vector.load %arg4[%c0_3, %c0_4, %c0_5] : memref<1x16x128xbf16, #tpu.memory_space<vmem>>, vector<1x16x128xbf16>
    %7 = vector.shape_cast %6 : vector<1x16x128xbf16> to vector<16x128xbf16>
    %c0_6 = arith.constant 0 : index
    %c0_7 = arith.constant 0 : index
    %c0_8 = arith.constant 0 : index
    %8 = vector.load %arg5[%c0_6, %c0_7, %c0_8] : memref<1x128x256xbf16, #tpu.memory_space<vmem>>, vector<1x128x256xbf16>
    %9 = vector.shape_cast %8 : vector<1x128x256xbf16> to vector<128x256xbf16>
    %cst = arith.constant dense<0.000000e+00> : vector<16x256xf32>
    %10 = tpu.matmul %7, %9, %cst {dimension_numbers = #tpu.dot_dimension_numbers<[1], [0], [0], [1], [0, 0, 1, 1], [], []>} : vector<16x128xbf16>, vector<128x256xbf16>, vector<16x256xf32> -> vector<16x256xf32>
    %11 = arith.addf %5, %10 : vector<16x256xf32>
    %c0_9 = arith.constant 0 : index
    %c0_10 = arith.constant 0 : index
    %12 = vector.load %arg9[%c0_9, %c0_10] : memref<16x256xf32, #tpu.memory_space<vmem>>, vector<16x256xf32>
    tpu.vector_store %arg9[%c0_9, %c0_10], %11 {strides = array<i32>} : memref<16x256xf32, #tpu.memory_space<vmem>>, vector<16x256xf32>,
    %c0_i32_11 = arith.constant 0 : i32
    %13 = arith.cmpi eq, %arg2, %c0_i32_11 : i32
    %c0_i32_12 = arith.constant 0 : i32
    %14 = arith.cmpi eq, %arg3, %c0_i32_12 : i32
    %15 = arith.andi %13, %14 : i1
    %16 = arith.extui %15 : i1 to i32
    %c0_i32_13 = arith.constant 0 : i32
    %17 = arith.cmpi ne, %16, %c0_i32_13 : i32
    scf.if %17 {
      %c0_14 = arith.constant 0 : index
      %c0_15 = arith.constant 0 : index
      %18 = vector.load %arg9[%c0_14, %c0_15] : memref<16x256xf32, #tpu.memory_space<vmem>>, vector<16x256xf32>
      %c0_16 = arith.constant 0 : index
      %c0_17 = arith.constant 0 : index
      %19 = vector.load %arg6[%c0_16, %c0_17] : memref<1x256xf32, #tpu.memory_space<vmem>>, vector<1x256xf32>
      %20 = vector.broadcast %19 : vector<1x256xf32> to vector<16x256xf32>
      %21 = arith.addf %18, %20 : vector<16x256xf32>
      %c0_18 = arith.constant 0 : index
      %c0_19 = arith.constant 0 : index
      %22 = vector.load %arg7[%c0_18, %c0_19] : memref<16x256xbf16, #tpu.memory_space<vmem>>, vector<16x256xbf16>
      %23 = arith.extf %22 : vector<16x256xbf16> to vector<16x256xf32>
      %24 = arith.addf %21, %23 : vector<16x256xf32>
      %cst_20 = arith.constant 0.000000e+00 : f32
      %25 = vector.broadcast %cst_20 : f32 to vector<16x256xf32>
      %26 = arith.maximumf %24, %25 : vector<16x256xf32>
      %27 = arith.truncf %26 : vector<16x256xf32> to vector<16x256xbf16>
      %c0_21 = arith.constant 0 : index
      %c0_22 = arith.constant 0 : index
      %28 = vector.load %arg8[%c0_21, %c0_22] : memref<16x256xbf16, #tpu.memory_space<vmem>>, vector<16x256xbf16>
      tpu.vector_store %arg8[%c0_21, %c0_22], %27 {strides = array<i32>} : memref<16x256xbf16, #tpu.memory_space<vmem>>, vector<16x256xbf16>,
    } else {
    }
    return
  }
  func.func @transform_0(%arg0: i32, %arg1: i32, %arg2: i32, %arg3: i32) -> (i32, i32, i32) {
    %c0_i32 = arith.constant 0 : i32
    return %arg2, %arg0, %arg3 : i32, i32, i32
  }
  func.func @transform_1(%arg0: i32, %arg1: i32, %arg2: i32, %arg3: i32) -> (i32, i32, i32) {
    %c0_i32 = arith.constant 0 : i32
    return %arg2, %arg3, %arg1 : i32, i32, i32
  }
  func.func @transform_2(%arg0: i32, %arg1: i32, %arg2: i32, %arg3: i32) -> (i32, i32) {
    %c0_i32 = arith.constant 0 : i32
    %c0_i32_0 = arith.constant 0 : i32
    return %c0_i32, %arg1 : i32, i32
  }
  func.func @transform_3(%arg0: i32, %arg1: i32, %arg2: i32, %arg3: i32) -> (i32, i32) {
    %c0_i32 = arith.constant 0 : i32
    return %arg0, %arg1 : i32, i32
  }
  func.func @transform_4(%arg0: i32, %arg1: i32, %arg2: i32, %arg3: i32) -> (i32, i32) {
    %c0_i32 = arith.constant 0 : i32
    return %arg0, %arg1 : i32, i32
  }
}

</mosaic_0001>

<bundles_post_ra>
// kernel: resnet_forward.28
= control target key start
LH: loop header
LB: loop body
LE: loop exit
PB: predicated region body
PF: predicated region fallthrough
CT: control target
= control target key end

     0   :  { %s598_s1 = inlined_call_operand.vmem [shape: bf16[1,128,128], index: 1, kind: input, shape index: {}]   ;;  %s599_s2 = inlined_call_operand.vmem [shape: f32[1,128], index: 2, kind: input, shape index: {}]   ;;  %s600_s0 = inlined_call_operand.vmem [shape: bf16[1,128,128], index: 0, kind: input, shape index: {}]   ;;  %s601_s3 = inlined_call_operand.vmem [shape: bf16[128,128], index: 3, kind: output, shape index: {}]  }
   0x1   :  { %v430_v0 = vld [vmem:[%s598_s1 + $0x38] sm:$0xff]  ;;  %v429_v1 = vld [vmem:[%s598_s1 + $0x30] sm:$0xff]  ;;  %v428_v2 = vld [vmem:[%s598_s1 + $0x28] sm:$0xff] }
   0x2   :  { %180 = vmatpush.bf16.msra.mxu0 %v430_v0  ;;  %478 = vmatpush.bf16.msra.mxu1 %v430_v0  ;;  %v427_v3 = vld [vmem:[%s598_s1 + $0x20] sm:$0xff]  ;;  %v426_v4 = vld [vmem:[%s598_s1 + $0x18] sm:$0xff]  ;;  %v425_v5 = vld [vmem:[%s598_s1 + $0x10] sm:$0xff] }
   0x3   :  { %479 = vmatpush.bf16.msra.mxu2 %v430_v0  ;;  %480 = vmatpush.bf16.msra.mxu3 %v430_v0  ;;  %v424_v6 = vld [vmem:[%s598_s1 + $0x8] sm:$0xff]  ;;  %v423_v7 = vld [vmem:[%s598_s1] sm:$0xff]  ;;  %v417_v9 = vld [vmem:[%s600_s0 + $0x10] sm:$0xff] }
   0x4   :  { %v415_v8 = vld [vmem:[%s600_s0] sm:$0xff]  ;;  %v421_v11 = vld [vmem:[%s600_s0 + $0x30] sm:$0xff]  ;;  %v416_v12 = vld [vmem:[%s600_s0 + $0x8] sm:$0xff] }
   0x5   :  { %v419_v10 = vld [vmem:[%s600_s0 + $0x20] sm:$0xff]  ;;  %v418_v13 = vld [vmem:[%s600_s0 + $0x18] sm:$0xff]  ;;  %v420_v14 = vld [vmem:[%s600_s0 + $0x28] sm:$0xff] }
   0x6   :  { %181 = vmatpush.bf16.msra.mxu0 %v429_v1  ;;  %481 = vmatpush.bf16.msra.mxu1 %v429_v1  ;;  %v422_v15 = vld [vmem:[%s600_s0 + $0x38] sm:$0xff]  ;;  %v502_v18 = vld [vmem:[%s599_s2] ss:$0 sm:$0xff] }
   0x7   :  { %482 = vmatpush.bf16.msra.mxu2 %v429_v1  ;;  %483 = vmatpush.bf16.msra.mxu3 %v429_v1 }
   0xa   :  { %182 = vmatpush.bf16.msra.mxu0 %v428_v2  ;;  %484 = vmatpush.bf16.msra.mxu1 %v428_v2 }
   0xb   :  { %485 = vmatpush.bf16.msra.mxu2 %v428_v2  ;;  %486 = vmatpush.bf16.msra.mxu3 %v428_v2 }
   0xe   :  { %183 = vmatpush.bf16.msra.mxu0 %v427_v3  ;;  %487 = vmatpush.bf16.msra.mxu1 %v427_v3 }
   0xf   :  { %488 = vmatpush.bf16.msra.mxu2 %v427_v3  ;;  %489 = vmatpush.bf16.msra.mxu3 %v427_v3 }
  0x12   :  { %184 = vmatpush.bf16.msra.mxu0 %v426_v4  ;;  %490 = vmatpush.bf16.msra.mxu1 %v426_v4 }
  0x13   :  { %491 = vmatpush.bf16.msra.mxu2 %v426_v4  ;;  %492 = vmatpush.bf16.msra.mxu3 %v426_v4 }
  0x16   :  { %185 = vmatpush.bf16.msra.mxu0 %v425_v5  ;;  %493 = vmatpush.bf16.msra.mxu1 %v425_v5 }
  0x17   :  { %494 = vmatpush.bf16.msra.mxu2 %v425_v5  ;;  %495 = vmatpush.bf16.msra.mxu3 %v425_v5 }
  0x1a   :  { %186 = vmatpush.bf16.msra.mxu0 %v424_v6  ;;  %496 = vmatpush.bf16.msra.mxu1 %v424_v6 }
  0x1b   :  { %497 = vmatpush.bf16.msra.mxu2 %v424_v6  ;;  %498 = vmatpush.bf16.msra.mxu3 %v424_v6 }
  0x1e   :  { %187 = vmatpush.bf16.msra.mxu0 %v423_v7  ;;  %499 = vmatpush.bf16.msra.mxu1 %v423_v7 }
  0x1f   :  { %500 = vmatpush.bf16.msra.mxu2 %v423_v7  ;;  %501 = vmatpush.bf16.msra.mxu3 %v423_v7 }
  0x21   :  { %188 = vmatmul.bf16.vlgmr.msra.gmra.mxu0 %v415_v8  ;;  %198 = vmatmul.bf16.vlgmr.msra.gmra.mxu1 %v417_v9 }
  0x22   :  { %208 = vmatmul.bf16.vlgmr.msra.gmra.mxu2 %v419_v10  ;;  %218 = vmatmul.bf16.vlgmr.msra.gmra.mxu3 %v421_v11 }
  0x31   :  { %193 = vmatmul.bf16.gmra.mxu0 %v416_v12  ;;  %203 = vmatmul.bf16.gmra.mxu1 %v418_v13 }
  0x32   :  { %213 = vmatmul.bf16.gmra.mxu2 %v420_v14  ;;  %223 = vmatmul.bf16.gmra.mxu3 %v422_v15 }
  0x9e   :  { %v189_v16 = vpop.f32.mrf.mxu0  ;;  %v199_v17 = vpop.f32.mrf.mxu1 }
  0x9f   :  { %v283_v19 = vadd.f32 %v502_v18, %v189_v16  ;;  %v287_v20 = vadd.f32 %v502_v18, %v199_v17 }
  0xa1   :  { %v299_v27 = vmax.f32 %v283_v19, 0.0  ;;  %v303_v28 = vmax.f32 %v287_v20, 0.0 }
  0xa5   :  { %v209_v21 = vpop.f32.mrf.mxu2  ;;  %v219_v22 = vpop.f32.mrf.mxu3 }
  0xa6   :  { %v191_v23 = vpop.f32.mrf.mxu0  ;;  %v201_v24 = vpop.f32.mrf.mxu1  ;;  %v291_v33 = vadd.f32 %v502_v18, %v209_v21  ;;  %v295_v34 = vadd.f32 %v502_v18, %v219_v22 }
  0xa7   :  { %v284_v25 = vadd.f32 %v502_v18, %v191_v23  ;;  %v288_v26 = vadd.f32 %v502_v18, %v201_v24 }
  0xa8   :  { %v307_v41 = vmax.f32 %v291_v33, 0.0  ;;  %v311_v42 = vmax.f32 %v295_v34, 0.0 }
  0xa9   :  { %v300_v29 = vmax.f32 %v284_v25, 0.0  ;;  %v304_v30 = vmax.f32 %v288_v26, 0.0 }
  0xab   :  { %v434_v31 = vpack.c.bf16 %v300_v29, %v299_v27  ;;  %v444_v32 = vpack.c.bf16 %v304_v30, %v303_v28 }
  0xad   :  { %435 = vst [vmem:[%s601_s3] sm:$0xff] %v434_v31   ;;  %v211_v35 = vpop.f32.mrf.mxu2  ;;  %v221_v36 = vpop.f32.mrf.mxu3 }
  0xae   :  { %472 = vst [vmem:[%s601_s3 + $0x10] sm:$0xff] %v444_v32   ;;  %v292_v37 = vadd.f32 %v502_v18, %v211_v35  ;;  %v296_v38 = vadd.f32 %v502_v18, %v221_v36  ;;  %v194_v39 = vpop.f32.mrf.mxu0  ;;  %v204_v40 = vpop.f32.mrf.mxu1 }
  0xaf   :  { %v285_v47 = vadd.f32 %v502_v18, %v194_v39  ;;  %v289_v48 = vadd.f32 %v502_v18, %v204_v40 }
  0xb0   :  { %v308_v43 = vmax.f32 %v292_v37, 0.0  ;;  %v312_v44 = vmax.f32 %v296_v38, 0.0 }
  0xb1   :  { %v301_v55 = vmax.f32 %v285_v47, 0.0  ;;  %v305_v56 = vmax.f32 %v289_v48, 0.0 }
  0xb2   :  { %v454_v45 = vpack.c.bf16 %v308_v43, %v307_v41  ;;  %v464_v46 = vpack.c.bf16 %v312_v44, %v311_v42 }
  0xb4   :  { %474 = vst [vmem:[%s601_s3 + $0x20] sm:$0xff] %v454_v45  }
  0xb5   :  { %476 = vst [vmem:[%s601_s3 + $0x30] sm:$0xff] %v464_v46   ;;  %v214_v49 = vpop.f32.mrf.mxu2  ;;  %v224_v50 = vpop.f32.mrf.mxu3 }
  0xb6   :  { %v196_v51 = vpop.f32.mrf.mxu0  ;;  %v206_v52 = vpop.f32.mrf.mxu1  ;;  %v293_v61 = vadd.f32 %v502_v18, %v214_v49  ;;  %v297_v62 = vadd.f32 %v502_v18, %v224_v50 }
  0xb7   :  { %v286_v53 = vadd.f32 %v502_v18, %v196_v51  ;;  %v290_v54 = vadd.f32 %v502_v18, %v206_v52 }
  0xb8   :  { %v309_v3 = vmax.f32 %v293_v61, 0.0  ;;  %v313_v4 = vmax.f32 %v297_v62, 0.0 }
  0xb9   :  { %v302_v57 = vmax.f32 %v286_v53, 0.0  ;;  %v306_v58 = vmax.f32 %v290_v54, 0.0 }
  0xbb   :  { %v439_v59 = vpack.c.bf16 %v302_v57, %v301_v55  ;;  %v449_v60 = vpack.c.bf16 %v306_v58, %v305_v56 }
  0xbd   :  { %471 = vst [vmem:[%s601_s3 + $0x8] sm:$0xff] %v439_v59   ;;  %v216_v63 = vpop.f32.mrf.mxu2  ;;  %v226_v0 = vpop.f32.mrf.mxu3 }
  0xbe   :  { %473 = vst [vmem:[%s601_s3 + $0x18] sm:$0xff] %v449_v60   ;;  %v294_v1 = vadd.f32 %v502_v18, %v216_v63  ;;  %v298_v2 = vadd.f32 %v502_v18, %v226_v0 }
  0xc0   :  { %v310_v5 = vmax.f32 %v294_v1, 0.0  ;;  %v314_v6 = vmax.f32 %v298_v2, 0.0 }
  0xc2   :  { %v459_v7 = vpack.c.bf16 %v310_v5, %v309_v3  ;;  %v469_v8 = vpack.c.bf16 %v314_v6, %v313_v4 }
  0xc4   :  { %475 = vst [vmem:[%s601_s3 + $0x28] sm:$0xff] %v459_v7  }
  0xc5   :  { %477 = vst [vmem:[%s601_s3 + $0x38] sm:$0xff] %v469_v8  }

// kernel: resnet_forward.29
= control target key start
LH: loop header
LB: loop body
LE: loop exit
PB: predicated region body
PF: predicated region fallthrough
CT: control target
= control target key end

     0   :  { %s991_s12 = smov 0   ;;  %s993_s13 = smov 0   ;;  %s1079_s0 = inlined_call_operand.vmem [shape: bf16[9,128,128], index: 0, kind: input, shape index: {}]   ;;  %s1080_s1 = inlined_call_operand.vmem [shape: bf16[9,128,128], index: 1, kind: input, shape index: {}]   ;;  %s1081_s2 = inlined_call_operand.vmem [shape: f32[1,128], index: 2, kind: input, shape index: {}]   ;;  %s1082_s3 = inlined_call_operand.vmem [shape: bf16[128,128], index: 3, kind: output, shape index: {}]  }
   0x1   :  { %s995_s14 = smov 0  }
   0x2 LB: > { %s31_s15 = sadd.s32 1, %s964_s13  ;;  %p754_p0 = scmp.ge.s32.totalorder %s968_s14, 1  ;;  %s968_s14 = sphi %s995_s14, %s13_s14   ;;  %s964_s13 = sphi %s993_s13, %s1084_s13   ;;  %s960_s12 = sphi %s991_s12, %s1083_s12  }
   0x3   : > { %p33_p1 = scmp.ge.s32.totalorder %s31_s15, 9  ;;  %p207_p2 = scmp.lt.s32.totalorder %s968_s14, 10 }
   0x5   : > { %s1086_s15 = smov (%p33_p1, %s31_s15), 0  ;;  %p208_p3 = pnand %p754_p0, %p207_p2 }
   0x6   : > { %p257_p4 = scmp.lt.s32.totalorder (!%p208_p3), %s960_s12, 8  ;;  %p294_p5 = scmp.eq.s32.totalorder (!%p208_p3), %s960_s12, 0 }
   0x7   : > { %211 = sbr.rel (%p208_p3) target bundleno = 236 (0xec), region = 32 }
   0xc   : > { %s258_s16 = scalar_select %p257_p4, %s960_s12, 8  ;;  %v970_v0 = vmov (%p294_p5), 0.0  }
   0xd   : > { %299 = sbr.rel (!%p294_p5) target bundleno = 29 (0x1d), region = 36  ;;  %300 = vst [vmem:[#allocation2 + $0x30] sm:$0xff] (%p294_p5), %v970_v0 }
   0xe   : > { %s829_s17 = sshll.u32 %s258_s16, 6  ;;  %301 = vst [vmem:[#allocation2] sm:$0xff] (%p294_p5), %v970_v0 }
   0xf   : > { %s1017_s20 = scalar_lea.vmem %s1079_s0, %s829_s17  ;;  %s1022_s23 = scalar_lea.vmem %s1080_s1, %s829_s17  ;;  %302 = vst [vmem:[#allocation2 + $0x58] sm:$0xff] (%p294_p5), %v970_v0 }
  0x10   : > { %303 = vst [vmem:[#allocation2 + $0x18] sm:$0xff] (%p294_p5), %v970_v0 }
  0x11   : > { %304 = vst [vmem:[#allocation2 + $0x50] sm:$0xff] (%p294_p5), %v970_v0 }
  0x12   : > { %305 = vst [vmem:[#allocation2 + $0x68] sm:$0xff] %v970_v0 }
  0x13   : > { %306 = vst [vmem:[#allocation2 + $0x8] sm:$0xff] %v970_v0 }
  0x14   : > { %307 = vst [vmem:[#allocation2 + $0x48] sm:$0xff] %v970_v0 }
  0x15   : > { %308 = vst [vmem:[#allocation2 + $0x40] sm:$0xff] %v970_v0 }
  0x16   : > { %309 = vst [vmem:[#allocation2 + $0x20] sm:$0xff] %v970_v0 }
  0x17   : > { %310 = vst [vmem:[#allocation2 + $0x10] sm:$0xff] %v970_v0 }
  0x18   : > { %311 = vst [vmem:[#allocation2 + $0x38] sm:$0xff] %v970_v0 }
  0x19   : > { %312 = vst [vmem:[#allocation2 + $0x60] sm:$0xff] %v970_v0 }
  0x1a   : > { %313 = vst [vmem:[#allocation2 + $0x70] sm:$0xff] %v970_v0 }
  0x1b   : > { %314 = vst [vmem:[#allocation2 + $0x78] sm:$0xff] %v970_v0 }
  0x1c   : > { %315 = vst [vmem:[#allocation2 + $0x28] sm:$0xff] %v970_v0 }
  0x1d PF: > { %v847_v1 = vld [vmem:[%s1022_s23 + $0x38] sm:$0xff]  ;;  %v846_v2 = vld [vmem:[%s1022_s23 + $0x30] sm:$0xff]  ;;  %v845_v3 = vld [vmem:[%s1022_s23 + $0x28] sm:$0xff]  ;;  %p541_p6 = scmp.eq.s32.totalorder %s960_s12, 8 }
  0x1e   : > { %460 = vmatpush.bf16.msra.mxu0 %v847_v1  ;;  %896 = vmatpush.bf16.msra.mxu1 %v847_v1  ;;  %v844_v4 = vld [vmem:[%s1022_s23 + $0x20] sm:$0xff]  ;;  %v843_v5 = vld [vmem:[%s1022_s23 + $0x18] sm:$0xff]  ;;  %v842_v6 = vld [vmem:[%s1022_s23 + $0x10] sm:$0xff] }
  0x1f   : > { %897 = vmatpush.bf16.msra.mxu2 %v847_v1  ;;  %898 = vmatpush.bf16.msra.mxu3 %v847_v1  ;;  %v841_v7 = vld [vmem:[%s1022_s23 + $0x8] sm:$0xff]  ;;  %v840_v8 = vld [vmem:[%s1022_s23] sm:$0xff]  ;;  %v834_v10 = vld [vmem:[%s1017_s20 + $0x10] sm:$0xff] }
  0x20   : > { %v832_v9 = vld [vmem:[%s1017_s20] sm:$0xff]  ;;  %v838_v12 = vld [vmem:[%s1017_s20 + $0x30] sm:$0xff]  ;;  %v833_v13 = vld [vmem:[%s1017_s20 + $0x8] sm:$0xff] }
  0x21   : > { %v836_v11 = vld [vmem:[%s1017_s20 + $0x20] sm:$0xff]  ;;  %v835_v14 = vld [vmem:[%s1017_s20 + $0x18] sm:$0xff]  ;;  %v837_v15 = vld [vmem:[%s1017_s20 + $0x28] sm:$0xff] }
  0x22   : > { %461 = vmatpush.bf16.msra.mxu0 %v846_v2  ;;  %899 = vmatpush.bf16.msra.mxu1 %v846_v2  ;;  %v839_v16 = vld [vmem:[%s1017_s20 + $0x38] sm:$0xff]  ;;  %v316_v17 = vld [vmem:[#allocation2 + $0x30] sm:$0xff]  ;;  %v324_v23 = vld [vmem:[#allocation2 + $0x40] sm:$0xff] }
  0x23   : > { %900 = vmatpush.bf16.msra.mxu2 %v846_v2  ;;  %901 = vmatpush.bf16.msra.mxu3 %v846_v2  ;;  %v320_v18 = vld [vmem:[#allocation2 + $0x50] sm:$0xff]  ;;  %v328_v24 = vld [vmem:[#allocation2 + $0x60] sm:$0xff]  ;;  %v321_v26 = vld [vmem:[#allocation2 + $0x68] sm:$0xff] }
  0x24   : > { %v317_v25 = vld [vmem:[#allocation2] sm:$0xff]  ;;  %v329_v36 = vld [vmem:[#allocation2 + $0x70] sm:$0xff]  ;;  %v318_v37 = vld [vmem:[#allocation2 + $0x58] sm:$0xff] }
  0x25   : > { %v325_v35 = vld [vmem:[#allocation2 + $0x20] sm:$0xff]  ;;  %v322_v38 = vld [vmem:[#allocation2 + $0x8] sm:$0xff]  ;;  %v326_v47 = vld [vmem:[#allocation2 + $0x10] sm:$0xff] }
  0x26   : > { %462 = vmatpush.bf16.msra.mxu0 %v845_v3  ;;  %902 = vmatpush.bf16.msra.mxu1 %v845_v3  ;;  %v330_v48 = vld [vmem:[#allocation2 + $0x78] sm:$0xff]  ;;  %v323_v50 = vld [vmem:[#allocation2 + $0x48] sm:$0xff] }
  0x27   : > { %903 = vmatpush.bf16.msra.mxu2 %v845_v3  ;;  %904 = vmatpush.bf16.msra.mxu3 %v845_v3  ;;  %v319_v49 = vld [vmem:[#allocation2 + $0x18] sm:$0xff]  ;;  %v331_v60 = vld [vmem:[#allocation2 + $0x28] sm:$0xff]  ;;  %v945_v3 = vld [vmem:[%s1081_s2] ss:$0 sm:$0xff] (%p541_p6) }
  0x28   : > { %v327_v59 = vld [vmem:[#allocation2 + $0x38] sm:$0xff] }
  0x2a   : > { %463 = vmatpush.bf16.msra.mxu0 %v844_v4  ;;  %905 = vmatpush.bf16.msra.mxu1 %v844_v4 }
  0x2b   : > { %906 = vmatpush.bf16.msra.mxu2 %v844_v4  ;;  %907 = vmatpush.bf16.msra.mxu3 %v844_v4 }
  0x2e   : > { %464 = vmatpush.bf16.msra.mxu0 %v843_v5  ;;  %908 = vmatpush.bf16.msra.mxu1 %v843_v5 }
  0x2f   : > { %909 = vmatpush.bf16.msra.mxu2 %v843_v5  ;;  %910 = vmatpush.bf16.msra.mxu3 %v843_v5 }
  0x32   : > { %465 = vmatpush.bf16.msra.mxu0 %v842_v6  ;;  %911 = vmatpush.bf16.msra.mxu1 %v842_v6 }
  0x33   : > { %912 = vmatpush.bf16.msra.mxu2 %v842_v6  ;;  %913 = vmatpush.bf16.msra.mxu3 %v842_v6 }
  0x36   : > { %466 = vmatpush.bf16.msra.mxu0 %v841_v7  ;;  %914 = vmatpush.bf16.msra.mxu1 %v841_v7 }
  0x37   : > { %915 = vmatpush.bf16.msra.mxu2 %v841_v7  ;;  %916 = vmatpush.bf16.msra.mxu3 %v841_v7 }
  0x3a   : > { %467 = vmatpush.bf16.msra.mxu0 %v840_v8  ;;  %917 = vmatpush.bf16.msra.mxu1 %v840_v8 }
  0x3b   : > { %918 = vmatpush.bf16.msra.mxu2 %v840_v8  ;;  %919 = vmatpush.bf16.msra.mxu3 %v840_v8 }
  0x3d   : > { %468 = vmatmul.bf16.vlgmr.msra.gmra.mxu0 %v832_v9  ;;  %478 = vmatmul.bf16.vlgmr.msra.gmra.mxu1 %v834_v10 }
  0x3e   : > { %488 = vmatmul.bf16.vlgmr.msra.gmra.mxu2 %v836_v11  ;;  %498 = vmatmul.bf16.vlgmr.msra.gmra.mxu3 %v838_v12 }
  0x4d   : > { %473 = vmatmul.bf16.gmra.mxu0 %v833_v13  ;;  %483 = vmatmul.bf16.gmra.mxu1 %v835_v14 }
  0x4e   : > { %493 = vmatmul.bf16.gmra.mxu2 %v837_v15  ;;  %503 = vmatmul.bf16.gmra.mxu3 %v839_v16 }
  0xba   : > { %v469_v19 = vpop.f32.mrf.mxu0  ;;  %v479_v20 = vpop.f32.mrf.mxu1 }
  0xbb   : > { %v509_v21 = vadd.f32 %v469_v19, %v316_v17  ;;  %v513_v22 = vadd.f32 %v479_v20, %v320_v18 }
  0xbd   : > { %525 = vst [vmem:[#allocation2 + $0x30] sm:$0xff] %v509_v21 }
  0xbe   : > { %529 = vst [vmem:[#allocation2 + $0x50] sm:$0xff] %v513_v22 }
  0xc1   : > { %v489_v27 = vpop.f32.mrf.mxu2  ;;  %v499_v28 = vpop.f32.mrf.mxu3 }
  0xc2   : > { %v517_v29 = vadd.f32 %v489_v27, %v324_v23  ;;  %v521_v30 = vadd.f32 %v499_v28, %v328_v24  ;;  %v471_v31 = vpop.f32.mrf.mxu0  ;;  %v481_v32 = vpop.f32.mrf.mxu1 }
  0xc3   : > { %v510_v33 = vadd.f32 %v471_v31, %v317_v25  ;;  %v514_v34 = vadd.f32 %v481_v32, %v321_v26 }
  0xc4   : > { %533 = vst [vmem:[#allocation2 + $0x40] sm:$0xff] %v517_v29  ;;  %v546_v1 = vld [vmem:[#allocation2 + $0x30] sm:$0xff] (%p541_p6) }
  0xc5   : > { %537 = vst [vmem:[#allocation2 + $0x60] sm:$0xff] %v521_v30  ;;  %v550_v6 = vld [vmem:[#allocation2 + $0x50] sm:$0xff] (%p541_p6)  ;;  %v566_v9 = vadd.f32 (%p541_p6), %v945_v3, %v546_v1 }
  0xc6   : > { %526 = vst [vmem:[#allocation2] sm:$0xff] %v510_v33  ;;  %v570_v14 = vadd.f32 (%p541_p6), %v945_v3, %v550_v6 }
  0xc7   : > { %530 = vst [vmem:[#allocation2 + $0x68] sm:$0xff] %v514_v34  ;;  %v582_v20 = vmax.f32 (%p541_p6), %v566_v9, 0.0 }
  0xc8   : > { %v586_v26 = vmax.f32 (%p541_p6), %v570_v14, 0.0 }
  0xc9   : > { %v491_v39 = vpop.f32.mrf.mxu2  ;;  %v501_v40 = vpop.f32.mrf.mxu3 }
  0xca   : > { %v518_v41 = vadd.f32 %v491_v39, %v325_v35  ;;  %v522_v42 = vadd.f32 %v501_v40, %v329_v36  ;;  %v474_v43 = vpop.f32.mrf.mxu0  ;;  %v484_v44 = vpop.f32.mrf.mxu1 }
  0xcb   : > { %v511_v45 = vadd.f32 %v474_v43, %v318_v37  ;;  %v515_v46 = vadd.f32 %v484_v44, %v322_v38  ;;  %v554_v18 = vld [vmem:[#allocation2 + $0x40] sm:$0xff] (%p541_p6) }
  0xcc   : > { %534 = vst [vmem:[#allocation2 + $0x20] sm:$0xff] %v518_v41  ;;  %v558_v30 = vld [vmem:[#allocation2 + $0x60] sm:$0xff] (%p541_p6)  ;;  %v574_v34 = vadd.f32 (%p541_p6), %v945_v3, %v554_v18 }
  0xcd   : > { %538 = vst [vmem:[#allocation2 + $0x70] sm:$0xff] %v522_v42  ;;  %v547_v2 = vld [vmem:[#allocation2] sm:$0xff] (%p541_p6)  ;;  %v578_v44 = vadd.f32 (%p541_p6), %v945_v3, %v558_v30 }
  0xce   : > { %527 = vst [vmem:[#allocation2 + $0x58] sm:$0xff] %v511_v45  ;;  %v551_v7 = vld [vmem:[#allocation2 + $0x68] sm:$0xff] (%p541_p6)  ;;  %v567_v10 = vadd.f32 (%p541_p6), %v945_v3, %v547_v2  ;;  %v590_v42 = vmax.f32 (%p541_p6), %v574_v34, 0.0 }
  0xcf   : > { %531 = vst [vmem:[#allocation2 + $0x8] sm:$0xff] %v515_v46  ;;  %v571_v15 = vadd.f32 (%p541_p6), %v945_v3, %v551_v7 }
  0xd0   : > { %v583_v21 = vmax.f32 (%p541_p6), %v567_v10, 0.0 }
  0xd1   : > { %v494_v51 = vpop.f32.mrf.mxu2  ;;  %v504_v52 = vpop.f32.mrf.mxu3  ;;  %v587_v27 = vmax.f32 (%p541_p6), %v571_v15, 0.0 }
  0xd2   : > { %v519_v53 = vadd.f32 %v494_v51, %v326_v47  ;;  %v523_v54 = vadd.f32 %v504_v52, %v330_v48  ;;  %v476_v55 = vpop.f32.mrf.mxu0  ;;  %v486_v56 = vpop.f32.mrf.mxu1  ;;  %v852_v32 = vpack.c.bf16 (%p541_p6), %v583_v21, %v582_v20  ;;  %v594_v51 = vmax.f32 (%p541_p6), %v578_v44, 0.0 }
  0xd3   : > { %v512_v57 = vadd.f32 %v476_v55, %v319_v49  ;;  %v516_v58 = vadd.f32 %v486_v56, %v323_v50  ;;  %v555_v19 = vld [vmem:[#allocation2 + $0x20] sm:$0xff] (%p541_p6)  ;;  %v862_v38 = vpack.c.bf16 (%p541_p6), %v587_v27, %v586_v26 }
  0xd4   : > { %535 = vst [vmem:[#allocation2 + $0x10] sm:$0xff] %v519_v53  ;;  %v559_v31 = vld [vmem:[#allocation2 + $0x70] sm:$0xff] (%p541_p6)  ;;  %v575_v35 = vadd.f32 (%p541_p6), %v945_v3, %v555_v19 }
  0xd5   : > { %539 = vst [vmem:[#allocation2 + $0x78] sm:$0xff] %v523_v54  ;;  %v548_v4 = vld [vmem:[#allocation2 + $0x58] sm:$0xff] (%p541_p6)  ;;  %v579_v45 = vadd.f32 (%p541_p6), %v945_v3, %v559_v31 }
  0xd6   : > { %528 = vst [vmem:[#allocation2 + $0x18] sm:$0xff] %v512_v57  ;;  %v552_v8 = vld [vmem:[#allocation2 + $0x8] sm:$0xff] (%p541_p6)  ;;  %v568_v11 = vadd.f32 (%p541_p6), %v945_v3, %v548_v4  ;;  %v591_v43 = vmax.f32 (%p541_p6), %v575_v35, 0.0 }
  0xd7   : > { %532 = vst [vmem:[#allocation2 + $0x48] sm:$0xff] %v516_v58  ;;  %v572_v16 = vadd.f32 (%p541_p6), %v945_v3, %v552_v8  ;;  %v595_v52 = vmax.f32 (%p541_p6), %v579_v45, 0.0 }
  0xd8   : > { %v584_v22 = vmax.f32 (%p541_p6), %v568_v11, 0.0  ;;  %853 = vst [vmem:[%s1082_s3] sm:$0xff] (%p541_p6), %v852_v32   ;;  %v872_v50 = vpack.c.bf16 (%p541_p6), %v591_v43, %v590_v42 }
  0xd9   : > { %v496_v61 = vpop.f32.mrf.mxu2  ;;  %v506_v62 = vpop.f32.mrf.mxu3  ;;  %545 = sbr.rel (!%p541_p6) target bundleno = 236 (0xec), region = 40  ;;  %v588_v28 = vmax.f32 (%p541_p6), %v572_v16, 0.0  ;;  %890 = vst [vmem:[%s1082_s3 + $0x10] sm:$0xff] (%p541_p6), %v862_v38   ;;  %v882_v56 = vpack.c.bf16 (%p541_p6), %v595_v52, %v594_v51 }
  0xda   : > { %v520_v63 = vadd.f32 %v496_v61, %v327_v59  ;;  %v524_v0 = vadd.f32 %v506_v62, %v331_v60  ;;  %892 = vst [vmem:[%s1082_s3 + $0x20] sm:$0xff] (%p541_p6), %v872_v50  }
  0xdb   : > { %v556_v24 = vld [vmem:[#allocation2 + $0x10] sm:$0xff] (%p541_p6)  ;;  %894 = vst [vmem:[%s1082_s3 + $0x30] sm:$0xff] (%p541_p6), %v882_v56  }
  0xdc   : > { %536 = vst [vmem:[#allocation2 + $0x38] sm:$0xff] %v520_v63  ;;  %v560_v36 = vld [vmem:[#allocation2 + $0x78] sm:$0xff] (%p541_p6)  ;;  %v576_v40 = vadd.f32 (%p541_p6), %v945_v3, %v556_v24 }
  0xdd   : > { %540 = vst [vmem:[#allocation2 + $0x28] sm:$0xff] %v524_v0  ;;  %v549_v5 = vld [vmem:[#allocation2 + $0x18] sm:$0xff] (%p541_p6)  ;;  %v580_v48 = vadd.f32 (%p541_p6), %v945_v3, %v560_v36 }
  0xde   : > { %v569_v12 = vadd.f32 %v945_v3, %v549_v5  ;;  %v553_v13 = vld [vmem:[#allocation2 + $0x48] sm:$0xff]  ;;  %v592_v46 = vmax.f32 %v576_v40, 0.0 }
  0xdf   : > { %v573_v17 = vadd.f32 %v945_v3, %v553_v13  ;;  %v596_v54 = vmax.f32 %v580_v48, 0.0 }
  0xe0   : > { %v585_v23 = vmax.f32 %v569_v12, 0.0 }
  0xe1   : > { %v589_v29 = vmax.f32 %v573_v17, 0.0 }
  0xe2   : > { %v857_v33 = vpack.c.bf16 %v585_v23, %v584_v22 }
  0xe3   : > { %v557_v25 = vld [vmem:[#allocation2 + $0x38] sm:$0xff]  ;;  %v867_v39 = vpack.c.bf16 %v589_v29, %v588_v28 }
  0xe4   : > { %v561_v37 = vld [vmem:[#allocation2 + $0x28] sm:$0xff]  ;;  %v577_v41 = vadd.f32 %v945_v3, %v557_v25  ;;  %889 = vst [vmem:[%s1082_s3 + $0x8] sm:$0xff] %v857_v33  }
  0xe5   : > { %v581_v49 = vadd.f32 %v945_v3, %v561_v37  ;;  %891 = vst [vmem:[%s1082_s3 + $0x18] sm:$0xff] %v867_v39  }
  0xe6   : > { %v593_v47 = vmax.f32 %v577_v41, 0.0 }
  0xe7   : > { %v597_v55 = vmax.f32 %v581_v49, 0.0 }
  0xe8   : > { %v877_v53 = vpack.c.bf16 %v593_v47, %v592_v46 }
  0xe9   : > { %v887_v57 = vpack.c.bf16 %v597_v55, %v596_v54 }
  0xea   : > { %893 = vst [vmem:[%s1082_s3 + $0x28] sm:$0xff] %v877_v53  }
  0xeb   : > { %895 = vst [vmem:[%s1082_s3 + $0x38] sm:$0xff] %v887_v57  }
  0xec PF: > { %s13_s14 = sadd.s32 1, %s968_s14   ;;  %s1083_s12 = smov %s964_s13 }
  0xed   : > { %p10_p7 = scmp.ge.s32.totalorder %s13_s14, 11   ;;  %s1084_s13 = smov %s1086_s15 }
  0xef   :  { %12 = sbr.rel (!%p10_p7) target bundleno = 2 (0x2), region = 76 }

// kernel: resnet_forward.31
= control target key start
LH: loop header
LB: loop body
LE: loop exit
PB: predicated region body
PF: predicated region fallthrough
CT: control target
= control target key end

     0   :  { %s294_s0 = inlined_call_operand.vmem [shape: bf16[9,32,128], index: 0, kind: input, shape index: {}]   ;;  %s295_s1 = inlined_call_operand.vmem [shape: bf16[32,128], index: 1, kind: output, shape index: {}]  }
   0x1   :  { %v125_v0 = vld [vmem:[%s294_s0] sm:$0xff]   ;;  %v207_v1 = vld [vmem:[%s294_s0 + $0x10] sm:$0xff]   ;;  %v206_v15 = vld [vmem:[%s294_s0 + $0x8] sm:$0xff]  }
   0x2   :  { %v209_v2 = vld [vmem:[%s294_s0 + $0x20] sm:$0xff]   ;;  %v126_v3 = vunpack.c.l.bf16 %v125_v0  ;;  %v127_v4 = vunpack.c.h.bf16 %v125_v0  ;;  %v134_v5 = vunpack.c.l.bf16 %v207_v1  ;;  %v135_v6 = vunpack.c.h.bf16 %v207_v1  ;;  %v211_v7 = vld [vmem:[%s294_s0 + $0x30] sm:$0xff]   ;;  %v208_v16 = vld [vmem:[%s294_s0 + $0x18] sm:$0xff]  }
   0x3   :  { %v142_v8 = vunpack.c.l.bf16 %v209_v2  ;;  %v143_v9 = vunpack.c.h.bf16 %v209_v2  ;;  %v213_v10 = vld [vmem:[%s294_s0 + $0x40] sm:$0xff]   ;;  %v150_v11 = vunpack.c.l.bf16 %v211_v7  ;;  %v151_v12 = vunpack.c.h.bf16 %v211_v7  ;;  %v215_v17 = vld [vmem:[%s294_s0 + $0x50] sm:$0xff]   ;;  %v210_v22 = vld [vmem:[%s294_s0 + $0x28] sm:$0xff]  }
   0x4   :  { %v80_v13 = vmax.f32 %v126_v3, %v134_v5  ;;  %v88_v14 = vmax.f32 %v127_v4, %v135_v6  ;;  %v158_v18 = vunpack.c.l.bf16 %v213_v10  ;;  %v159_v19 = vunpack.c.h.bf16 %v213_v10  ;;  %v217_v23 = vld [vmem:[%s294_s0 + $0x60] sm:$0xff]   ;;  %v212_v32 = vld [vmem:[%s294_s0 + $0x38] sm:$0xff]   ;;  %v219_v33 = vld [vmem:[%s294_s0 + $0x70] sm:$0xff]  }
   0x5   :  { %v130_v24 = vunpack.c.l.bf16 %v206_v15  ;;  %v131_v25 = vunpack.c.h.bf16 %v206_v15  ;;  %v138_v26 = vunpack.c.l.bf16 %v208_v16  ;;  %v139_v27 = vunpack.c.h.bf16 %v208_v16  ;;  %v214_v40 = vld [vmem:[%s294_s0 + $0x48] sm:$0xff]   ;;  %v221_v41 = vld [vmem:[%s294_s0 + $0x80] sm:$0xff]   ;;  %v216_v50 = vld [vmem:[%s294_s0 + $0x58] sm:$0xff]  }
   0x6   :  { %v81_v20 = vmax.f32 %v80_v13, %v142_v8  ;;  %v89_v21 = vmax.f32 %v88_v14, %v143_v9  ;;  %v166_v28 = vunpack.c.l.bf16 %v215_v17  ;;  %v167_v29 = vunpack.c.h.bf16 %v215_v17  ;;  %v218_v59 = vld [vmem:[%s294_s0 + $0x68] sm:$0xff]   ;;  %v220_v2 = vld [vmem:[%s294_s0 + $0x78] sm:$0xff]  }
   0x7   :  { %v146_v34 = vunpack.c.l.bf16 %v210_v22  ;;  %v147_v35 = vunpack.c.h.bf16 %v210_v22  ;;  %v174_v36 = vunpack.c.l.bf16 %v217_v23  ;;  %v175_v37 = vunpack.c.h.bf16 %v217_v23  ;;  %v222_v9 = vld [vmem:[%s294_s0 + $0x88] sm:$0xff]  }
   0x8   :  { %v82_v30 = vmax.f32 %v81_v20, %v150_v11  ;;  %v90_v31 = vmax.f32 %v89_v21, %v151_v12  ;;  %v154_v42 = vunpack.c.l.bf16 %v212_v32  ;;  %v155_v43 = vunpack.c.h.bf16 %v212_v32 }
   0x9   :  { %v96_v44 = vmax.f32 %v130_v24, %v138_v26  ;;  %v104_v45 = vmax.f32 %v131_v25, %v139_v27  ;;  %v182_v46 = vunpack.c.l.bf16 %v219_v33  ;;  %v183_v47 = vunpack.c.h.bf16 %v219_v33 }
   0xa   :  { %v83_v38 = vmax.f32 %v82_v30, %v158_v18  ;;  %v91_v39 = vmax.f32 %v90_v31, %v159_v19  ;;  %v162_v51 = vunpack.c.l.bf16 %v214_v40  ;;  %v163_v52 = vunpack.c.h.bf16 %v214_v40 }
   0xb   :  { %v97_v53 = vmax.f32 %v96_v44, %v146_v34  ;;  %v105_v54 = vmax.f32 %v104_v45, %v147_v35  ;;  %v190_v55 = vunpack.c.l.bf16 %v221_v41  ;;  %v191_v56 = vunpack.c.h.bf16 %v221_v41 }
   0xc   :  { %v84_v48 = vmax.f32 %v83_v38, %v166_v28  ;;  %v92_v49 = vmax.f32 %v91_v39, %v167_v29  ;;  %v170_v60 = vunpack.c.l.bf16 %v216_v50  ;;  %v171_v61 = vunpack.c.h.bf16 %v216_v50 }
   0xd   :  { %v98_v62 = vmax.f32 %v97_v53, %v154_v42  ;;  %v106_v63 = vmax.f32 %v105_v54, %v155_v43  ;;  %v178_v3 = vunpack.c.l.bf16 %v218_v59  ;;  %v179_v4 = vunpack.c.h.bf16 %v218_v59 }
   0xe   :  { %v85_v57 = vmax.f32 %v84_v48, %v174_v36  ;;  %v93_v58 = vmax.f32 %v92_v49, %v175_v37  ;;  %v186_v10 = vunpack.c.l.bf16 %v220_v2  ;;  %v187_v11 = vunpack.c.h.bf16 %v220_v2 }
   0xf   :  { %v99_v5 = vmax.f32 %v98_v62, %v162_v51  ;;  %v107_v6 = vmax.f32 %v106_v63, %v163_v52  ;;  %v194_v15 = vunpack.c.l.bf16 %v222_v9  ;;  %v195_v16 = vunpack.c.h.bf16 %v222_v9 }
  0x10   :  { %v86_v0 = vmax.f32 %v85_v57, %v182_v46  ;;  %v94_v1 = vmax.f32 %v93_v58, %v183_v47 }
  0x11   :  { %v100_v12 = vmax.f32 %v99_v5, %v170_v60  ;;  %v108_v13 = vmax.f32 %v107_v6, %v171_v61 }
  0x12   :  { %v87_v7 = vmax.f32 %v86_v0, %v190_v55  ;;  %v95_v8 = vmax.f32 %v94_v1, %v191_v56 }
  0x13   :  { %v101_v17 = vmax.f32 %v100_v12, %v178_v3  ;;  %v109_v18 = vmax.f32 %v108_v13, %v179_v4 }
  0x14   :  { %v199_v14 = vpack.c.bf16 %v95_v8, %v87_v7 }
  0x15   :  { %v102_v19 = vmax.f32 %v101_v17, %v186_v10  ;;  %v110_v20 = vmax.f32 %v109_v18, %v187_v11 }
  0x16   :  { %200 = vst [vmem:[%s295_s1] sm:$0xff] %v199_v14  }
  0x17   :  { %v103_v21 = vmax.f32 %v102_v19, %v194_v15  ;;  %v111_v22 = vmax.f32 %v110_v20, %v195_v16 }
  0x19   :  { %v204_v23 = vpack.c.bf16 %v111_v22, %v103_v21 }
  0x1b   :  { %223 = vst [vmem:[%s295_s1 + $0x8] sm:$0xff] %v204_v23  }

// kernel: resnet_forward.33
= control target key start
LH: loop header
LB: loop body
LE: loop exit
PB: predicated region body
PF: predicated region fallthrough
CT: control target
= control target key end

     0   :  { %s294_s1 = inlined_call_operand.vmem [shape: bf16[1,128,128], index: 1, kind: input, shape index: {}]   ;;  %s295_s2 = inlined_call_operand.vmem [shape: f32[1,128], index: 2, kind: input, shape index: {}]   ;;  %s296_s0 = inlined_call_operand.vmem [shape: bf16[1,32,128], index: 0, kind: input, shape index: {}]   ;;  %s297_s3 = inlined_call_operand.vmem [shape: bf16[32,128], index: 3, kind: output, shape index: {}]  }
   0x1   :  { %v214_v0 = vld [vmem:[%s294_s1 + $0x38] sm:$0xff]  ;;  %v213_v1 = vld [vmem:[%s294_s1 + $0x30] sm:$0xff]  ;;  %v212_v2 = vld [vmem:[%s294_s1 + $0x28] sm:$0xff] }
   0x2   :  { %108 = vmatpush.bf16.msra.mxu0 %v214_v0  ;;  %226 = vmatpush.bf16.msra.mxu1 %v214_v0  ;;  %v211_v3 = vld [vmem:[%s294_s1 + $0x20] sm:$0xff]  ;;  %v210_v4 = vld [vmem:[%s294_s1 + $0x18] sm:$0xff]  ;;  %v209_v5 = vld [vmem:[%s294_s1 + $0x10] sm:$0xff] }
   0x3   :  { %v208_v6 = vld [vmem:[%s294_s1 + $0x8] sm:$0xff]  ;;  %v207_v7 = vld [vmem:[%s294_s1] sm:$0xff] }
   0x4   :  { %v205_v8 = vld [vmem:[%s296_s0] sm:$0xff]  ;;  %v206_v9 = vld [vmem:[%s296_s0 + $0x8] sm:$0xff] }
   0x5   :  { %v234_v12 = vld [vmem:[%s295_s2] ss:$0 sm:$0xff] }
   0x6   :  { %109 = vmatpush.bf16.msra.mxu0 %v213_v1  ;;  %227 = vmatpush.bf16.msra.mxu1 %v213_v1 }
   0xa   :  { %110 = vmatpush.bf16.msra.mxu0 %v212_v2  ;;  %228 = vmatpush.bf16.msra.mxu1 %v212_v2 }
   0xe   :  { %111 = vmatpush.bf16.msra.mxu0 %v211_v3  ;;  %229 = vmatpush.bf16.msra.mxu1 %v211_v3 }
  0x12   :  { %112 = vmatpush.bf16.msra.mxu0 %v210_v4  ;;  %230 = vmatpush.bf16.msra.mxu1 %v210_v4 }
  0x16   :  { %113 = vmatpush.bf16.msra.mxu0 %v209_v5  ;;  %231 = vmatpush.bf16.msra.mxu1 %v209_v5 }
  0x1a   :  { %114 = vmatpush.bf16.msra.mxu0 %v208_v6  ;;  %232 = vmatpush.bf16.msra.mxu1 %v208_v6 }
  0x1e   :  { %115 = vmatpush.bf16.msra.mxu0 %v207_v7  ;;  %233 = vmatpush.bf16.msra.mxu1 %v207_v7 }
  0x21   :  { %116 = vmatmul.bf16.vlgmr.msra.gmra.mxu0 %v205_v8  ;;  %121 = vmatmul.bf16.vlgmr.msra.gmra.mxu1 %v206_v9 }
  0x9e   :  { %v117_v10 = vpop.f32.mrf.mxu0  ;;  %v122_v11 = vpop.f32.mrf.mxu1 }
  0x9f   :  { %v145_v13 = vadd.f32 %v234_v12, %v117_v10  ;;  %v147_v14 = vadd.f32 %v234_v12, %v122_v11 }
  0xa1   :  { %v149_v19 = vmax.f32 %v145_v13, 0.0  ;;  %v151_v20 = vmax.f32 %v147_v14, 0.0 }
  0xa6   :  { %v119_v15 = vpop.f32.mrf.mxu0  ;;  %v124_v16 = vpop.f32.mrf.mxu1 }
  0xa7   :  { %v146_v17 = vadd.f32 %v234_v12, %v119_v15  ;;  %v148_v18 = vadd.f32 %v234_v12, %v124_v16 }
  0xa9   :  { %v150_v21 = vmax.f32 %v146_v17, 0.0  ;;  %v152_v22 = vmax.f32 %v148_v18, 0.0 }
  0xab   :  { %v218_v23 = vpack.c.bf16 %v150_v21, %v149_v19  ;;  %v223_v24 = vpack.c.bf16 %v152_v22, %v151_v20 }
  0xad   :  { %219 = vst [vmem:[%s297_s3] sm:$0xff] %v218_v23  }
  0xae   :  { %225 = vst [vmem:[%s297_s3 + $0x8] sm:$0xff] %v223_v24  }

// kernel: resnet_forward.32
= control target key start
LH: loop header
LB: loop body
LE: loop exit
PB: predicated region body
PF: predicated region fallthrough
CT: control target
= control target key end

     0   :  { %s290_s1 = inlined_call_operand.vmem [shape: bf16[1,128,128], index: 1, kind: input, shape index: {}]   ;;  %s291_s2 = inlined_call_operand.vmem [shape: f32[1,128], index: 2, kind: input, shape index: {}]   ;;  %s292_s0 = inlined_call_operand.vmem [shape: bf16[1,32,128], index: 0, kind: input, shape index: {}]   ;;  %s293_s3 = inlined_call_operand.vmem [shape: bf16[32,128], index: 3, kind: output, shape index: {}]  }
   0x1   :  { %v210_v0 = vld [vmem:[%s290_s1 + $0x38] sm:$0xff]  ;;  %v209_v1 = vld [vmem:[%s290_s1 + $0x30] sm:$0xff]  ;;  %v208_v2 = vld [vmem:[%s290_s1 + $0x28] sm:$0xff] }
   0x2   :  { %108 = vmatpush.bf16.msra.mxu0 %v210_v0  ;;  %222 = vmatpush.bf16.msra.mxu1 %v210_v0  ;;  %v207_v3 = vld [vmem:[%s290_s1 + $0x20] sm:$0xff]  ;;  %v206_v4 = vld [vmem:[%s290_s1 + $0x18] sm:$0xff]  ;;  %v205_v5 = vld [vmem:[%s290_s1 + $0x10] sm:$0xff] }
   0x3   :  { %v204_v6 = vld [vmem:[%s290_s1 + $0x8] sm:$0xff]  ;;  %v203_v7 = vld [vmem:[%s290_s1] sm:$0xff] }
   0x4   :  { %v201_v8 = vld [vmem:[%s292_s0] sm:$0xff]  ;;  %v202_v9 = vld [vmem:[%s292_s0 + $0x8] sm:$0xff] }
   0x5   :  { %v230_v12 = vld [vmem:[%s291_s2] ss:$0 sm:$0xff] }
   0x6   :  { %109 = vmatpush.bf16.msra.mxu0 %v209_v1  ;;  %223 = vmatpush.bf16.msra.mxu1 %v209_v1 }
   0xa   :  { %110 = vmatpush.bf16.msra.mxu0 %v208_v2  ;;  %224 = vmatpush.bf16.msra.mxu1 %v208_v2 }
   0xe   :  { %111 = vmatpush.bf16.msra.mxu0 %v207_v3  ;;  %225 = vmatpush.bf16.msra.mxu1 %v207_v3 }
  0x12   :  { %112 = vmatpush.bf16.msra.mxu0 %v206_v4  ;;  %226 = vmatpush.bf16.msra.mxu1 %v206_v4 }
  0x16   :  { %113 = vmatpush.bf16.msra.mxu0 %v205_v5  ;;  %227 = vmatpush.bf16.msra.mxu1 %v205_v5 }
  0x1a   :  { %114 = vmatpush.bf16.msra.mxu0 %v204_v6  ;;  %228 = vmatpush.bf16.msra.mxu1 %v204_v6 }
  0x1e   :  { %115 = vmatpush.bf16.msra.mxu0 %v203_v7  ;;  %229 = vmatpush.bf16.msra.mxu1 %v203_v7 }
  0x21   :  { %116 = vmatmul.bf16.vlgmr.msra.gmra.mxu0 %v201_v8  ;;  %121 = vmatmul.bf16.vlgmr.msra.gmra.mxu1 %v202_v9 }
  0x9e   :  { %v117_v10 = vpop.f32.mrf.mxu0  ;;  %v122_v11 = vpop.f32.mrf.mxu1 }
  0x9f   :  { %v145_v15 = vadd.f32 %v230_v12, %v117_v10  ;;  %v147_v16 = vadd.f32 %v230_v12, %v122_v11 }
  0xa6   :  { %v119_v13 = vpop.f32.mrf.mxu0  ;;  %v124_v14 = vpop.f32.mrf.mxu1 }
  0xa7   :  { %v146_v17 = vadd.f32 %v230_v12, %v119_v13  ;;  %v148_v18 = vadd.f32 %v230_v12, %v124_v14 }
  0xa9   :  { %v214_v19 = vpack.c.bf16 %v146_v17, %v145_v15  ;;  %v219_v20 = vpack.c.bf16 %v148_v18, %v147_v16 }
  0xab   :  { %215 = vst [vmem:[%s293_s3] sm:$0xff] %v214_v19  }
  0xac   :  { %221 = vst [vmem:[%s293_s3 + $0x8] sm:$0xff] %v219_v20  }

// kernel: resnet_forward.34
= control target key start
LH: loop header
LB: loop body
LE: loop exit
PB: predicated region body
PF: predicated region fallthrough
CT: control target
= control target key end

     0   :  { %s723_s12 = smov 0   ;;  %s725_s13 = smov 0   ;;  %s777_s0 = inlined_call_operand.vmem [shape: bf16[9,32,128], index: 0, kind: input, shape index: {}]   ;;  %s778_s1 = inlined_call_operand.vmem [shape: bf16[9,128,128], index: 1, kind: input, shape index: {}]   ;;  %s779_s2 = inlined_call_operand.vmem [shape: f32[1,128], index: 2, kind: input, shape index: {}]   ;;  %s780_s3 = inlined_call_operand.vmem [shape: bf16[32,128], index: 3, kind: output, shape index: {}]  }
   0x1   :  { %s727_s14 = smov 0  }
   0x2 LB: > { %s31_s15 = sadd.s32 1, %s696_s13  ;;  %p568_p0 = scmp.ge.s32.totalorder %s700_s14, 1  ;;  %s700_s14 = sphi %s727_s14, %s13_s14   ;;  %s696_s13 = sphi %s725_s13, %s782_s13   ;;  %s692_s12 = sphi %s723_s12, %s781_s12  }
   0x3   : > { %p33_p1 = scmp.ge.s32.totalorder %s31_s15, 9  ;;  %p207_p2 = scmp.lt.s32.totalorder %s700_s14, 10 }
   0x5   : > { %s784_s15 = smov (%p33_p1, %s31_s15), 0  ;;  %p208_p3 = pnand %p568_p0, %p207_p2 }
   0x6   : > { %p257_p4 = scmp.lt.s32.totalorder (!%p208_p3), %s692_s12, 8  ;;  %p294_p5 = scmp.eq.s32.totalorder (!%p208_p3), %s692_s12, 0 }
   0x7   : > { %211 = sbr.rel (%p208_p3) target bundleno = 202 (0xca), region = 32 }
   0xc   : > { %s258_s16 = scalar_select %p257_p4, %s692_s12, 8  ;;  %v702_v0 = vmov (%p294_p5), 0.0  }
   0xd   : > { %299 = sbr.rel (!%p294_p5) target bundleno = 18 (0x12), region = 36  ;;  %300 = vst [vmem:[#allocation2 + $0x10] sm:$0xff] (%p294_p5), %v702_v0 }
   0xe   : > { %s619_s17 = sshll.u32 %s258_s16, 4  ;;  %s620_s18 = sshll.u32 %s258_s16, 6  ;;  %301 = vst [vmem:[#allocation2] sm:$0xff] (%p294_p5), %v702_v0 }
   0xf   : > { %s749_s21 = scalar_lea.vmem %s777_s0, %s619_s17  ;;  %s280_s24 = scalar_lea.vmem %s778_s1, %s620_s18  ;;  %302 = vst [vmem:[#allocation2 + $0x18] sm:$0xff] (%p294_p5), %v702_v0 }
  0x10   : > { %303 = vst [vmem:[#allocation2 + $0x8] sm:$0xff] (%p294_p5), %v702_v0 }
  0x12 PF: > { %v631_v1 = vld [vmem:[%s280_s24 + $0x38] sm:$0xff]  ;;  %v630_v2 = vld [vmem:[%s280_s24 + $0x30] sm:$0xff]  ;;  %v629_v3 = vld [vmem:[%s280_s24 + $0x28] sm:$0xff]  ;;  %p415_p6 = scmp.eq.s32.totalorder %s692_s12, 8 }
  0x13   : > { %388 = vmatpush.bf16.msra.mxu0 %v631_v1  ;;  %644 = vmatpush.bf16.msra.mxu1 %v631_v1  ;;  %v628_v4 = vld [vmem:[%s280_s24 + $0x20] sm:$0xff]  ;;  %v627_v5 = vld [vmem:[%s280_s24 + $0x18] sm:$0xff]  ;;  %v626_v6 = vld [vmem:[%s280_s24 + $0x10] sm:$0xff] }
  0x14   : > { %v625_v7 = vld [vmem:[%s280_s24 + $0x8] sm:$0xff]  ;;  %v624_v8 = vld [vmem:[%s280_s24] sm:$0xff]  ;;  %v304_v11 = vld [vmem:[#allocation2 + $0x10] sm:$0xff] }
  0x15   : > { %v622_v9 = vld [vmem:[%s749_s21] sm:$0xff]  ;;  %v623_v10 = vld [vmem:[%s749_s21 + $0x8] sm:$0xff] }
  0x16   : > { %v306_v12 = vld [vmem:[#allocation2 + $0x18] sm:$0xff]  ;;  %v305_v17 = vld [vmem:[#allocation2] sm:$0xff] }
  0x17   : > { %389 = vmatpush.bf16.msra.mxu0 %v630_v2  ;;  %645 = vmatpush.bf16.msra.mxu1 %v630_v2  ;;  %v307_v18 = vld [vmem:[#allocation2 + $0x8] sm:$0xff]  ;;  %v677_v25 = vld [vmem:[%s779_s2] ss:$0 sm:$0xff] (%p415_p6) }
  0x1b   : > { %390 = vmatpush.bf16.msra.mxu0 %v629_v3  ;;  %646 = vmatpush.bf16.msra.mxu1 %v629_v3 }
  0x1f   : > { %391 = vmatpush.bf16.msra.mxu0 %v628_v4  ;;  %647 = vmatpush.bf16.msra.mxu1 %v628_v4 }
  0x23   : > { %392 = vmatpush.bf16.msra.mxu0 %v627_v5  ;;  %648 = vmatpush.bf16.msra.mxu1 %v627_v5 }
  0x27   : > { %393 = vmatpush.bf16.msra.mxu0 %v626_v6  ;;  %649 = vmatpush.bf16.msra.mxu1 %v626_v6 }
  0x2b   : > { %394 = vmatpush.bf16.msra.mxu0 %v625_v7  ;;  %650 = vmatpush.bf16.msra.mxu1 %v625_v7 }
  0x2f   : > { %395 = vmatpush.bf16.msra.mxu0 %v624_v8  ;;  %651 = vmatpush.bf16.msra.mxu1 %v624_v8 }
  0x32   : > { %396 = vmatmul.bf16.vlgmr.msra.gmra.mxu0 %v622_v9  ;;  %401 = vmatmul.bf16.vlgmr.msra.gmra.mxu1 %v623_v10 }
  0xaf   : > { %v397_v13 = vpop.f32.mrf.mxu0  ;;  %v402_v14 = vpop.f32.mrf.mxu1 }
  0xb0   : > { %v407_v15 = vadd.f32 %v397_v13, %v304_v11  ;;  %v409_v16 = vadd.f32 %v402_v14, %v306_v12 }
  0xb2   : > { %411 = vst [vmem:[#allocation2 + $0x10] sm:$0xff] %v407_v15 }
  0xb3   : > { %413 = vst [vmem:[#allocation2 + $0x18] sm:$0xff] %v409_v16 }
  0xb7   : > { %v399_v19 = vpop.f32.mrf.mxu0  ;;  %v404_v20 = vpop.f32.mrf.mxu1  ;;  %419 = sbr.rel (!%p415_p6) target bundleno = 202 (0xca), region = 40 }
  0xb8   : > { %v408_v21 = vadd.f32 %v399_v19, %v305_v17  ;;  %v410_v22 = vadd.f32 %v404_v20, %v307_v18 }
  0xb9   : > { %v420_v23 = vld [vmem:[#allocation2 + $0x10] sm:$0xff] (%p415_p6) }
  0xba   : > { %412 = vst [vmem:[#allocation2] sm:$0xff] %v408_v21  ;;  %v422_v26 = vld [vmem:[#allocation2 + $0x18] sm:$0xff] (%p415_p6)  ;;  %v428_v28 = vadd.f32 (%p415_p6), %v677_v25, %v420_v23 }
  0xbb   : > { %414 = vst [vmem:[#allocation2 + $0x8] sm:$0xff] %v410_v22  ;;  %v430_v30 = vadd.f32 (%p415_p6), %v677_v25, %v422_v26 }
  0xbc   : > { %v432_v32 = vmax.f32 %v428_v28, 0.0 }
  0xbd   : > { %v434_v34 = vmax.f32 %v430_v30, 0.0 }
  0xc1   : > { %v421_v24 = vld [vmem:[#allocation2] sm:$0xff] }
  0xc2   : > { %v423_v27 = vld [vmem:[#allocation2 + $0x8] sm:$0xff]  ;;  %v429_v29 = vadd.f32 %v677_v25, %v421_v24 }
  0xc3   : > { %v431_v31 = vadd.f32 %v677_v25, %v423_v27 }
  0xc4   : > { %v433_v33 = vmax.f32 %v429_v29, 0.0 }
  0xc5   : > { %v435_v35 = vmax.f32 %v431_v31, 0.0 }
  0xc6   : > { %v636_v36 = vpack.c.bf16 %v433_v33, %v432_v32 }
  0xc7   : > { %v641_v37 = vpack.c.bf16 %v435_v35, %v434_v34 }
  0xc8   : > { %637 = vst [vmem:[%s780_s3] sm:$0xff] %v636_v36  }
  0xc9   : > { %643 = vst [vmem:[%s780_s3 + $0x8] sm:$0xff] %v641_v37  }
  0xca PF: > { %s13_s14 = sadd.s32 1, %s700_s14   ;;  %s781_s12 = smov %s696_s13 }
  0xcb   : > { %p10_p7 = scmp.ge.s32.totalorder %s13_s14, 11   ;;  %s782_s13 = smov %s784_s15 }
  0xcd   :  { %12 = sbr.rel (!%p10_p7) target bundleno = 2 (0x2), region = 76 }

// kernel: resnet_forward.35
= control target key start
LH: loop header
LB: loop body
LE: loop exit
PB: predicated region body
PF: predicated region fallthrough
CT: control target
= control target key end

     0   :  { %s329_s1 = inlined_call_operand.vmem [shape: bf16[1,128,128], index: 1, kind: input, shape index: {}]   ;;  %s330_s2 = inlined_call_operand.vmem [shape: f32[1,128], index: 2, kind: input, shape index: {}]   ;;  %s331_s0 = inlined_call_operand.vmem [shape: bf16[1,32,128], index: 0, kind: input, shape index: {}]   ;;  %s332_s3 = inlined_call_operand.vmem [shape: bf16[32,128], index: 3, kind: input, shape index: {}]   ;;  %s333_s4 = inlined_call_operand.vmem [shape: bf16[32,128], index: 4, kind: output, shape index: {}]  }
   0x1   :  { %v229_v0 = vld [vmem:[%s329_s1 + $0x38] sm:$0xff]  ;;  %v228_v1 = vld [vmem:[%s329_s1 + $0x30] sm:$0xff]  ;;  %v227_v2 = vld [vmem:[%s329_s1 + $0x28] sm:$0xff] }
   0x2   :  { %111 = vmatpush.bf16.msra.mxu0 %v229_v0  ;;  %250 = vmatpush.bf16.msra.mxu1 %v229_v0  ;;  %v226_v3 = vld [vmem:[%s329_s1 + $0x20] sm:$0xff]  ;;  %v225_v4 = vld [vmem:[%s329_s1 + $0x18] sm:$0xff]  ;;  %v224_v5 = vld [vmem:[%s329_s1 + $0x10] sm:$0xff] }
   0x3   :  { %v223_v6 = vld [vmem:[%s329_s1 + $0x8] sm:$0xff]  ;;  %v222_v7 = vld [vmem:[%s329_s1] sm:$0xff] }
   0x4   :  { %v220_v8 = vld [vmem:[%s331_s0] sm:$0xff]  ;;  %v221_v9 = vld [vmem:[%s331_s0 + $0x8] sm:$0xff] }
   0x5   :  { %v258_v12 = vld [vmem:[%s330_s2] ss:$0 sm:$0xff]  ;;  %v248_v14 = vld [vmem:[%s332_s3 + $0x8] sm:$0xff]  }
   0x6   :  { %112 = vmatpush.bf16.msra.mxu0 %v228_v1  ;;  %251 = vmatpush.bf16.msra.mxu1 %v228_v1  ;;  %v231_v13 = vld [vmem:[%s332_s3] sm:$0xff]   ;;  %v236_v18 = vunpack.c.l.bf16 %v248_v14  ;;  %v237_v20 = vunpack.c.h.bf16 %v248_v14 }
   0x7   :  { %v232_v16 = vunpack.c.l.bf16 %v231_v13  ;;  %v233_v19 = vunpack.c.h.bf16 %v231_v13 }
   0xa   :  { %113 = vmatpush.bf16.msra.mxu0 %v227_v2  ;;  %252 = vmatpush.bf16.msra.mxu1 %v227_v2 }
   0xe   :  { %114 = vmatpush.bf16.msra.mxu0 %v226_v3  ;;  %253 = vmatpush.bf16.msra.mxu1 %v226_v3 }
  0x12   :  { %115 = vmatpush.bf16.msra.mxu0 %v225_v4  ;;  %254 = vmatpush.bf16.msra.mxu1 %v225_v4 }
  0x16   :  { %116 = vmatpush.bf16.msra.mxu0 %v224_v5  ;;  %255 = vmatpush.bf16.msra.mxu1 %v224_v5 }
  0x1a   :  { %117 = vmatpush.bf16.msra.mxu0 %v223_v6  ;;  %256 = vmatpush.bf16.msra.mxu1 %v223_v6 }
  0x1e   :  { %118 = vmatpush.bf16.msra.mxu0 %v222_v7  ;;  %257 = vmatpush.bf16.msra.mxu1 %v222_v7 }
  0x21   :  { %119 = vmatmul.bf16.vlgmr.msra.gmra.mxu0 %v220_v8  ;;  %124 = vmatmul.bf16.vlgmr.msra.gmra.mxu1 %v221_v9 }
  0x9e   :  { %v120_v10 = vpop.f32.mrf.mxu0  ;;  %v125_v11 = vpop.f32.mrf.mxu1 }
  0x9f   :  { %v148_v15 = vadd.f32 %v258_v12, %v120_v10  ;;  %v150_v17 = vadd.f32 %v258_v12, %v125_v11 }
  0xa1   :  { %v160_v23 = vadd.f32 %v232_v16, %v148_v15  ;;  %v162_v24 = vadd.f32 %v236_v18, %v150_v17 }
  0xa3   :  { %v164_v29 = vmax.f32 %v160_v23, 0.0  ;;  %v166_v30 = vmax.f32 %v162_v24, 0.0 }
  0xa6   :  { %v122_v21 = vpop.f32.mrf.mxu0  ;;  %v127_v22 = vpop.f32.mrf.mxu1 }
  0xa7   :  { %v149_v25 = vadd.f32 %v258_v12, %v122_v21  ;;  %v151_v26 = vadd.f32 %v258_v12, %v127_v22 }
  0xa9   :  { %v161_v27 = vadd.f32 %v233_v19, %v149_v25  ;;  %v163_v28 = vadd.f32 %v237_v20, %v151_v26 }
  0xab   :  { %v165_v31 = vmax.f32 %v161_v27, 0.0  ;;  %v167_v32 = vmax.f32 %v163_v28, 0.0 }
  0xad   :  { %v241_v33 = vpack.c.bf16 %v165_v31, %v164_v29  ;;  %v246_v34 = vpack.c.bf16 %v167_v32, %v166_v30 }
  0xaf   :  { %242 = vst [vmem:[%s333_s4] sm:$0xff] %v241_v33  }
  0xb0   :  { %249 = vst [vmem:[%s333_s4 + $0x8] sm:$0xff] %v246_v34  }

// kernel: resnet_forward.37
= control target key start
LH: loop header
LB: loop body
LE: loop exit
PB: predicated region body
PF: predicated region fallthrough
CT: control target
= control target key end

     0   :  { %s236_s1 = inlined_call_operand.vmem [shape: bf16[1,128,128], index: 1, kind: input, shape index: {}]   ;;  %s237_s2 = inlined_call_operand.vmem [shape: f32[1,128], index: 2, kind: input, shape index: {}]   ;;  %s238_s0 = inlined_call_operand.vmem [shape: bf16[1,16,128], index: 0, kind: input, shape index: {}]   ;;  %s239_s3 = inlined_call_operand.vmem [shape: bf16[16,128], index: 3, kind: output, shape index: {}]  }
   0x1   :  { %v176_v0 = vld [vmem:[%s236_s1 + $0x38] sm:$0xff]  ;;  %v175_v1 = vld [vmem:[%s236_s1 + $0x30] sm:$0xff]  ;;  %v174_v2 = vld [vmem:[%s236_s1 + $0x28] sm:$0xff] }
   0x2   :  { %96 = vmatpush.bf16.msra.mxu0 %v176_v0  ;;  %v173_v3 = vld [vmem:[%s236_s1 + $0x20] sm:$0xff]  ;;  %v172_v4 = vld [vmem:[%s236_s1 + $0x18] sm:$0xff]  ;;  %v171_v5 = vld [vmem:[%s236_s1 + $0x10] sm:$0xff] }
   0x3   :  { %v170_v6 = vld [vmem:[%s236_s1 + $0x8] sm:$0xff]  ;;  %v169_v7 = vld [vmem:[%s236_s1] sm:$0xff] }
   0x4   :  { %v168_v8 = vld [vmem:[%s238_s0] sm:$0xff] }
   0x5   :  { %v182_v10 = vld [vmem:[%s237_s2] ss:$0 sm:$0xff] }
   0x6   :  { %97 = vmatpush.bf16.msra.mxu0 %v175_v1 }
   0xa   :  { %98 = vmatpush.bf16.msra.mxu0 %v174_v2 }
   0xe   :  { %99 = vmatpush.bf16.msra.mxu0 %v173_v3 }
  0x12   :  { %100 = vmatpush.bf16.msra.mxu0 %v172_v4 }
  0x16   :  { %101 = vmatpush.bf16.msra.mxu0 %v171_v5 }
  0x1a   :  { %102 = vmatpush.bf16.msra.mxu0 %v170_v6 }
  0x1e   :  { %103 = vmatpush.bf16.msra.mxu0 %v169_v7 }
  0x21   :  { %104 = vmatmul.bf16.vlgmr.msra.gmra.mxu0 %v168_v8 }
  0x9e   :  { %v105_v9 = vpop.f32.mrf.mxu0 }
  0x9f   :  { %v122_v12 = vadd.f32 %v182_v10, %v105_v9 }
  0xa6   :  { %v107_v11 = vpop.f32.mrf.mxu0 }
  0xa7   :  { %v123_v13 = vadd.f32 %v182_v10, %v107_v11 }
  0xa9   :  { %v180_v14 = vpack.c.bf16 %v123_v13, %v122_v12 }
  0xab   :  { %181 = vst [vmem:[%s239_s3] sm:$0xff] %v180_v14  }

// kernel: resnet_forward.36
= control target key start
LH: loop header
LB: loop body
LE: loop exit
PB: predicated region body
PF: predicated region fallthrough
CT: control target
= control target key end

     0   :  { %v87_v0 = vmov 0   ;;  %s124_s1 = inlined_call_operand.vmem [shape: f32[16,1], index: 1, kind: input, shape index: {}]   ;;  %s125_s0 = inlined_call_operand.vmem [shape: bf16[4,16,128], index: 0, kind: input, shape index: {}]   ;;  %s126_s2 = inlined_call_operand.vmem [shape: bf16[16,128], index: 2, kind: output, shape index: {}]  }
   0x1   :  { %82 = vset.pattern.permute.xlu0 %v87_v0  ;;  %v33_v1 = vld [vmem:[%s124_s1] sm:$0xff]  ;;  %v34_v2 = vld [vmem:[%s124_s1 + $0x8] sm:$0xff]  ;;  %v79_v11 = vld [vmem:[%s125_s0 + $0x10] sm:$0xff]  }
   0x2   :  { %83 = vrcp.f32 %v33_v1  ;;  %v58_v5 = vld [vmem:[%s125_s0] sm:$0xff]   ;;  %v78_v6 = vld [vmem:[%s125_s0 + $0x8] sm:$0xff]   ;;  %v67_v12 = vunpack.c.l.bf16 %v79_v11  ;;  %v68_v14 = vunpack.c.h.bf16 %v79_v11  ;;  %v80_v16 = vld [vmem:[%s125_s0 + $0x18] sm:$0xff]  }
   0x3   :  { %85 = vrcp.f32 %v34_v2  ;;  %v59_v7 = vunpack.c.l.bf16 %v58_v5  ;;  %v63_v8 = vunpack.c.l.bf16 %v78_v6  ;;  %v60_v9 = vunpack.c.h.bf16 %v58_v5 }
   0x4   :  { %v64_v10 = vunpack.c.h.bf16 %v78_v6  ;;  %v71_v18 = vunpack.c.l.bf16 %v80_v16  ;;  %v72_v20 = vunpack.c.h.bf16 %v80_v16 }
   0x5   :  { %v27_v13 = vadd.f32 %v63_v8, %v59_v7 }
   0x6   :  { %v30_v15 = vadd.f32 %v64_v10, %v60_v9 }
   0x7   :  { %v28_v19 = vadd.f32 %v67_v12, %v27_v13 }
   0x8   :  { %v84_v3 = vpop.eup %83  ;;  %v31_v21 = vadd.f32 %v68_v14, %v30_v15 }
   0x9   :  { %39 = vperm.xlu0 %82, %v84_v3   ;;  %v86_v4 = vpop.eup %85  ;;  %v29_v22 = vadd.f32 %v71_v18, %v28_v19 }
   0xa   :  { %v32_v23 = vadd.f32 %v72_v20, %v31_v21 }
  0x11   :  { %44 = vperm.xlu0 %82, %v86_v4  }
  0x7b   :  { %v40_v17 = vpop.permute.xlu0 %39 }
  0x7c   :  { %v47_v25 = vmul.f32 %v40_v17, %v29_v22 }
  0x83   :  { %v45_v24 = vpop.permute.xlu0 %44 }
  0x84   :  { %v48_v26 = vmul.f32 %v45_v24, %v32_v23 }
  0x86   :  { %v76_v27 = vpack.c.bf16 %v48_v26, %v47_v25 }
  0x88   :  { %77 = vst [vmem:[%s126_s2] sm:$0xff] %v76_v27  }

// kernel: resnet_forward.40
= control target key start
LH: loop header
LB: loop body
LE: loop exit
PB: predicated region body
PF: predicated region fallthrough
CT: control target
= control target key end

     0   :  { %s259_s1 = inlined_call_operand.vmem [shape: bf16[1,128,128], index: 1, kind: input, shape index: {}]   ;;  %s260_s2 = inlined_call_operand.vmem [shape: f32[1,128], index: 2, kind: input, shape index: {}]   ;;  %s261_s0 = inlined_call_operand.vmem [shape: bf16[1,16,128], index: 0, kind: input, shape index: {}]   ;;  %s262_s3 = inlined_call_operand.vmem [shape: bf16[16,128], index: 3, kind: input, shape index: {}]   ;;  %s263_s4 = inlined_call_operand.vmem [shape: bf16[16,128], index: 4, kind: output, shape index: {}]  }
   0x1   :  { %v187_v0 = vld [vmem:[%s259_s1 + $0x38] sm:$0xff]  ;;  %v186_v1 = vld [vmem:[%s259_s1 + $0x30] sm:$0xff]  ;;  %v185_v2 = vld [vmem:[%s259_s1 + $0x28] sm:$0xff] }
   0x2   :  { %99 = vmatpush.bf16.msra.mxu0 %v187_v0  ;;  %v184_v3 = vld [vmem:[%s259_s1 + $0x20] sm:$0xff]  ;;  %v183_v4 = vld [vmem:[%s259_s1 + $0x18] sm:$0xff]  ;;  %v182_v5 = vld [vmem:[%s259_s1 + $0x10] sm:$0xff] }
   0x3   :  { %v181_v6 = vld [vmem:[%s259_s1 + $0x8] sm:$0xff]  ;;  %v180_v7 = vld [vmem:[%s259_s1] sm:$0xff] }
   0x4   :  { %v179_v8 = vld [vmem:[%s261_s0] sm:$0xff] }
   0x5   :  { %v197_v10 = vld [vmem:[%s260_s2] ss:$0 sm:$0xff] }
   0x6   :  { %100 = vmatpush.bf16.msra.mxu0 %v186_v1  ;;  %v189_v11 = vld [vmem:[%s262_s3] sm:$0xff]  }
   0x7   :  { %v190_v13 = vunpack.c.l.bf16 %v189_v11  ;;  %v191_v14 = vunpack.c.h.bf16 %v189_v11 }
   0xa   :  { %101 = vmatpush.bf16.msra.mxu0 %v185_v2 }
   0xe   :  { %102 = vmatpush.bf16.msra.mxu0 %v184_v3 }
  0x12   :  { %103 = vmatpush.bf16.msra.mxu0 %v183_v4 }
  0x16   :  { %104 = vmatpush.bf16.msra.mxu0 %v182_v5 }
  0x1a   :  { %105 = vmatpush.bf16.msra.mxu0 %v181_v6 }
  0x1e   :  { %106 = vmatpush.bf16.msra.mxu0 %v180_v7 }
  0x21   :  { %107 = vmatmul.bf16.vlgmr.msra.gmra.mxu0 %v179_v8 }
  0x9e   :  { %v108_v9 = vpop.f32.mrf.mxu0 }
  0x9f   :  { %v125_v12 = vadd.f32 %v197_v10, %v108_v9 }
  0xa1   :  { %v131_v16 = vadd.f32 %v190_v13, %v125_v12 }
  0xa3   :  { %v133_v19 = vmax.f32 %v131_v16, 0.0 }
  0xa6   :  { %v110_v15 = vpop.f32.mrf.mxu0 }
  0xa7   :  { %v126_v17 = vadd.f32 %v197_v10, %v110_v15 }
  0xa9   :  { %v132_v18 = vadd.f32 %v191_v14, %v126_v17 }
  0xab   :  { %v134_v20 = vmax.f32 %v132_v18, 0.0 }
  0xad   :  { %v195_v21 = vpack.c.bf16 %v134_v20, %v133_v19 }
  0xaf   :  { %196 = vst [vmem:[%s263_s4] sm:$0xff] %v195_v21  }

// kernel: resnet_forward.41
= control target key start
LH: loop header
LB: loop body
LE: loop exit
PB: predicated region body
PF: predicated region fallthrough
CT: control target
= control target key end

     0   :  { %s238_s1 = inlined_call_operand.vmem [shape: bf16[1,128,128], index: 1, kind: input, shape index: {}]   ;;  %s239_s2 = inlined_call_operand.vmem [shape: f32[1,128], index: 2, kind: input, shape index: {}]   ;;  %s240_s0 = inlined_call_operand.vmem [shape: bf16[1,16,128], index: 0, kind: input, shape index: {}]   ;;  %s241_s3 = inlined_call_operand.vmem [shape: bf16[16,128], index: 3, kind: output, shape index: {}]  }
   0x1   :  { %v178_v0 = vld [vmem:[%s238_s1 + $0x38] sm:$0xff]  ;;  %v177_v1 = vld [vmem:[%s238_s1 + $0x30] sm:$0xff]  ;;  %v176_v2 = vld [vmem:[%s238_s1 + $0x28] sm:$0xff] }
   0x2   :  { %96 = vmatpush.bf16.msra.mxu0 %v178_v0  ;;  %v175_v3 = vld [vmem:[%s238_s1 + $0x20] sm:$0xff]  ;;  %v174_v4 = vld [vmem:[%s238_s1 + $0x18] sm:$0xff]  ;;  %v173_v5 = vld [vmem:[%s238_s1 + $0x10] sm:$0xff] }
   0x3   :  { %v172_v6 = vld [vmem:[%s238_s1 + $0x8] sm:$0xff]  ;;  %v171_v7 = vld [vmem:[%s238_s1] sm:$0xff] }
   0x4   :  { %v170_v8 = vld [vmem:[%s240_s0] sm:$0xff] }
   0x5   :  { %v184_v10 = vld [vmem:[%s239_s2] ss:$0 sm:$0xff] }
   0x6   :  { %97 = vmatpush.bf16.msra.mxu0 %v177_v1 }
   0xa   :  { %98 = vmatpush.bf16.msra.mxu0 %v176_v2 }
   0xe   :  { %99 = vmatpush.bf16.msra.mxu0 %v175_v3 }
  0x12   :  { %100 = vmatpush.bf16.msra.mxu0 %v174_v4 }
  0x16   :  { %101 = vmatpush.bf16.msra.mxu0 %v173_v5 }
  0x1a   :  { %102 = vmatpush.bf16.msra.mxu0 %v172_v6 }
  0x1e   :  { %103 = vmatpush.bf16.msra.mxu0 %v171_v7 }
  0x21   :  { %104 = vmatmul.bf16.vlgmr.msra.gmra.mxu0 %v170_v8 }
  0x9e   :  { %v105_v9 = vpop.f32.mrf.mxu0 }
  0x9f   :  { %v122_v11 = vadd.f32 %v184_v10, %v105_v9 }
  0xa1   :  { %v124_v14 = vmax.f32 %v122_v11, 0.0 }
  0xa6   :  { %v107_v12 = vpop.f32.mrf.mxu0 }
  0xa7   :  { %v123_v13 = vadd.f32 %v184_v10, %v107_v12 }
  0xa9   :  { %v125_v15 = vmax.f32 %v123_v13, 0.0 }
  0xab   :  { %v182_v16 = vpack.c.bf16 %v125_v15, %v124_v14 }
  0xad   :  { %183 = vst [vmem:[%s241_s3] sm:$0xff] %v182_v16  }

// kernel: resnet_forward.39
= control target key start
LH: loop header
LB: loop body
LE: loop exit
PB: predicated region body
PF: predicated region fallthrough
CT: control target
= control target key end

     0   :  { %s673_s12 = smov 0   ;;  %s675_s13 = smov 0   ;;  %s718_s0 = inlined_call_operand.vmem [shape: bf16[9,16,128], index: 0, kind: input, shape index: {}]   ;;  %s719_s1 = inlined_call_operand.vmem [shape: bf16[9,128,128], index: 1, kind: input, shape index: {}]   ;;  %s720_s2 = inlined_call_operand.vmem [shape: f32[1,128], index: 2, kind: input, shape index: {}]   ;;  %s721_s3 = inlined_call_operand.vmem [shape: bf16[16,128], index: 3, kind: output, shape index: {}]  }
   0x1   :  { %s677_s14 = smov 0  }
   0x2 LB: > { %s31_s15 = sadd.s32 1, %s646_s13  ;;  %p537_p0 = scmp.ge.s32.totalorder %s650_s14, 1  ;;  %s650_s14 = sphi %s677_s14, %s13_s14   ;;  %s646_s13 = sphi %s675_s13, %s723_s13   ;;  %s642_s12 = sphi %s673_s12, %s722_s12  }
   0x3   : > { %p33_p1 = scmp.ge.s32.totalorder %s31_s15, 9  ;;  %p207_p2 = scmp.lt.s32.totalorder %s650_s14, 10 }
   0x5   : > { %s725_s15 = smov (%p33_p1, %s31_s15), 0  ;;  %p208_p3 = pnand %p537_p0, %p207_p2 }
   0x6   : > { %p257_p4 = scmp.lt.s32.totalorder (!%p208_p3), %s642_s12, 8  ;;  %p294_p5 = scmp.eq.s32.totalorder (!%p208_p3), %s642_s12, 0 }
   0x7   : > { %211 = sbr.rel (%p208_p3) target bundleno = 201 (0xc9), region = 32 }
   0xc   : > { %s258_s16 = scalar_select %p257_p4, %s642_s12, 8  ;;  %v652_v0 = vmov (%p294_p5), 0.0  }
   0xd   : > { %299 = sbr.rel (!%p294_p5) target bundleno = 18 (0x12), region = 36  ;;  %300 = vst [vmem:[#allocation2] sm:$0xff] (%p294_p5), %v652_v0 }
   0xe   : > { %s584_s17 = sshll.u32 %s258_s16, 3  ;;  %s585_s18 = sshll.u32 %s258_s16, 6  ;;  %301 = vst [vmem:[#allocation2 + $0x8] sm:$0xff] (%p294_p5), %v652_v0 }
   0xf   : > { %s267_s21 = scalar_lea.vmem %s718_s0, %s584_s17  ;;  %s280_s24 = scalar_lea.vmem %s719_s1, %s585_s18 }
  0x12 PF: > { %v595_v1 = vld [vmem:[%s280_s24 + $0x38] sm:$0xff]  ;;  %v594_v2 = vld [vmem:[%s280_s24 + $0x30] sm:$0xff]  ;;  %v593_v3 = vld [vmem:[%s280_s24 + $0x28] sm:$0xff]  ;;  %p394_p6 = scmp.eq.s32.totalorder %s642_s12, 8 }
  0x13   : > { %376 = vmatpush.bf16.msra.mxu0 %v595_v1  ;;  %v592_v4 = vld [vmem:[%s280_s24 + $0x20] sm:$0xff]  ;;  %v591_v5 = vld [vmem:[%s280_s24 + $0x18] sm:$0xff]  ;;  %v590_v6 = vld [vmem:[%s280_s24 + $0x10] sm:$0xff] }
  0x14   : > { %v589_v7 = vld [vmem:[%s280_s24 + $0x8] sm:$0xff]  ;;  %v588_v8 = vld [vmem:[%s280_s24] sm:$0xff] }
  0x15   : > { %v587_v9 = vld [vmem:[%s267_s21] sm:$0xff]  ;;  %v303_v13 = vld [vmem:[#allocation2 + $0x8] sm:$0xff] }
  0x16   : > { %v302_v10 = vld [vmem:[#allocation2] sm:$0xff] }
  0x17   : > { %377 = vmatpush.bf16.msra.mxu0 %v594_v2  ;;  %v627_v18 = vld [vmem:[%s720_s2] ss:$0 sm:$0xff] (%p394_p6) }
  0x1b   : > { %378 = vmatpush.bf16.msra.mxu0 %v593_v3 }
  0x1f   : > { %379 = vmatpush.bf16.msra.mxu0 %v592_v4 }
  0x23   : > { %380 = vmatpush.bf16.msra.mxu0 %v591_v5 }
  0x27   : > { %381 = vmatpush.bf16.msra.mxu0 %v590_v6 }
  0x2b   : > { %382 = vmatpush.bf16.msra.mxu0 %v589_v7 }
  0x2f   : > { %383 = vmatpush.bf16.msra.mxu0 %v588_v8 }
  0x32   : > { %384 = vmatmul.bf16.vlgmr.msra.gmra.mxu0 %v587_v9 }
  0xaf   : > { %v385_v11 = vpop.f32.mrf.mxu0 }
  0xb0   : > { %v390_v12 = vadd.f32 %v385_v11, %v302_v10 }
  0xb2   : > { %392 = vst [vmem:[#allocation2] sm:$0xff] %v390_v12 }
  0xb6   : > { %398 = sbr.rel (!%p394_p6) target bundleno = 201 (0xc9), region = 40 }
  0xb7   : > { %v387_v14 = vpop.f32.mrf.mxu0 }
  0xb8   : > { %v391_v15 = vadd.f32 %v387_v14, %v303_v13 }
  0xb9   : > { %v399_v16 = vld [vmem:[#allocation2] sm:$0xff] (%p394_p6) }
  0xba   : > { %393 = vst [vmem:[#allocation2 + $0x8] sm:$0xff] %v391_v15  ;;  %v405_v19 = vadd.f32 (%p394_p6), %v627_v18, %v399_v16 }
  0xbc   : > { %v407_v21 = vmax.f32 %v405_v19, 0.0 }
  0xc1   : > { %v400_v17 = vld [vmem:[#allocation2 + $0x8] sm:$0xff] }
  0xc2   : > { %v406_v20 = vadd.f32 %v627_v18, %v400_v17 }
  0xc4   : > { %v408_v22 = vmax.f32 %v406_v20, 0.0 }
  0xc6   : > { %v600_v23 = vpack.c.bf16 %v408_v22, %v407_v21 }
  0xc8   : > { %601 = vst [vmem:[%s721_s3] sm:$0xff] %v600_v23  }
  0xc9 PF: > { %s13_s14 = sadd.s32 1, %s650_s14   ;;  %s722_s12 = smov %s646_s13 }
  0xca   : > { %p10_p7 = scmp.ge.s32.totalorder %s13_s14, 11   ;;  %s723_s13 = smov %s725_s15 }
  0xcc   :  { %12 = sbr.rel (!%p10_p7) target bundleno = 2 (0x2), region = 76 }

// kernel: resnet_forward.50
= control target key start
LH: loop header
LB: loop body
LE: loop exit
PB: predicated region body
PF: predicated region fallthrough
CT: control target
= control target key end

     0   :  { %s405_s1 = inlined_call_operand.vmem [shape: bf16[1,128,256], index: 1, kind: input, shape index: {}]   ;;  %s406_s0 = inlined_call_operand.vmem [shape: bf16[1,16,128], index: 0, kind: input, shape index: {}]   ;;  %s407_s2 = inlined_call_operand.vmem [shape: f32[1,256], index: 2, kind: input, shape index: {}]   ;;  %s408_s3 = inlined_call_operand.vmem [shape: bf16[16,256], index: 3, kind: output, shape index: {}]  }
   0x1   :  { %v254_v0 = vld [vmem:[%s405_s1 + $0x70] sm:$0xf]  ;;  %v276_v1 = vld [vmem:[%s405_s1 + $0x74] sm:$0xf0]  ;;  %v275_v2 = vld [vmem:[%s405_s1 + $0x74] sm:$0xf] }
   0x2   :  { %v255_v3 = vor.u32 %v276_v1, %v254_v0  ;;  %v256_v4 = vld [vmem:[%s405_s1 + $0x78] sm:$0xf0]  ;;  %v246_v5 = vld [vmem:[%s405_s1 + $0x60] sm:$0xf]  ;;  %v274_v6 = vld [vmem:[%s405_s1 + $0x64] sm:$0xf0] }
   0x3   :  { %v259_v7 = vor.u32 %v275_v2, %v256_v4  ;;  %v273_v8 = vld [vmem:[%s405_s1 + $0x64] sm:$0xf]  ;;  %v248_v9 = vld [vmem:[%s405_s1 + $0x68] sm:$0xf0]  ;;  %v247_v10 = vor.u32 %v274_v6, %v246_v5  ;;  %v238_v12 = vld [vmem:[%s405_s1 + $0x50] sm:$0xf] }
   0x4   :  { %132 = vmatpush.bf16.msra.mxu0 %v255_v3  ;;  %v251_v11 = vor.u32 %v273_v8, %v248_v9  ;;  %v272_v13 = vld [vmem:[%s405_s1 + $0x54] sm:$0xf0]  ;;  %v271_v14 = vld [vmem:[%s405_s1 + $0x54] sm:$0xf]  ;;  %v240_v15 = vld [vmem:[%s405_s1 + $0x58] sm:$0xf0] }
   0x5   :  { %146 = vmatpush.bf16.msra.mxu1 %v259_v7  ;;  %v239_v16 = vor.u32 %v272_v13, %v238_v12  ;;  %v243_v17 = vor.u32 %v271_v14, %v240_v15  ;;  %v230_v18 = vld [vmem:[%s405_s1 + $0x40] sm:$0xf]  ;;  %v270_v19 = vld [vmem:[%s405_s1 + $0x44] sm:$0xf0]  ;;  %v269_v20 = vld [vmem:[%s405_s1 + $0x44] sm:$0xf] }
   0x6   :  { %v232_v21 = vld [vmem:[%s405_s1 + $0x48] sm:$0xf0]  ;;  %v231_v22 = vor.u32 %v270_v19, %v230_v18  ;;  %v222_v24 = vld [vmem:[%s405_s1 + $0x30] sm:$0xf]  ;;  %v268_v25 = vld [vmem:[%s405_s1 + $0x34] sm:$0xf0] }
   0x7   :  { %v235_v23 = vor.u32 %v269_v20, %v232_v21  ;;  %v267_v26 = vld [vmem:[%s405_s1 + $0x34] sm:$0xf]  ;;  %v224_v27 = vld [vmem:[%s405_s1 + $0x38] sm:$0xf0]  ;;  %v223_v28 = vor.u32 %v268_v25, %v222_v24  ;;  %v214_v30 = vld [vmem:[%s405_s1 + $0x20] sm:$0xf] }
   0x8   :  { %133 = vmatpush.bf16.msra.mxu0 %v247_v10  ;;  %v227_v29 = vor.u32 %v267_v26, %v224_v27  ;;  %v266_v31 = vld [vmem:[%s405_s1 + $0x24] sm:$0xf0]  ;;  %v265_v32 = vld [vmem:[%s405_s1 + $0x24] sm:$0xf]  ;;  %v216_v33 = vld [vmem:[%s405_s1 + $0x28] sm:$0xf0] }
   0x9   :  { %147 = vmatpush.bf16.msra.mxu1 %v251_v11  ;;  %v215_v34 = vor.u32 %v266_v31, %v214_v30  ;;  %v219_v35 = vor.u32 %v265_v32, %v216_v33  ;;  %v206_v36 = vld [vmem:[%s405_s1 + $0x10] sm:$0xf]  ;;  %v264_v37 = vld [vmem:[%s405_s1 + $0x14] sm:$0xf0]  ;;  %v263_v38 = vld [vmem:[%s405_s1 + $0x14] sm:$0xf] }
   0xa   :  { %v208_v39 = vld [vmem:[%s405_s1 + $0x18] sm:$0xf0]  ;;  %v207_v40 = vor.u32 %v264_v37, %v206_v36  ;;  %v198_v42 = vld [vmem:[%s405_s1] sm:$0xf]  ;;  %v262_v43 = vld [vmem:[%s405_s1 + $0x4] sm:$0xf0] }
   0xb   :  { %v211_v41 = vor.u32 %v263_v38, %v208_v39  ;;  %v261_v44 = vld [vmem:[%s405_s1 + $0x4] sm:$0xf]  ;;  %v200_v45 = vld [vmem:[%s405_s1 + $0x8] sm:$0xf0]  ;;  %v199_v46 = vor.u32 %v262_v43, %v198_v42  ;;  %v174_v49 = vld [vmem:[%s407_s2] sm:$0x3] }
   0xc   :  { %134 = vmatpush.bf16.msra.mxu0 %v239_v16  ;;  %v203_v47 = vor.u32 %v261_v44, %v200_v45  ;;  %v260_v48 = vld [vmem:[%s406_s0] sm:$0xff]  ;;  %v176_v50 = vperm.slane %v174_v49, 0  ;;  %v177_v51 = vperm.slane %v174_v49, 1 }
   0xd   :  { %148 = vmatpush.bf16.msra.mxu1 %v243_v17 }
  0x10   :  { %135 = vmatpush.bf16.msra.mxu0 %v231_v22 }
  0x11   :  { %149 = vmatpush.bf16.msra.mxu1 %v235_v23 }
  0x14   :  { %136 = vmatpush.bf16.msra.mxu0 %v223_v28 }
  0x15   :  { %150 = vmatpush.bf16.msra.mxu1 %v227_v29 }
  0x18   :  { %137 = vmatpush.bf16.msra.mxu0 %v215_v34 }
  0x19   :  { %151 = vmatpush.bf16.msra.mxu1 %v219_v35 }
  0x1c   :  { %138 = vmatpush.bf16.msra.mxu0 %v207_v40 }
  0x1d   :  { %152 = vmatpush.bf16.msra.mxu1 %v211_v41 }
  0x20   :  { %139 = vmatpush.bf16.msra.mxu0 %v199_v46 }
  0x21   :  { %153 = vmatpush.bf16.msra.mxu1 %v203_v47 }
  0x23   :  { %140 = vmatmul.bf16.vlgmr.msra.gmra.mxu0 %v260_v48 }
  0x24   :  { %154 = vmatmul.bf16.vlgmr.msra.gmra.mxu1 %v260_v48 }
  0xa0   :  { %v141_v52 = vpop.f32.mrf.mxu0 }
  0xa1   :  { %v180_v53 = vadd.f32 %v176_v50, %v141_v52  ;;  %v155_v54 = vpop.f32.mrf.mxu1 }
  0xa2   :  { %v181_v55 = vadd.f32 %v177_v51, %v155_v54 }
  0xa4   :  { %v184_v56 = vpack.c.bf16 %v181_v55, %v180_v53 }
  0xa6   :  { %186 = vst [vmem:[%s408_s3] sm:$0xff] %v184_v56 }
  0xa8   :  { %v143_v57 = vpop.f32.mrf.mxu0 }
  0xa9   :  { %v182_v58 = vadd.f32 %v176_v50, %v143_v57  ;;  %v157_v59 = vpop.f32.mrf.mxu1 }
  0xaa   :  { %v183_v60 = vadd.f32 %v177_v51, %v157_v59 }
  0xac   :  { %v185_v61 = vpack.c.bf16 %v183_v60, %v182_v58 }
  0xae   :  { %187 = vst [vmem:[%s408_s3 + $0x8] sm:$0xff] %v185_v61 }

// kernel: resnet_forward.54
= control target key start
LH: loop header
LB: loop body
LE: loop exit
PB: predicated region body
PF: predicated region fallthrough
CT: control target
= control target key end

     0   :  { %vm30_vm0 = vcmask 1040384   ;;  %vm49_vm1 = vcmask 1041409   ;;  %s86_s0 = inlined_call_operand.vmem [shape: bf16[2,1,256], index: 0, kind: input, shape index: {}]   ;;  %s87_s1 = inlined_call_operand.vmem [shape: bf16[2,256], index: 1, kind: output, shape index: {}]  }
   0x1   :  { %v9_v0 = vld [vmem:[%s86_s0 + $0x2] sm:$0x3]  ;;  %v8_v1 = vld [vmem:[%s86_s0] sm:$0x3] }
   0x2   :  { %v11_v2 = vunpack.c.l.bf16 %v9_v0  ;;  %v10_v3 = vunpack.c.l.bf16 %v8_v1 }
   0x4   :  { %v18_v4 = vperm.slane %v11_v2, 0  ;;  %v19_v5 = vperm.slane %v11_v2, 2  ;;  %v16_v6 = vperm.slane %v10_v3, 0  ;;  %v17_v7 = vperm.slane %v10_v3, 2 }
   0x6   :  { %v25_v8 = vpack.c.bf16 %v19_v5, %v18_v4  ;;  %v24_v9 = vpack.c.bf16 %v17_v7, %v16_v6 }
   0x8   :  { %v29_v10 = vrot.slane %v25_v8, 3  ;;  %v28_v11 = vrot.slane %v24_v9, 3 }
   0xa   :  { %v36_v12 = vsel %vm30_vm0, %v25_v8, %v29_v10  ;;  %v33_v13 = vsel %vm30_vm0, %v24_v9, %v28_v11 }
   0xb   :  { %41 = vst [vmem:[#allocation1 + $0x20] ss:$4 sm:$0xff] %v36_v12 }
   0xc   :  { %37 = vst [vmem:[#allocation1] ss:$4 sm:$0xff] %v33_v13 }
  0x12   :  { %v42_v14 = vld [vmem:[#allocation1 + $0x20] sm:$0xff] }
  0x13   :  { %v38_v15 = vld [vmem:[#allocation1] sm:$0xff]  ;;  %v46_v16 = vunpack.c.l.b16 %v42_v14  ;;  %v47_v17 = vunpack.c.h.b16 %v42_v14 }
  0x14   :  { %v44_v18 = vunpack.c.l.b16 %v38_v15  ;;  %v45_v19 = vunpack.c.h.b16 %v38_v15 }
  0x15   :  { %v48_v20 = vrot.slane %v46_v16, 7  ;;  %v51_v21 = vrot.slane %v47_v17, 7 }
  0x17   :  { %v50_v22 = vsel %vm49_vm1, %v48_v20, %v44_v18  ;;  %v52_v23 = vsel %vm49_vm1, %v51_v21, %v45_v19 }
  0x18   :  { %v53_v24 = vpack.c.b16 %v52_v23, %v50_v22 }
  0x1a   :  { %v54_v25 = vrot.slane %v53_v24, 3 }
  0x1c   :  { %v57_v26 = vsel %vm30_vm0, %v53_v24, %v54_v25 }
  0x1d   :  { %59 = vst [vmem:[%s87_s1] sm:$0x3] %v57_v26 }

// kernel: resnet_forward.55
= control target key start
LH: loop header
LB: loop body
LE: loop exit
PB: predicated region body
PF: predicated region fallthrough
CT: control target
= control target key end

     0   :  { %s392_s1 = inlined_call_operand.vmem [shape: bf16[1,256,128], index: 1, kind: input, shape index: {}]   ;;  %s393_s0 = inlined_call_operand.vmem [shape: bf16[1,16,256], index: 0, kind: input, shape index: {}]   ;;  %s394_s2 = inlined_call_operand.vmem [shape: f32[1,128], index: 2, kind: input, shape index: {}]   ;;  %s395_s3 = inlined_call_operand.vmem [shape: f32[16,128], index: 3, kind: output, shape index: {}]  }
   0x1   :  { %v293_v0 = vld [vmem:[%s392_s1 + $0x38] sm:$0xff]  ;;  %v292_v2 = vld [vmem:[%s392_s1 + $0x30] sm:$0xff]  ;;  %v291_v4 = vld [vmem:[%s392_s1 + $0x28] sm:$0xff] }
   0x2   :  { %v301_v1 = vld [vmem:[%s392_s1 + $0x78] sm:$0xff]  ;;  %164 = vmatpush.bf16.msra.mxu0 %v293_v0  ;;  %v300_v3 = vld [vmem:[%s392_s1 + $0x70] sm:$0xff]  ;;  %v299_v5 = vld [vmem:[%s392_s1 + $0x68] sm:$0xff] }
   0x3   :  { %178 = vmatpush.bf16.msra.mxu1 %v301_v1  ;;  %v290_v6 = vld [vmem:[%s392_s1 + $0x20] sm:$0xff]  ;;  %v289_v8 = vld [vmem:[%s392_s1 + $0x18] sm:$0xff]  ;;  %v288_v10 = vld [vmem:[%s392_s1 + $0x10] sm:$0xff] }
   0x4   :  { %v298_v7 = vld [vmem:[%s392_s1 + $0x60] sm:$0xff]  ;;  %v297_v9 = vld [vmem:[%s392_s1 + $0x58] sm:$0xff]  ;;  %v296_v11 = vld [vmem:[%s392_s1 + $0x50] sm:$0xff] }
   0x5   :  { %v287_v12 = vld [vmem:[%s392_s1 + $0x8] sm:$0xff]  ;;  %v286_v14 = vld [vmem:[%s392_s1] sm:$0xff] }
   0x6   :  { %165 = vmatpush.bf16.msra.mxu0 %v292_v2  ;;  %v295_v13 = vld [vmem:[%s392_s1 + $0x48] sm:$0xff]  ;;  %v294_v15 = vld [vmem:[%s392_s1 + $0x40] sm:$0xff] }
   0x7   :  { %179 = vmatpush.bf16.msra.mxu1 %v300_v3  ;;  %v214_v16 = vld [vmem:[%s393_s0] sm:$0xf]  ;;  %v285_v17 = vld [vmem:[%s393_s0 + $0x4] sm:$0xf0]  ;;  %v284_v18 = vld [vmem:[%s393_s0 + $0x4] sm:$0xf] }
   0x8   :  { %v216_v19 = vld [vmem:[%s393_s0 + $0x8] sm:$0xf0]  ;;  %v215_v20 = vor.u32 %v285_v17, %v214_v16  ;;  %v302_v22 = vld [vmem:[%s394_s2] ss:$0 sm:$0xff] }
   0x9   :  { %v219_v21 = vor.u32 %v284_v18, %v216_v19 }
   0xa   :  { %166 = vmatpush.bf16.msra.mxu0 %v291_v4 }
   0xb   :  { %180 = vmatpush.bf16.msra.mxu1 %v299_v5 }
   0xe   :  { %167 = vmatpush.bf16.msra.mxu0 %v290_v6 }
   0xf   :  { %181 = vmatpush.bf16.msra.mxu1 %v298_v7 }
  0x12   :  { %168 = vmatpush.bf16.msra.mxu0 %v289_v8 }
  0x13   :  { %182 = vmatpush.bf16.msra.mxu1 %v297_v9 }
  0x16   :  { %169 = vmatpush.bf16.msra.mxu0 %v288_v10 }
  0x17   :  { %183 = vmatpush.bf16.msra.mxu1 %v296_v11 }
  0x1a   :  { %170 = vmatpush.bf16.msra.mxu0 %v287_v12 }
  0x1b   :  { %184 = vmatpush.bf16.msra.mxu1 %v295_v13 }
  0x1e   :  { %171 = vmatpush.bf16.msra.mxu0 %v286_v14 }
  0x1f   :  { %185 = vmatpush.bf16.msra.mxu1 %v294_v15 }
  0x21   :  { %172 = vmatmul.bf16.vlgmr.msra.gmra.mxu0 %v215_v20 }
  0x22   :  { %186 = vmatmul.bf16.vlgmr.msra.gmra.mxu1 %v219_v21 }
  0x9e   :  { %v173_v23 = vpop.f32.mrf.mxu0 }
  0x9f   :  { %v187_v24 = vpop.f32.mrf.mxu1 }
  0xa0   :  { %v188_v25 = vadd.f32 %v187_v24, %v173_v23 }
  0xa2   :  { %v204_v26 = vadd.f32 %v302_v22, %v188_v25 }
  0xa4   :  { %206 = vst [vmem:[%s395_s3] sm:$0xff] %v204_v26 }
  0xa6   :  { %v175_v27 = vpop.f32.mrf.mxu0 }
  0xa7   :  { %v189_v28 = vpop.f32.mrf.mxu1 }
  0xa8   :  { %v190_v29 = vadd.f32 %v189_v28, %v175_v27 }
  0xaa   :  { %v205_v30 = vadd.f32 %v302_v22, %v190_v29 }
  0xac   :  { %207 = vst [vmem:[%s395_s3 + $0x8] sm:$0xff] %v205_v30 }

// kernel: resnet_forward.53
= control target key start
LH: loop header
LB: loop body
LE: loop exit
PB: predicated region body
PF: predicated region fallthrough
CT: control target
= control target key end

     0   :  { %s433_s1 = inlined_call_operand.vmem [shape: bf16[1,128,256], index: 1, kind: input, shape index: {}]   ;;  %s434_s0 = inlined_call_operand.vmem [shape: bf16[1,16,128], index: 0, kind: input, shape index: {}]   ;;  %s435_s2 = inlined_call_operand.vmem [shape: f32[1,256], index: 2, kind: input, shape index: {}]   ;;  %s436_s3 = inlined_call_operand.vmem [shape: bf16[16,256], index: 3, kind: input, shape index: {}]   ;;  %s437_s4 = inlined_call_operand.vmem [shape: bf16[16,256], index: 4, kind: output, shape index: {}]  }
   0x1   :  { %v271_v0 = vld [vmem:[%s433_s1 + $0x70] sm:$0xf]  ;;  %v293_v1 = vld [vmem:[%s433_s1 + $0x74] sm:$0xf0]  ;;  %v292_v2 = vld [vmem:[%s433_s1 + $0x74] sm:$0xf] }
   0x2   :  { %v272_v3 = vor.u32 %v293_v1, %v271_v0  ;;  %v273_v4 = vld [vmem:[%s433_s1 + $0x78] sm:$0xf0]  ;;  %v263_v5 = vld [vmem:[%s433_s1 + $0x60] sm:$0xf]  ;;  %v291_v6 = vld [vmem:[%s433_s1 + $0x64] sm:$0xf0] }
   0x3   :  { %v276_v7 = vor.u32 %v292_v2, %v273_v4  ;;  %v290_v8 = vld [vmem:[%s433_s1 + $0x64] sm:$0xf]  ;;  %v265_v9 = vld [vmem:[%s433_s1 + $0x68] sm:$0xf0]  ;;  %v264_v10 = vor.u32 %v291_v6, %v263_v5  ;;  %v255_v12 = vld [vmem:[%s433_s1 + $0x50] sm:$0xf] }
   0x4   :  { %135 = vmatpush.bf16.msra.mxu0 %v272_v3  ;;  %v268_v11 = vor.u32 %v290_v8, %v265_v9  ;;  %v289_v13 = vld [vmem:[%s433_s1 + $0x54] sm:$0xf0]  ;;  %v288_v14 = vld [vmem:[%s433_s1 + $0x54] sm:$0xf]  ;;  %v257_v15 = vld [vmem:[%s433_s1 + $0x58] sm:$0xf0] }
   0x5   :  { %149 = vmatpush.bf16.msra.mxu1 %v276_v7  ;;  %v256_v16 = vor.u32 %v289_v13, %v255_v12  ;;  %v260_v17 = vor.u32 %v288_v14, %v257_v15  ;;  %v247_v18 = vld [vmem:[%s433_s1 + $0x40] sm:$0xf]  ;;  %v287_v19 = vld [vmem:[%s433_s1 + $0x44] sm:$0xf0]  ;;  %v286_v20 = vld [vmem:[%s433_s1 + $0x44] sm:$0xf] }
   0x6   :  { %v249_v21 = vld [vmem:[%s433_s1 + $0x48] sm:$0xf0]  ;;  %v248_v22 = vor.u32 %v287_v19, %v247_v18  ;;  %v239_v24 = vld [vmem:[%s433_s1 + $0x30] sm:$0xf]  ;;  %v285_v25 = vld [vmem:[%s433_s1 + $0x34] sm:$0xf0] }
   0x7   :  { %v252_v23 = vor.u32 %v286_v20, %v249_v21  ;;  %v284_v26 = vld [vmem:[%s433_s1 + $0x34] sm:$0xf]  ;;  %v241_v27 = vld [vmem:[%s433_s1 + $0x38] sm:$0xf0]  ;;  %v240_v28 = vor.u32 %v285_v25, %v239_v24  ;;  %v231_v30 = vld [vmem:[%s433_s1 + $0x20] sm:$0xf] }
   0x8   :  { %136 = vmatpush.bf16.msra.mxu0 %v264_v10  ;;  %v244_v29 = vor.u32 %v284_v26, %v241_v27  ;;  %v283_v31 = vld [vmem:[%s433_s1 + $0x24] sm:$0xf0]  ;;  %v282_v32 = vld [vmem:[%s433_s1 + $0x24] sm:$0xf]  ;;  %v233_v33 = vld [vmem:[%s433_s1 + $0x28] sm:$0xf0] }
   0x9   :  { %150 = vmatpush.bf16.msra.mxu1 %v268_v11  ;;  %v232_v34 = vor.u32 %v283_v31, %v231_v30  ;;  %v236_v35 = vor.u32 %v282_v32, %v233_v33  ;;  %v223_v36 = vld [vmem:[%s433_s1 + $0x10] sm:$0xf]  ;;  %v281_v37 = vld [vmem:[%s433_s1 + $0x14] sm:$0xf0]  ;;  %v280_v38 = vld [vmem:[%s433_s1 + $0x14] sm:$0xf] }
   0xa   :  { %v225_v39 = vld [vmem:[%s433_s1 + $0x18] sm:$0xf0]  ;;  %v224_v40 = vor.u32 %v281_v37, %v223_v36  ;;  %v215_v42 = vld [vmem:[%s433_s1] sm:$0xf]  ;;  %v279_v43 = vld [vmem:[%s433_s1 + $0x4] sm:$0xf0] }
   0xb   :  { %v228_v41 = vor.u32 %v280_v38, %v225_v39  ;;  %v278_v44 = vld [vmem:[%s433_s1 + $0x4] sm:$0xf]  ;;  %v217_v45 = vld [vmem:[%s433_s1 + $0x8] sm:$0xf0]  ;;  %v216_v46 = vor.u32 %v279_v43, %v215_v42  ;;  %v177_v49 = vld [vmem:[%s435_s2] sm:$0x3] }
   0xc   :  { %137 = vmatpush.bf16.msra.mxu0 %v256_v16  ;;  %v220_v47 = vor.u32 %v278_v44, %v217_v45  ;;  %v277_v48 = vld [vmem:[%s434_s0] sm:$0xff]  ;;  %v179_v51 = vperm.slane %v177_v49, 0  ;;  %v180_v52 = vperm.slane %v177_v49, 1  ;;  %v188_v61 = vld [vmem:[%s436_s3 + $0x8] sm:$0xff] }
   0xd   :  { %151 = vmatpush.bf16.msra.mxu1 %v260_v17  ;;  %v187_v50 = vld [vmem:[%s436_s3] sm:$0xff]  ;;  %v191_v0 = vunpack.c.l.bf16 %v188_v61  ;;  %v192_v3 = vunpack.c.h.bf16 %v188_v61 }
   0xe   :  { %v189_v53 = vunpack.c.l.bf16 %v187_v50  ;;  %v190_v55 = vunpack.c.h.bf16 %v187_v50 }
  0x10   :  { %138 = vmatpush.bf16.msra.mxu0 %v248_v22 }
  0x11   :  { %152 = vmatpush.bf16.msra.mxu1 %v252_v23 }
  0x14   :  { %139 = vmatpush.bf16.msra.mxu0 %v240_v28 }
  0x15   :  { %153 = vmatpush.bf16.msra.mxu1 %v244_v29 }
  0x18   :  { %140 = vmatpush.bf16.msra.mxu0 %v232_v34 }
  0x19   :  { %154 = vmatpush.bf16.msra.mxu1 %v236_v35 }
  0x1c   :  { %141 = vmatpush.bf16.msra.mxu0 %v224_v40 }
  0x1d   :  { %155 = vmatpush.bf16.msra.mxu1 %v228_v41 }
  0x20   :  { %142 = vmatpush.bf16.msra.mxu0 %v216_v46 }
  0x21   :  { %156 = vmatpush.bf16.msra.mxu1 %v220_v47 }
  0x23   :  { %143 = vmatmul.bf16.vlgmr.msra.gmra.mxu0 %v277_v48 }
  0x24   :  { %157 = vmatmul.bf16.vlgmr.msra.gmra.mxu1 %v277_v48 }
  0xa0   :  { %v144_v54 = vpop.f32.mrf.mxu0 }
  0xa1   :  { %v183_v56 = vadd.f32 %v179_v51, %v144_v54  ;;  %v158_v57 = vpop.f32.mrf.mxu1 }
  0xa2   :  { %v184_v58 = vadd.f32 %v180_v52, %v158_v57 }
  0xa3   :  { %v193_v59 = vadd.f32 %v189_v53, %v183_v56 }
  0xa4   :  { %v194_v60 = vadd.f32 %v190_v55, %v184_v58 }
  0xa5   :  { %v197_v62 = vmax.f32 %v193_v59, 0.0 }
  0xa6   :  { %v198_v63 = vmax.f32 %v194_v60, 0.0 }
  0xa8   :  { %v201_v1 = vpack.c.bf16 %v198_v63, %v197_v62  ;;  %v146_v2 = vpop.f32.mrf.mxu0 }
  0xa9   :  { %v185_v4 = vadd.f32 %v179_v51, %v146_v2  ;;  %v160_v5 = vpop.f32.mrf.mxu1 }
  0xaa   :  { %203 = vst [vmem:[%s437_s4] sm:$0xff] %v201_v1  ;;  %v186_v6 = vadd.f32 %v180_v52, %v160_v5 }
  0xab   :  { %v195_v7 = vadd.f32 %v191_v0, %v185_v4 }
  0xac   :  { %v196_v8 = vadd.f32 %v192_v3, %v186_v6 }
  0xad   :  { %v199_v9 = vmax.f32 %v195_v7, 0.0 }
  0xae   :  { %v200_v10 = vmax.f32 %v196_v8, 0.0 }
  0xb0   :  { %v202_v11 = vpack.c.bf16 %v200_v10, %v199_v9 }
  0xb2   :  { %204 = vst [vmem:[%s437_s4 + $0x8] sm:$0xff] %v202_v11 }

</bundles_post_ra>
